<compile_context>
chip_gen: v5e
topology: v5e:2x2
jax: 0.10.0
libtpu: 0.0.40
codegen_flags: <defaults>
</compile_context>

<pallas_src>
import functools
import math

import jax
import jax.numpy as jnp
from jax.experimental import pallas as pl
from jax.experimental.pallas import tpu as pltpu

NEG = -1e9                      # additive mask value (matches torch masking)
BF16 = jnp.bfloat16

ROW_TILES = (512, 256, 128, 64, 32, 16, 8)   # sublane-dim tile candidates
LANE_TILES = (512, 256, 128)                 # lane-dim tile candidates (256-first for v6e/v7x MXU)


def _round_up(x, m):
    return ((x + m - 1) // m) * m


def _pick(dim, candidates):
    """Largest candidate tile that evenly divides `dim`, else the full dim."""
    for c in candidates:
        if c <= dim and dim % c == 0:
            return c
    return dim


def _vmem_capacity_bytes():
    try:
        return int(pltpu.get_tpu_info().vmem_capacity_bytes)
    except Exception:
        return 64 * 1024 * 1024


# Scoped-VMEM limit with headroom: 48 MiB on v7x (64 MiB), 96 MiB on v5e/v6e.
_VMEM_LIMIT = int(min(_vmem_capacity_bytes() * 3 // 4, 100 * 1024 * 1024))


def _activate(y, act):
    if act == "gelu":          # exact (erf) GELU — HF BERT default
        return 0.5 * y * (1.0 + jax.lax.erf(y * (1.0 / math.sqrt(2.0))))
    if act == "relu":          # nn.TransformerDecoderLayer default
        return jnp.maximum(y, 0.0)
    return y


def _ln_f32(y, g, b, n_real, eps):
    """LayerNorm over the last (padded) axis using sums over the real width.

    Assumes padded lanes of `y` are zero and `g`/`b` are zero-padded, so the
    padded lanes of the result are exactly zero again.
    """
    inv_n = 1.0 / float(n_real)
    mu = jnp.sum(y, axis=-1, keepdims=True) * inv_n
    ex2 = jnp.sum(y * y, axis=-1, keepdims=True) * inv_n
    var = jnp.maximum(ex2 - mu * mu, 0.0)
    return (y - mu) * jax.lax.rsqrt(var + eps) * g + b


def _mha_out_block(qsrc, q_off, ksrc, k_off, vsrc, v_off, wo, bias, *,
                   heads, d, scale, causal):
    """All-head attention + output projection, accumulated per head.

    qsrc/ksrc/vsrc are bf16 values; per-head lane slices are taken in-kernel
    (no HBM transposes).  Returns sum_h softmax(q_h k_h^T) v_h @ Wo[h] in f32,
    shape (Sq, Hp) — padded output lanes are zero because Wo's padded columns
    are zero.
    """
    Sq, Sk = qsrc.shape[0], ksrc.shape[0]
    cmask = None
    if causal:
        qi = jax.lax.broadcasted_iota(jnp.int32, (Sq, Sk), 0)
        kj = jax.lax.broadcasted_iota(jnp.int32, (Sq, Sk), 1)
        cmask = jnp.where(kj > qi, NEG, 0.0)
    y = None
    for h in range(heads):
        qh = qsrc[:, q_off + h * d: q_off + (h + 1) * d]
        kh = ksrc[:, k_off + h * d: k_off + (h + 1) * d]
        vh = vsrc[:, v_off + h * d: v_off + (h + 1) * d]
        s = jax.lax.dot_general(qh, kh, (((1,), (1,)), ((), ())),
                                preferred_element_type=jnp.float32) * scale
        if bias is not None:
            s = s + bias
        if cmask is not None:
            s = s + cmask
        m = jnp.max(s, axis=-1, keepdims=True)
        p = jnp.exp(s - m)
        l = jnp.sum(p, axis=-1, keepdims=True)
        o = jnp.dot(p.astype(vh.dtype), vh, preferred_element_type=jnp.float32)
        o = o * pl.reciprocal(l, approx=True)
        contrib = jnp.dot(o.astype(wo.dtype), wo[h * d:(h + 1) * d, :],
                          preferred_element_type=jnp.float32)
        y = contrib if y is None else y + contrib
    return y


# ----------------------------- Pallas kernels ------------------------------

def _linear_kernel(x_ref, w_ref, b_ref, o_ref, acc_ref, *, act):
    """out = act(x @ w + b); K-reduction over grid axis 2; f32 accumulator."""
    k = pl.program_id(2)
    prod = jnp.dot(x_ref[...], w_ref[...], preferred_element_type=jnp.float32)

    @pl.when(k == 0)
    def _():
        acc_ref[...] = prod           # init with the first dot (no zero fill)

    @pl.when(k != 0)
    def _():
        acc_ref[...] += prod

    @pl.when(k == pl.num_programs(2) - 1)
    def _():
        y = _activate(acc_ref[...] + b_ref[...], act)
        o_ref[...] = y.astype(o_ref.dtype)


def _matmul_res_ln_kernel(x_ref, w_ref, b_ref, r_ref, g_ref, bt_ref,
                          o_ref, acc_ref, *, eps, n_real):
    """out = LayerNorm(x @ w + b + residual)  (LN over full padded N)."""
    k = pl.program_id(1)
    prod = jnp.dot(x_ref[...], w_ref[...], preferred_element_type=jnp.float32)

    @pl.when(k == 0)
    def _():
        acc_ref[...] = prod

    @pl.when(k != 0)
    def _():
        acc_ref[...] += prod

    @pl.when(k == pl.num_programs(1) - 1)
    def _():
        y = acc_ref[...] + b_ref[...] + r_ref[...].astype(jnp.float32)
        o_ref[...] = _ln_f32(y, g_ref[...], bt_ref[...], n_real, eps).astype(o_ref.dtype)


def _ffn_res_ln_kernel(x_ref, w1_ref, b1_ref, w2_ref, b2_ref, r_ref,
                       g_ref, bt_ref, o_ref, *, act, eps, n_real):
    """out = LayerNorm(act(x @ w1 + b1) @ w2 + b2 + residual) in one kernel."""
    h = jnp.dot(x_ref[...], w1_ref[...], preferred_element_type=jnp.float32)
    h = _activate(h + b1_ref[...], act)
    y = jnp.dot(h.astype(w2_ref.dtype), w2_ref[...],
                preferred_element_type=jnp.float32)
    y = y + b2_ref[...] + r_ref[...].astype(jnp.float32)
    o_ref[...] = _ln_f32(y, g_ref[...], bt_ref[...], n_real, eps).astype(o_ref.dtype)


def _ln_kernel(x_ref, g_ref, b_ref, o_ref, *, eps, n_real):
    x = x_ref[...].astype(jnp.float32)
    o_ref[...] = _ln_f32(x, g_ref[...], b_ref[...], n_real, eps).astype(o_ref.dtype)


def _flash_attn_kernel(*refs, heads, d, H, Hp, q_off, k_off, v_off, scale,
                       causal, has_bias, tq, tk):
    """Flash attention: grid (B, Sq-tiles, Sk-tiles); online softmax per head.

    Consumes the packed QKV / KV buffers directly (per-head lane slices done
    in-kernel), writes a lane-dense (tq, Hp) output tile.
    """
    if has_bias:
        q_ref, kv_ref, b_ref, o_ref, m_ref, l_ref, acc_ref = refs
    else:
        q_ref, kv_ref, o_ref, m_ref, l_ref, acc_ref = refs
    kv_i = pl.program_id(2)

    @pl.when(kv_i == 0)
    def _():
        m_ref[...] = jnp.full_like(m_ref, NEG)
        l_ref[...] = jnp.zeros_like(l_ref)
        acc_ref[...] = jnp.zeros_like(acc_ref)

    extra = None
    if has_bias:
        extra = b_ref[0].astype(jnp.float32)                       # (1, tk)
    if causal:
        q_start = pl.program_id(1) * tq
        k_start = kv_i * tk
        qi = q_start + jax.lax.broadcasted_iota(jnp.int32, (tq, tk), 0)
        kj = k_start + jax.lax.broadcasted_iota(jnp.int32, (tq, tk), 1)
        cb = jnp.where(kj > qi, NEG, 0.0)
        extra = cb if extra is None else extra + cb

    qs = q_ref[0]                                                  # (tq, QW) bf16
    ks = kv_ref[0]                                                 # (tk, KW) bf16
    for h in range(heads):
        qh = qs[:, q_off + h * d: q_off + (h + 1) * d]
        kh = ks[:, k_off + h * d: k_off + (h + 1) * d]
        vh = ks[:, v_off + h * d: v_off + (h + 1) * d]
        s = jax.lax.dot_general(qh, kh, (((1,), (1,)), ((), ())),
                                preferred_element_type=jnp.float32) * scale
        if extra is not None:
            s = s + extra
        m_prev = m_ref[:, h:h + 1]
        m_new = jnp.maximum(m_prev, jnp.max(s, axis=-1, keepdims=True))
        alpha = jnp.exp(m_prev - m_new)
        p = jnp.exp(s - m_new)
        l_ref[:, h:h + 1] = alpha * l_ref[:, h:h + 1] \
            + jnp.sum(p, axis=-1, keepdims=True)
        pv = jnp.dot(p.astype(vh.dtype), vh, preferred_element_type=jnp.float32)
        acc_ref[:, h * d:(h + 1) * d] = alpha * acc_ref[:, h * d:(h + 1) * d] + pv
        m_ref[:, h:h + 1] = m_new

    @pl.when(kv_i == pl.num_programs(2) - 1)
    def _():
        for h in range(heads):
            inv = pl.reciprocal(l_ref[:, h:h + 1], approx=True)
            o_ref[0, :, h * d:(h + 1) * d] = \
                (acc_ref[:, h * d:(h + 1) * d] * inv).astype(o_ref.dtype)
        if Hp > H:     # keep padded lanes zero (lane-dense, deterministic store)
            o_ref[0, :, H:] = jnp.zeros((tq, Hp - H), o_ref.dtype)


def _enc_layer_kernel(h_ref, bias_ref, qkv_w, qkv_b, ao_w, ao_b, g1, be1,
                      w1, fb1, w2, fb2, g2, be2, o_ref,
                      *, heads, d, H, Hp, eps, act):
    """Whole BERT encoder layer for one batch element (small-config path)."""
    x = h_ref[0]                                                   # (S, Hp) bf16
    qkv = (jnp.dot(x, qkv_w[...], preferred_element_type=jnp.float32)
           + qkv_b[...]).astype(BF16)                              # (S, 3Hp)
    bias = bias_ref[0].astype(jnp.float32)                         # (1, S)
    attn = _mha_out_block(qkv, 0, qkv, Hp, qkv, 2 * Hp, ao_w[...], bias,
                          heads=heads, d=d, scale=1.0 / math.sqrt(d),
                          causal=False)                            # (S, Hp) f32
    y = attn + ao_b[...] + x.astype(jnp.float32)
    h1 = _ln_f32(y, g1[...], be1[...], H, eps)
    t = _activate(jnp.dot(h1.astype(BF16), w1[...],
                          preferred_element_type=jnp.float32) + fb1[...], act)
    y2 = jnp.dot(t.astype(BF16), w2[...], preferred_element_type=jnp.float32)
    y2 = y2 + fb2[...] + h1
    o_ref[0] = _ln_f32(y2, g2[...], be2[...], H, eps).astype(o_ref.dtype)


def _dec_layer_kernel(x_ref, mem_ref, sa_qkv_w, sa_qkv_b, sa_o_w, sa_o_b,
                      g1, be1, ca_q_w, ca_q_b, ca_kv_w, ca_kv_b, ca_o_w, ca_o_b,
                      g2, be2, ff1_w, ff1_b, ff2_w, ff2_b, g3, be3, o_ref,
                      *, heads, d, H, Hp, eps):
    """Whole Transformer decoder layer for one batch element (small-config path)."""
    x = x_ref[0]                                                   # (T, Hp) bf16
    mem = mem_ref[0]                                               # (S, Hp) bf16
    scale = 1.0 / math.sqrt(d)
    # self-attention (causal), post-norm
    qkv = (jnp.dot(x, sa_qkv_w[...], preferred_element_type=jnp.float32)
           + sa_qkv_b[...]).astype(BF16)
    sa = _mha_out_block(qkv, 0, qkv, Hp, qkv, 2 * Hp, sa_o_w[...], None,
                        heads=heads, d=d, scale=scale, causal=True)
    x1 = _ln_f32(sa + sa_o_b[...] + x.astype(jnp.float32), g1[...], be1[...], H, eps)
    # cross-attention over encoder memory
    q = (jnp.dot(x1.astype(BF16), ca_q_w[...], preferred_element_type=jnp.float32)
         + ca_q_b[...]).astype(BF16)
    kv = (jnp.dot(mem, ca_kv_w[...], preferred_element_type=jnp.float32)
          + ca_kv_b[...]).astype(BF16)
    ca = _mha_out_block(q, 0, kv, 0, kv, Hp, ca_o_w[...], None,
                        heads=heads, d=d, scale=scale, causal=False)
    x2 = _ln_f32(ca + ca_o_b[...] + x1, g2[...], be2[...], H, eps)
    # feed-forward (ReLU)
    t = jnp.maximum(jnp.dot(x2.astype(BF16), ff1_w[...],
                            preferred_element_type=jnp.float32) + ff1_b[...], 0.0)
    y = jnp.dot(t.astype(BF16), ff2_w[...], preferred_element_type=jnp.float32)
    x3 = _ln_f32(y + ff2_b[...] + x2, g3[...], be3[...], H, eps)
    o_ref[0] = x3.astype(o_ref.dtype)


# ------------------------------ kernel wrappers -----------------------------

def linear(x, w, b, act="none", out_dtype=None):
    """x:(...,K) @ w:(K,N)[bf16] + b:(1,N)[f32], optional activation.  K,N padded."""
    lead = x.shape[:-1]
    K, N = x.shape[-1], w.shape[-1]
    M = int(math.prod(lead)) if lead else 1
    x2 = x.reshape(M, K)
    tm, tn, tk = _pick(M, ROW_TILES), _pick(N, LANE_TILES), _pick(K, LANE_TILES)
    out = pl.pallas_call(
        functools.partial(_linear_kernel, act=act),
        out_shape=jax.ShapeDtypeStruct((M, N), out_dtype or x.dtype),
        grid=(M // tm, N // tn, K // tk),
        in_specs=[pl.BlockSpec((tm, tk), lambda i, j, k: (i, k)),
                  pl.BlockSpec((tk, tn), lambda i, j, k: (k, j)),
                  pl.BlockSpec((1, tn), lambda i, j, k: (0, j))],
        out_specs=pl.BlockSpec((tm, tn), lambda i, j, k: (i, j)),
        scratch_shapes=[pltpu.VMEM((tm, tn), jnp.float32)],
        compiler_params=pltpu.CompilerParams(
            dimension_semantics=("parallel", "parallel", "arbitrary"),
            vmem_limit_bytes=_VMEM_LIMIT),
        cost_estimate=pl.CostEstimate(
            flops=2 * M * N * K,
            transcendentals=M * N if act != "none" else 0,
            bytes_accessed=(M * K + K * N + M * N) * 2),
    )(x2, w, b)
    return out.reshape(*lead, N)


def matmul_res_ln(x, w, b, res, g, beta, *, eps, n_real, out_dtype=None):
    """LayerNorm(x @ w + b + res) fused (N kept whole for LN; N padded to 128)."""
    lead = x.shape[:-1]
    K, N = x.shape[-1], w.shape[-1]
    M = int(math.prod(lead)) if lead else 1
    x2, r2 = x.reshape(M, K), res.reshape(M, N)
    tm, tk = _pick(M, ROW_TILES), _pick(K, LANE_TILES)
    out = pl.pallas_call(
        functools.partial(_matmul_res_ln_kernel, eps=eps, n_real=n_real),
        out_shape=jax.ShapeDtypeStruct((M, N), out_dtype or x.dtype),
        grid=(M // tm, K // tk),
        # TODO(synk): grid-invariant bias/gamma/beta specs could use
        # pipeline_mode=pl.Buffered(1) to halve their VMEM footprint.
        in_specs=[pl.BlockSpec((tm, tk), lambda i, k: (i, k)),
                  pl.BlockSpec((tk, N), lambda i, k: (k, 0)),
                  pl.BlockSpec((1, N), lambda i, k: (0, 0)),
                  pl.BlockSpec((tm, N), lambda i, k: (i, 0)),
                  pl.BlockSpec((1, N), lambda i, k: (0, 0)),
                  pl.BlockSpec((1, N), lambda i, k: (0, 0))],
        out_specs=pl.BlockSpec((tm, N), lambda i, k: (i, 0)),
        scratch_shapes=[pltpu.VMEM((tm, N), jnp.float32)],
        compiler_params=pltpu.CompilerParams(
            dimension_semantics=("parallel", "arbitrary"),
            vmem_limit_bytes=_VMEM_LIMIT),
        cost_estimate=pl.CostEstimate(flops=2 * M * N * K, transcendentals=0,
                                      bytes_accessed=(M * K + K * N + 2 * M * N) * 2),
    )(x2, w, b, r2, g, beta)
    return out.reshape(*lead, N)


def ffn_res_ln(x, w1, b1, w2, b2, res, g, beta, *, eps, act, n_real, out_dtype=None):
    """Whole FFN block: LayerNorm(act(x@w1+b1)@w2 + b2 + res) in one kernel."""
    lead = x.shape[:-1]
    K, I, N = x.shape[-1], w1.shape[-1], w2.shape[-1]
    M = int(math.prod(lead)) if lead else 1
    tm = _pick(M, ROW_TILES)
    while tm % 2 == 0 and tm > 8 and tm * I * 4 > (2 << 20):
        tm //= 2                                   # cap the (tm, I) f32 intermediate
    # VMEM residency: weights double-buffered + activation blocks + f32 live values.
    wbytes = (K * I + I * N) * 2 * 2
    actbytes = 2 * tm * (K + 2 * N) * 2
    livebytes = tm * I * 4 + 2 * tm * N * 4
    if wbytes + actbytes + livebytes > _VMEM_LIMIT // 2:
        hmid = linear(x, w1, b1, act=act)
        return matmul_res_ln(hmid, w2, b2, res, g, beta, eps=eps, n_real=n_real,
                             out_dtype=out_dtype)
    x2, r2 = x.reshape(M, K), res.reshape(M, N)
    out = pl.pallas_call(
        functools.partial(_ffn_res_ln_kernel, act=act, eps=eps, n_real=n_real),
        out_shape=jax.ShapeDtypeStruct((M, N), out_dtype or x.dtype),
        grid=(M // tm,),
        in_specs=[pl.BlockSpec((tm, K), lambda i: (i, 0)),
                  pl.BlockSpec((K, I), lambda i: (0, 0)),
                  pl.BlockSpec((1, I), lambda i: (0, 0)),
                  pl.BlockSpec((I, N), lambda i: (0, 0)),
                  pl.BlockSpec((1, N), lambda i: (0, 0)),
                  pl.BlockSpec((tm, N), lambda i: (i, 0)),
                  pl.BlockSpec((1, N), lambda i: (0, 0)),
                  pl.BlockSpec((1, N), lambda i: (0, 0))],
        out_specs=pl.BlockSpec((tm, N), lambda i: (i, 0)),
        compiler_params=pltpu.CompilerParams(
            dimension_semantics=("parallel",), vmem_limit_bytes=_VMEM_LIMIT),
        cost_estimate=pl.CostEstimate(flops=2 * M * I * (K + N), transcendentals=M * I,
                                      bytes_accessed=(M * K + K * I + I * N + 2 * M * N) * 2),
    )(x2, w1, b1, w2, b2, r2, g, beta)
    return out.reshape(*lead, N)


def layer_norm(x, g, b, *, eps, n_real, out_dtype=None):
    lead = x.shape[:-1]
    N = x.shape[-1]
    M = int(math.prod(lead)) if lead else 1
    x2 = x.reshape(M, N)
    tm = _pick(M, ROW_TILES)
    out = pl.pallas_call(
        functools.partial(_ln_kernel, eps=eps, n_real=n_real),
        out_shape=jax.ShapeDtypeStruct((M, N), out_dtype or x.dtype),
        grid=(M // tm,),
        in_specs=[pl.BlockSpec((tm, N), lambda i: (i, 0)),
                  pl.BlockSpec((1, N), lambda i: (0, 0)),
                  pl.BlockSpec((1, N), lambda i: (0, 0))],
        out_specs=pl.BlockSpec((tm, N), lambda i: (i, 0)),
        compiler_params=pltpu.CompilerParams(
            dimension_semantics=("parallel",), vmem_limit_bytes=_VMEM_LIMIT),
    )(x2, g, b)
    return out.reshape(*lead, N)


def flash_mha(q_src, kv_src, bias, *, heads, d, H, Hp, q_off, k_off, v_off, causal):
    """Tiled multi-head attention reading packed QKV/KV buffers directly.

    q_src:(B,Sq,QW), kv_src:(B,Sk,KW) bf16; bias None or (B,1,Sk) f32.
    Output (B,Sq,Hp) bf16 with padded lanes zero.
    """
    B, Sq, QW = q_src.shape
    Sk, KW = kv_src.shape[1], kv_src.shape[2]
    tq, tk = _pick(Sq, ROW_TILES), _pick(Sk, ROW_TILES)
    has_bias = bias is not None
    in_specs = [pl.BlockSpec((1, tq, QW), lambda b, qi, ki: (b, qi, 0)),
                pl.BlockSpec((1, tk, KW), lambda b, qi, ki: (b, ki, 0))]
    args = [q_src, kv_src]
    if has_bias:
        in_specs.append(pl.BlockSpec((1, 1, tk), lambda b, qi, ki: (b, 0, ki)))
        args.append(bias)
    # TODO(synk): for self-attention the KV tile re-reads the Q columns of the
    # packed buffer (3Hp wide); splitting the QKV projection into Q / KV
    # outputs would remove that extra HBM traffic.
    out = pl.pallas_call(
        functools.partial(_flash_attn_kernel, heads=heads, d=d, H=H, Hp=Hp,
                          q_off=q_off, k_off=k_off, v_off=v_off,
                          scale=1.0 / math.sqrt(d), causal=causal,
                          has_bias=has_bias, tq=tq, tk=tk),
        out_shape=jax.ShapeDtypeStruct((B, Sq, Hp), q_src.dtype),
        grid=(B, Sq // tq, Sk // tk),
        in_specs=in_specs,
        out_specs=pl.BlockSpec((1, tq, Hp), lambda b, qi, ki: (b, qi, 0)),
        scratch_shapes=[pltpu.VMEM((tq, heads), jnp.float32),
                        pltpu.VMEM((tq, heads), jnp.float32),
                        pltpu.VMEM((tq, Hp), jnp.float32)],
        compiler_params=pltpu.CompilerParams(
            dimension_semantics=("parallel", "parallel", "arbitrary"),
            vmem_limit_bytes=_VMEM_LIMIT),
        cost_estimate=pl.CostEstimate(
            flops=4 * B * heads * Sq * Sk * d,
            transcendentals=B * heads * Sq * Sk,
            bytes_accessed=(int(q_src.size) + int(kv_src.size) + B * Sq * Hp) * 2),
    )(*args)
    return out


def _batch_spec(a):
    nd = a.ndim

    def imap(b):
        return (b,) + (0,) * (nd - 1)

    return pl.BlockSpec((1,) + a.shape[1:], imap)


def _whole_spec(a):
    nd = a.ndim

    def imap(b):
        return (0,) * nd

    return pl.BlockSpec(a.shape, imap)


def fused_layer_call(kernel_fn, data_args, weights, static_kwargs, out_like):
    """One pallas_call per transformer layer; grid=(B,), all weights VMEM-resident."""
    B = data_args[0].shape[0]
    rows = data_args[0].shape[0] * data_args[0].shape[1]
    mm = sum(int(w.size) for w in weights if w.ndim == 2 and w.shape[0] > 1)
    bytes_accessed = (sum(int(w.size) * w.dtype.itemsize for w in weights)
                      + sum(int(a.size) * a.dtype.itemsize for a in data_args)
                      + int(out_like.size) * out_like.dtype.itemsize)
    return pl.pallas_call(
        functools.partial(kernel_fn, **static_kwargs),
        out_shape=jax.ShapeDtypeStruct(out_like.shape, out_like.dtype),
        grid=(B,),
        in_specs=[_batch_spec(a) for a in data_args] + [_whole_spec(w) for w in weights],
        out_specs=_batch_spec(out_like),
        compiler_params=pltpu.CompilerParams(
            dimension_semantics=("parallel",), vmem_limit_bytes=_VMEM_LIMIT),
        cost_estimate=pl.CostEstimate(flops=2 * rows * mm, transcendentals=rows * 8,
                                      bytes_accessed=int(bytes_accessed)),
    )(*data_args, *weights)


def _fused_layer_ok(weights, rows_q, rows_kv, Hp, inner):
    """Rough VMEM budget check for the per-layer fused path (double-buffered)."""
    wb = sum(int(a.size) * a.dtype.itemsize for a in weights)
    act = 4 * rows_q * (4 * Hp + inner) + 2 * rows_kv * Hp + 8 * rows_q * rows_kv
    return 2 * (wb + act) < _VMEM_LIMIT // 2


# ------------------------------ parameter setup -----------------------------

def _dense(key, k_in, k_out, scale=0.02):
    kw, kb = jax.random.split(key)
    return {"w": scale * jax.random.normal(kw, (k_in, k_out), jnp.float32),
            "b": scale * jax.random.normal(kb, (k_out,), jnp.float32)}


def _ln(h):
    return {"g": jnp.ones((h,), jnp.float32), "b": jnp.zeros((h,), jnp.float32)}


def init_params(key, cfg):
    H, I = cfg["hidden"], cfg["intermediate"]
    keys = iter(jax.random.split(key, 256))
    p = {
        "emb_x": 0.02 * jax.random.normal(next(keys), (cfg["vocab_x"], H // 2), jnp.float32),
        "emb_y": 0.02 * jax.random.normal(next(keys), (cfg["vocab_y"], H // 2), jnp.float32),
        "pos_emb": 0.02 * jax.random.normal(next(keys), (cfg["max_pos"], H), jnp.float32),
        # HF BertEmbeddings internals (inputs_embeds path still adds these)
        "bert_pos_emb": 0.02 * jax.random.normal(next(keys), (cfg["max_pos"], H), jnp.float32),
        "bert_tok_type_emb": 0.02 * jax.random.normal(next(keys), (2, H), jnp.float32),
        "bert_emb_ln": _ln(H),
        "enc_layers": [], "dec_layers": [],
        "out_x": _dense(next(keys), H, cfg["vocab_x"]),
        "out_y": _dense(next(keys), H, cfg["vocab_y"]),
    }
    for _ in range(cfg["enc_layers"]):
        p["enc_layers"].append({
            "q": _dense(next(keys), H, H), "k": _dense(next(keys), H, H),
            "v": _dense(next(keys), H, H), "ao": _dense(next(keys), H, H),
            "ln1": _ln(H),
            "inter": _dense(next(keys), H, I), "out": _dense(next(keys), I, H),
            "ln2": _ln(H),
        })
    for _ in range(cfg["dec_layers"]):
        p["dec_layers"].append({
            "sa_q": _dense(next(keys), H, H), "sa_k": _dense(next(keys), H, H),
            "sa_v": _dense(next(keys), H, H), "sa_o": _dense(next(keys), H, H),
            "ln1": _ln(H),
            "ca_q": _dense(next(keys), H, H), "ca_k": _dense(next(keys), H, H),
            "ca_v": _dense(next(keys), H, H), "ca_o": _dense(next(keys), H, H),
            "ln2": _ln(H),
            "ff1": _dense(next(keys), H, 4 * H), "ff2": _dense(next(keys), 4 * H, H),
            "ln3": _ln(H),
        })
    return p


def prepare_params(p, cfg):
    """One-time fusion / zero-padding (to 128-lane multiples) / bf16 casting."""
    H, I = cfg["hidden"], cfg["intermediate"]
    D = 4 * H
    Hp, Ip, Dp = _round_up(H, 128), _round_up(I, 128), _round_up(D, 128)

    def pad_w(d, rp, cp):
        w = d["w"]
        return jnp.pad(w, ((0, rp - w.shape[0]), (0, cp - w.shape[1]))).astype(BF16)

    def pad_b(d, cp):
        b = d["b"]
        return jnp.pad(b, (0, cp - b.shape[0])).reshape(1, -1).astype(jnp.float32)

    def pad_vec(v, cp):
        return jnp.pad(v, (0, cp - v.shape[0])).reshape(1, -1).astype(jnp.float32)

    def pad_ln(d):
        return (pad_vec(d["g"], Hp), pad_vec(d["b"], Hp))

    def pack(ds, rp, seg):
        # Each segment gets its own 128-aligned lane slot (q/k/v offsets = i*seg).
        W = jnp.zeros((rp, seg * len(ds)), jnp.float32)
        Bv = jnp.zeros((seg * len(ds),), jnp.float32)
        for i, d in enumerate(ds):
            w, b = d["w"], d["b"]
            W = W.at[: w.shape[0], i * seg: i * seg + w.shape[1]].set(w)
            Bv = Bv.at[i * seg: i * seg + b.shape[0]].set(b)
        return W.astype(BF16), Bv.reshape(1, -1).astype(jnp.float32)

    out = {
        "H": H, "Hp": Hp, "Ip": Ip, "Dp": Dp,
        "emb_x": p["emb_x"], "emb_y": p["emb_y"], "pos_emb": p["pos_emb"],
        "bert_pos_emb": p["bert_pos_emb"],
        "bert_tok_type_emb": p["bert_tok_type_emb"],
        "bert_emb_ln": pad_ln(p["bert_emb_ln"]),
        "enc_layers": [], "dec_layers": [],
    }
    for lp in p["enc_layers"]:
        qkv_w, qkv_b = pack([lp["q"], lp["k"], lp["v"]], Hp, Hp)
        out["enc_layers"].append({
            "qkv_w": qkv_w, "qkv_b": qkv_b,
            "ao_w": pad_w(lp["ao"], Hp, Hp), "ao_b": pad_b(lp["ao"], Hp),
            "ln1": pad_ln(lp["ln1"]),
            "w1": pad_w(lp["inter"], Hp, Ip), "b1": pad_b(lp["inter"], Ip),
            "w2": pad_w(lp["out"], Ip, Hp), "b2": pad_b(lp["out"], Hp),
            "ln2": pad_ln(lp["ln2"]),
        })
    for lp in p["dec_layers"]:
        sa_qkv_w, sa_qkv_b = pack([lp["sa_q"], lp["sa_k"], lp["sa_v"]], Hp, Hp)
        ca_kv_w, ca_kv_b = pack([lp["ca_k"], lp["ca_v"]], Hp, Hp)
        out["dec_layers"].append({
            "sa_qkv_w": sa_qkv_w, "sa_qkv_b": sa_qkv_b,
            "sa_o_w": pad_w(lp["sa_o"], Hp, Hp), "sa_o_b": pad_b(lp["sa_o"], Hp),
            "ln1": pad_ln(lp["ln1"]),
            "ca_q_w": pad_w(lp["ca_q"], Hp, Hp), "ca_q_b": pad_b(lp["ca_q"], Hp),
            "ca_kv_w": ca_kv_w, "ca_kv_b": ca_kv_b,
            "ca_o_w": pad_w(lp["ca_o"], Hp, Hp), "ca_o_b": pad_b(lp["ca_o"], Hp),
            "ln2": pad_ln(lp["ln2"]),
            "ff1_w": pad_w(lp["ff1"], Hp, Dp), "ff1_b": pad_b(lp["ff1"], Dp),
            "ff2_w": pad_w(lp["ff2"], Dp, Hp), "ff2_b": pad_b(lp["ff2"], Hp),
            "ln3": pad_ln(lp["ln3"]),
        })
    # Fused, lane-dense vocab head: concat vocab_x/vocab_y and pad to 128 lanes.
    Vx, Vy = cfg["vocab_x"], cfg["vocab_y"]
    Vp = _round_up(Vx + Vy, 128)
    wcat = jnp.concatenate([p["out_x"]["w"], p["out_y"]["w"]], axis=1)
    bcat = jnp.concatenate([p["out_x"]["b"], p["out_y"]["b"]])
    out["head_w"] = jnp.pad(wcat, ((0, Hp - H), (0, Vp - (Vx + Vy)))).astype(BF16)
    out["head_b"] = jnp.pad(bcat, (0, Vp - (Vx + Vy))).reshape(1, -1).astype(jnp.float32)
    return out


# ------------------------------- forward pass -------------------------------

def forward(pp, cfg, input_ids_x, input_ids_y, attention_mask,
            decoder_input_ids_x, decoder_input_ids_y, fuse_layers=None):
    B, S = input_ids_x.shape
    T = decoder_input_ids_x.shape[1]
    H, Hp = pp["H"], pp["Hp"]
    heads, heads_d = cfg["enc_heads"], cfg["dec_heads"]
    d_enc, d_dec = H // heads, H // heads_d

    # ---- encoder embeddings (outer model) + BertEmbeddings internals ----
    enc_emb = jnp.concatenate(
        [jnp.take(pp["emb_x"], input_ids_x, axis=0),
         jnp.take(pp["emb_y"], input_ids_y, axis=0)], axis=-1)
    enc_emb = enc_emb + pp["pos_emb"][:S][None]
    h = enc_emb + pp["bert_pos_emb"][:S][None] + pp["bert_tok_type_emb"][0][None, None]
    h = jnp.pad(h, ((0, 0), (0, 0), (0, Hp - H)))           # lane-dense padded stream
    h = layer_norm(h, *pp["bert_emb_ln"], eps=1e-12, n_real=H, out_dtype=BF16)

    # padding mask -> additive bias, un-broadcast (B, 1, S)
    bias_enc = ((1.0 - attention_mask.astype(jnp.float32)) * NEG).reshape(B, 1, S)

    for lp in pp["enc_layers"]:
        enc_weights = [lp["qkv_w"], lp["qkv_b"], lp["ao_w"], lp["ao_b"],
                       lp["ln1"][0], lp["ln1"][1], lp["w1"], lp["b1"],
                       lp["w2"], lp["b2"], lp["ln2"][0], lp["ln2"][1]]
        fuse = (_fused_layer_ok(enc_weights, S, S, Hp, lp["w1"].shape[1])
                if fuse_layers is None else fuse_layers)
        if fuse:
            h = fused_layer_call(
                _enc_layer_kernel, [h, bias_enc], enc_weights,
                dict(heads=heads, d=d_enc, H=H, Hp=Hp, eps=1e-12, act="gelu"),
                out_like=h)
        else:
            qkv = linear(h, lp["qkv_w"], lp["qkv_b"])
            ctx = flash_mha(qkv, qkv, bias_enc, heads=heads, d=d_enc, H=H, Hp=Hp,
                            q_off=0, k_off=Hp, v_off=2 * Hp, causal=False)
            h = matmul_res_ln(ctx, lp["ao_w"], lp["ao_b"], h, *lp["ln1"],
                              eps=1e-12, n_real=H)
            h = ffn_res_ln(h, lp["w1"], lp["b1"], lp["w2"], lp["b2"], h,
                           *lp["ln2"], eps=1e-12, act="gelu", n_real=H)
    memory = h

    # ---- decoder embeddings ----
    dec_emb = jnp.concatenate(
        [jnp.take(pp["emb_x"], decoder_input_ids_x, axis=0),
         jnp.take(pp["emb_y"], decoder_input_ids_y, axis=0)], axis=-1)
    dec_emb = dec_emb + pp["pos_emb"][:T][None]
    x = jnp.pad(dec_emb, ((0, 0), (0, 0), (0, Hp - H))).astype(BF16)

    for lp in pp["dec_layers"]:
        dec_weights = [lp["sa_qkv_w"], lp["sa_qkv_b"], lp["sa_o_w"], lp["sa_o_b"],
                       lp["ln1"][0], lp["ln1"][1],
                       lp["ca_q_w"], lp["ca_q_b"], lp["ca_kv_w"], lp["ca_kv_b"],
                       lp["ca_o_w"], lp["ca_o_b"], lp["ln2"][0], lp["ln2"][1],
                       lp["ff1_w"], lp["ff1_b"], lp["ff2_w"], lp["ff2_b"],
                       lp["ln3"][0], lp["ln3"][1]]
        fuse = (_fused_layer_ok(dec_weights, T, S, Hp, lp["ff1_w"].shape[1])
                if fuse_layers is None else fuse_layers)
        if fuse:
            x = fused_layer_call(
                _dec_layer_kernel, [x, memory], dec_weights,
                dict(heads=heads_d, d=d_dec, H=H, Hp=Hp, eps=1e-5),
                out_like=x)
        else:
            qkv = linear(x, lp["sa_qkv_w"], lp["sa_qkv_b"])
            sa = flash_mha(qkv, qkv, None, heads=heads_d, d=d_dec, H=H, Hp=Hp,
                           q_off=0, k_off=Hp, v_off=2 * Hp, causal=True)
            x = matmul_res_ln(sa, lp["sa_o_w"], lp["sa_o_b"], x, *lp["ln1"],
                              eps=1e-5, n_real=H)
            q = linear(x, lp["ca_q_w"], lp["ca_q_b"])
            kv = linear(memory, lp["ca_kv_w"], lp["ca_kv_b"])
            ca = flash_mha(q, kv, None, heads=heads_d, d=d_dec, H=H, Hp=Hp,
                           q_off=0, k_off=0, v_off=Hp, causal=False)
            x = matmul_res_ln(ca, lp["ca_o_w"], lp["ca_o_b"], x, *lp["ln2"],
                              eps=1e-5, n_real=H)
            x = ffn_res_ln(x, lp["ff1_w"], lp["ff1_b"], lp["ff2_w"], lp["ff2_b"],
                           x, *lp["ln3"], eps=1e-5, act="relu", n_real=H)

    # fused, 128-lane-padded vocab heads; split/unpad afterwards
    logits = linear(x, pp["head_w"], pp["head_b"], out_dtype=jnp.float32)
    Vx, Vy = cfg["vocab_x"], cfg["vocab_y"]
    return logits[..., :Vx], logits[..., Vx:Vx + Vy]


# ----------------------------------- main -----------------------------------

if __name__ == "__main__":
    cfg = dict(vocab_x=11, vocab_y=13, hidden=32, intermediate=64,
               enc_layers=2, enc_heads=4, dec_layers=2, dec_heads=4, max_pos=64)
    key = jax.random.PRNGKey(0)
    kp, k1, k2, k3, k4 = jax.random.split(key, 5)
    params = init_params(kp, cfg)
    pp = prepare_params(params, cfg)          # pad / fuse / bf16-cast once

    B, S, T = 2, 8, 8
    input_ids_x = jax.random.randint(k1, (B, S), 0, cfg["vocab_x"])
    input_ids_y = jax.random.randint(k2, (B, S), 0, cfg["vocab_y"])
    attention_mask = jnp.ones((B, S), jnp.float32)
    decoder_input_ids_x = jax.random.randint(k3, (B, T), 0, cfg["vocab_x"])
    decoder_input_ids_y = jax.random.randint(k4, (B, T), 0, cfg["vocab_y"])
    args = (input_ids_x, input_ids_y, attention_mask,
            decoder_input_ids_x, decoder_input_ids_y)

    # Primary path at these tiny shapes: one fused pallas_call per layer.
    fwd_fused = jax.jit(functools.partial(forward, pp, cfg, fuse_layers=True))
    logits_x, logits_y = fwd_fused(*args)
    jax.block_until_ready((logits_x, logits_y))
    assert logits_x.shape == (B, T, cfg["vocab_x"])
    assert logits_y.shape == (B, T, cfg["vocab_y"])
    assert bool(jnp.all(jnp.isfinite(logits_x))) and bool(jnp.all(jnp.isfinite(logits_y)))

    # Also exercise the tiled / flash-attention path (used for large configs)
    # and cross-check it against the fused path (loose bf16 tolerance).
    fwd_tiled = jax.jit(functools.partial(forward, pp, cfg, fuse_layers=False))
    lx2, ly2 = fwd_tiled(*args)
    jax.block_until_ready((lx2, ly2))
    assert bool(jnp.all(jnp.isfinite(lx2))) and bool(jnp.all(jnp.isfinite(ly2)))
    assert bool(jnp.allclose(logits_x, lx2, atol=0.1, rtol=0.25))
    assert bool(jnp.allclose(logits_y, ly2, atol=0.1, rtol=0.25))

    print("KERNEL_OK")
</pallas_src>

<mosaic_0001>
module attributes {stable_mosaic.version = 11 : i64} {
  func.func @_ln_kernel(%arg0: i32, %arg1: memref<16x128xf32, #tpu.memory_space<vmem>>, %arg2: memref<1x128xf32, #tpu.memory_space<vmem>>, %arg3: memref<1x128xf32, #tpu.memory_space<vmem>>, %arg4: memref<16x128xbf16, #tpu.memory_space<vmem>>) attributes {dimension_semantics = [#tpu.dimension_semantics<parallel>], iteration_bounds = array<i64: 1>, scalar_prefetch = 0 : i64, scratch_operands = 0 : i64, tpu.core_type = #tpu.core_type<tc>, window_params = [{transform_indices = @transform_0, window_bounds = array<i64: 16, 128>}, {pipeline_mode = #tpu.pipeline_mode<synchronous>, transform_indices = @transform_1, window_bounds = array<i64: 1, 128>}, {pipeline_mode = #tpu.pipeline_mode<synchronous>, transform_indices = @transform_2, window_bounds = array<i64: 1, 128>}, {transform_indices = @transform_3, window_bounds = array<i64: 16, 128>}]} {
    %c0 = arith.constant 0 : index
    %c0_0 = arith.constant 0 : index
    %0 = vector.load %arg1[%c0, %c0_0] : memref<16x128xf32, #tpu.memory_space<vmem>>, vector<16x128xf32>
    %c0_1 = arith.constant 0 : index
    %c0_2 = arith.constant 0 : index
    %1 = vector.load %arg2[%c0_1, %c0_2] : memref<1x128xf32, #tpu.memory_space<vmem>>, vector<1x128xf32>
    %c0_3 = arith.constant 0 : index
    %c0_4 = arith.constant 0 : index
    %2 = vector.load %arg3[%c0_3, %c0_4] : memref<1x128xf32, #tpu.memory_space<vmem>>, vector<1x128xf32>
    %cst = arith.constant dense<0.000000e+00> : vector<16xf32>
    %3 = vector.multi_reduction <add>, %0, %cst [1] : vector<16x128xf32> to vector<16xf32>
    %4 = vector.shape_cast %3 : vector<16xf32> to vector<16x1xf32>
    %cst_5 = arith.constant 3.125000e-02 : f32
    %5 = vector.broadcast %cst_5 : f32 to vector<16x1xf32>
    %6 = arith.mulf %4, %5 : vector<16x1xf32>
    %7 = arith.mulf %0, %0 : vector<16x128xf32>
    %cst_6 = arith.constant dense<0.000000e+00> : vector<16xf32>
    %8 = vector.multi_reduction <add>, %7, %cst_6 [1] : vector<16x128xf32> to vector<16xf32>
    %9 = vector.shape_cast %8 : vector<16xf32> to vector<16x1xf32>
    %cst_7 = arith.constant 3.125000e-02 : f32
    %10 = vector.broadcast %cst_7 : f32 to vector<16x1xf32>
    %11 = arith.mulf %9, %10 : vector<16x1xf32>
    %12 = arith.mulf %6, %6 : vector<16x1xf32>
    %13 = arith.subf %11, %12 : vector<16x1xf32>
    %cst_8 = arith.constant 0.000000e+00 : f32
    %14 = vector.broadcast %cst_8 : f32 to vector<16x1xf32>
    %15 = arith.maximumf %13, %14 : vector<16x1xf32>
    %16 = vector.broadcast %6 : vector<16x1xf32> to vector<16x128xf32>
    %17 = arith.subf %0, %16 : vector<16x128xf32>
    %cst_9 = arith.constant 9.99999996E-13 : f32
    %18 = vector.broadcast %cst_9 : f32 to vector<16x1xf32>
    %19 = arith.addf %15, %18 : vector<16x1xf32>
    %20 = math.rsqrt %19 : vector<16x1xf32>
    %21 = vector.broadcast %20 : vector<16x1xf32> to vector<16x128xf32>
    %22 = arith.mulf %17, %21 : vector<16x128xf32>
    %23 = vector.broadcast %1 : vector<1x128xf32> to vector<16x128xf32>
    %24 = arith.mulf %22, %23 : vector<16x128xf32>
    %25 = vector.broadcast %2 : vector<1x128xf32> to vector<16x128xf32>
    %26 = arith.addf %24, %25 : vector<16x128xf32>
    %27 = arith.truncf %26 : vector<16x128xf32> to vector<16x128xbf16>
    %c0_10 = arith.constant 0 : index
    %c0_11 = arith.constant 0 : index
    %28 = vector.load %arg4[%c0_10, %c0_11] : memref<16x128xbf16, #tpu.memory_space<vmem>>, vector<16x128xbf16>
    tpu.vector_store %arg4[%c0_10, %c0_11], %27 {strides = array<i32>} : memref<16x128xbf16, #tpu.memory_space<vmem>>, vector<16x128xbf16>,
    return
  }
  func.func @transform_0(%arg0: i32) -> (i32, i32) {
    %c0_i32 = arith.constant 0 : i32
    %c0_i32_0 = arith.constant 0 : i32
    return %arg0, %c0_i32 : i32, i32
  }
  func.func @transform_1(%arg0: i32) -> (i32, i32) {
    %c0_i32 = arith.constant 0 : i32
    %c0_i32_0 = arith.constant 0 : i32
    %c0_i32_1 = arith.constant 0 : i32
    return %c0_i32, %c0_i32_0 : i32, i32
  }
  func.func @transform_2(%arg0: i32) -> (i32, i32) {
    %c0_i32 = arith.constant 0 : i32
    %c0_i32_0 = arith.constant 0 : i32
    %c0_i32_1 = arith.constant 0 : i32
    return %c0_i32, %c0_i32_0 : i32, i32
  }
  func.func @transform_3(%arg0: i32) -> (i32, i32) {
    %c0_i32 = arith.constant 0 : i32
    %c0_i32_0 = arith.constant 0 : i32
    return %arg0, %c0_i32 : i32, i32
  }
}

module attributes {stable_mosaic.version = 11 : i64} {
  func.func @_linear_kernel(%arg0: i32, %arg1: i32, %arg2: i32, %arg3: memref<16x128xbf16, #tpu.memory_space<vmem>>, %arg4: memref<128x128xbf16, #tpu.memory_space<vmem>>, %arg5: memref<1x128xf32, #tpu.memory_space<vmem>>, %arg6: memref<16x128xf32, #tpu.memory_space<vmem>>, %arg7: memref<16x128xf32, #tpu.memory_space<vmem>>) attributes {dimension_semantics = [#tpu.dimension_semantics<parallel>, #tpu.dimension_semantics<parallel>, #tpu.dimension_semantics<arbitrary>], iteration_bounds = array<i64: 1, 1, 1>, scalar_prefetch = 0 : i64, scratch_operands = 1 : i64, tpu.core_type = #tpu.core_type<tc>, window_params = [{transform_indices = @transform_0, window_bounds = array<i64: 16, 128>}, {transform_indices = @transform_1, window_bounds = array<i64: 128, 128>}, {transform_indices = @transform_2, window_bounds = array<i64: 1, 128>}, {transform_indices = @transform_3, window_bounds = array<i64: 16, 128>}]} {
    %c0 = arith.constant 0 : index
    %c0_0 = arith.constant 0 : index
    %0 = vector.load %arg3[%c0, %c0_0] : memref<16x128xbf16, #tpu.memory_space<vmem>>, vector<16x128xbf16>
    %c0_1 = arith.constant 0 : index
    %c0_2 = arith.constant 0 : index
    %1 = vector.load %arg4[%c0_1, %c0_2] : memref<128x128xbf16, #tpu.memory_space<vmem>>, vector<128x128xbf16>
    %cst = arith.constant dense<0.000000e+00> : vector<16x128xf32>
    %2 = tpu.matmul %0, %1, %cst {dimension_numbers = #tpu.dot_dimension_numbers<[1], [0], [0], [1], [0, 0, 1, 1], [], []>} : vector<16x128xbf16>, vector<128x128xbf16>, vector<16x128xf32> -> vector<16x128xf32>
    %c0_i32 = arith.constant 0 : i32
    %3 = arith.cmpi eq, %arg2, %c0_i32 : i32
    %4 = arith.extui %3 : i1 to i32
    %c0_i32_3 = arith.constant 0 : i32
    %5 = arith.cmpi ne, %4, %c0_i32_3 : i32
    scf.if %5 {
      %c0_8 = arith.constant 0 : index
      %c0_9 = arith.constant 0 : index
      %12 = vector.load %arg7[%c0_8, %c0_9] : memref<16x128xf32, #tpu.memory_space<vmem>>, vector<16x128xf32>
      tpu.vector_store %arg7[%c0_8, %c0_9], %2 {strides = array<i32>} : memref<16x128xf32, #tpu.memory_space<vmem>>, vector<16x128xf32>,
    } else {
    }
    %c0_i32_4 = arith.constant 0 : i32
    %6 = arith.cmpi ne, %arg2, %c0_i32_4 : i32
    %7 = arith.extui %6 : i1 to i32
    %c0_i32_5 = arith.constant 0 : i32
    %8 = arith.cmpi ne, %7, %c0_i32_5 : i32
    scf.if %8 {
      %c0_8 = arith.constant 0 : index
      %c0_9 = arith.constant 0 : index
      %12 = vector.load %arg7[%c0_8, %c0_9] : memref<16x128xf32, #tpu.memory_space<vmem>>, vector<16x128xf32>
      %13 = arith.addf %12, %2 : vector<16x128xf32>
      %c0_10 = arith.constant 0 : index
      %c0_11 = arith.constant 0 : index
      %14 = vector.load %arg7[%c0_10, %c0_11] : memref<16x128xf32, #tpu.memory_space<vmem>>, vector<16x128xf32>
      tpu.vector_store %arg7[%c0_10, %c0_11], %13 {strides = array<i32>} : memref<16x128xf32, #tpu.memory_space<vmem>>, vector<16x128xf32>,
    } else {
    }
    %c0_i32_6 = arith.constant 0 : i32
    %9 = arith.cmpi eq, %arg2, %c0_i32_6 : i32
    %10 = arith.extui %9 : i1 to i32
    %c0_i32_7 = arith.constant 0 : i32
    %11 = arith.cmpi ne, %10, %c0_i32_7 : i32
    scf.if %11 {
      %c0_8 = arith.constant 0 : index
      %c0_9 = arith.constant 0 : index
      %12 = vector.load %arg7[%c0_8, %c0_9] : memref<16x128xf32, #tpu.memory_space<vmem>>, vector<16x128xf32>
      %c0_10 = arith.constant 0 : index
      %c0_11 = arith.constant 0 : index
      %13 = vector.load %arg5[%c0_10, %c0_11] : memref<1x128xf32, #tpu.memory_space<vmem>>, vector<1x128xf32>
      %14 = vector.broadcast %13 : vector<1x128xf32> to vector<16x128xf32>
      %15 = arith.addf %12, %14 : vector<16x128xf32>
      %c0_12 = arith.constant 0 : index
      %c0_13 = arith.constant 0 : index
      %16 = vector.load %arg6[%c0_12, %c0_13] : memref<16x128xf32, #tpu.memory_space<vmem>>, vector<16x128xf32>
      tpu.vector_store %arg6[%c0_12, %c0_13], %15 {strides = array<i32>} : memref<16x128xf32, #tpu.memory_space<vmem>>, vector<16x128xf32>,
    } else {
    }
    return
  }
  func.func @transform_0(%arg0: i32, %arg1: i32, %arg2: i32) -> (i32, i32) {
    %c0_i32 = arith.constant 0 : i32
    return %arg0, %arg2 : i32, i32
  }
  func.func @transform_1(%arg0: i32, %arg1: i32, %arg2: i32) -> (i32, i32) {
    %c0_i32 = arith.constant 0 : i32
    return %arg2, %arg1 : i32, i32
  }
  func.func @transform_2(%arg0: i32, %arg1: i32, %arg2: i32) -> (i32, i32) {
    %c0_i32 = arith.constant 0 : i32
    %c0_i32_0 = arith.constant 0 : i32
    return %c0_i32, %arg1 : i32, i32
  }
  func.func @transform_3(%arg0: i32, %arg1: i32, %arg2: i32) -> (i32, i32) {
    %c0_i32 = arith.constant 0 : i32
    return %arg0, %arg1 : i32, i32
  }
}

module attributes {stable_mosaic.version = 11 : i64} {
  func.func @_enc_layer_kernel(%arg0: i32, %arg1: memref<1x8x128xbf16, #tpu.memory_space<vmem>>, %arg2: memref<1x1x8xf32, #tpu.memory_space<vmem>>, %arg3: memref<128x384xbf16, #tpu.memory_space<vmem>>, %arg4: memref<1x384xf32, #tpu.memory_space<vmem>>, %arg5: memref<128x128xbf16, #tpu.memory_space<vmem>>, %arg6: memref<1x128xf32, #tpu.memory_space<vmem>>, %arg7: memref<1x128xf32, #tpu.memory_space<vmem>>, %arg8: memref<1x128xf32, #tpu.memory_space<vmem>>, %arg9: memref<128x128xbf16, #tpu.memory_space<vmem>>, %arg10: memref<1x128xf32, #tpu.memory_space<vmem>>, %arg11: memref<128x128xbf16, #tpu.memory_space<vmem>>, %arg12: memref<1x128xf32, #tpu.memory_space<vmem>>, %arg13: memref<1x128xf32, #tpu.memory_space<vmem>>, %arg14: memref<1x128xf32, #tpu.memory_space<vmem>>, %arg15: memref<1x8x128xbf16, #tpu.memory_space<vmem>>) attributes {dimension_semantics = [#tpu.dimension_semantics<parallel>], iteration_bounds = array<i64: 2>, scalar_prefetch = 0 : i64, scratch_operands = 0 : i64, tpu.core_type = #tpu.core_type<tc>, window_params = [{transform_indices = @transform_0, window_bounds = array<i64: 1, 8, 128>}, {transform_indices = @transform_1, window_bounds = array<i64: 1, 1, 8>}, {pipeline_mode = #tpu.pipeline_mode<synchronous>, transform_indices = @transform_2, window_bounds = array<i64: 128, 384>}, {pipeline_mode = #tpu.pipeline_mode<synchronous>, transform_indices = @transform_3, window_bounds = array<i64: 1, 384>}, {pipeline_mode = #tpu.pipeline_mode<synchronous>, transform_indices = @transform_4, window_bounds = array<i64: 128, 128>}, {pipeline_mode = #tpu.pipeline_mode<synchronous>, transform_indices = @transform_5, window_bounds = array<i64: 1, 128>}, {pipeline_mode = #tpu.pipeline_mode<synchronous>, transform_indices = @transform_6, window_bounds = array<i64: 1, 128>}, {pipeline_mode = #tpu.pipeline_mode<synchronous>, transform_indices = @transform_7, window_bounds = array<i64: 1, 128>}, {pipeline_mode = #tpu.pipeline_mode<synchronous>, transform_indices = @transform_8, window_bounds = array<i64: 128, 128>}, {pipeline_mode = #tpu.pipeline_mode<synchronous>, transform_indices = @transform_9, window_bounds = array<i64: 1, 128>}, {pipeline_mode = #tpu.pipeline_mode<synchronous>, transform_indices = @transform_10, window_bounds = array<i64: 128, 128>}, {pipeline_mode = #tpu.pipeline_mode<synchronous>, transform_indices = @transform_11, window_bounds = array<i64: 1, 128>}, {pipeline_mode = #tpu.pipeline_mode<synchronous>, transform_indices = @transform_12, window_bounds = array<i64: 1, 128>}, {pipeline_mode = #tpu.pipeline_mode<synchronous>, transform_indices = @transform_13, window_bounds = array<i64: 1, 128>}, {transform_indices = @transform_14, window_bounds = array<i64: 1, 8, 128>}]} {
    %c0 = arith.constant 0 : index
    %c0_0 = arith.constant 0 : index
    %c0_1 = arith.constant 0 : index
    %0 = vector.load %arg1[%c0, %c0_0, %c0_1] : memref<1x8x128xbf16, #tpu.memory_space<vmem>>, vector<1x8x128xbf16>
    %1 = vector.shape_cast %0 : vector<1x8x128xbf16> to vector<8x128xbf16>
    %c0_2 = arith.constant 0 : index
    %c0_3 = arith.constant 0 : index
    %2 = vector.load %arg3[%c0_2, %c0_3] : memref<128x384xbf16, #tpu.memory_space<vmem>>, vector<128x384xbf16>
    %cst = arith.constant dense<0.000000e+00> : vector<8x384xf32>
    %3 = tpu.matmul %1, %2, %cst {dimension_numbers = #tpu.dot_dimension_numbers<[1], [0], [0], [1], [0, 0, 1, 1], [], []>} : vector<8x128xbf16>, vector<128x384xbf16>, vector<8x384xf32> -> vector<8x384xf32>
    %c0_4 = arith.constant 0 : index
    %c0_5 = arith.constant 0 : index
    %4 = vector.load %arg4[%c0_4, %c0_5] : memref<1x384xf32, #tpu.memory_space<vmem>>, vector<1x384xf32>
    %5 = vector.broadcast %4 : vector<1x384xf32> to vector<8x384xf32>
    %6 = arith.addf %3, %5 : vector<8x384xf32>
    %7 = arith.truncf %6 : vector<8x384xf32> to vector<8x384xbf16>
    %c0_6 = arith.constant 0 : index
    %c0_7 = arith.constant 0 : index
    %c0_8 = arith.constant 0 : index
    %8 = vector.load %arg2[%c0_6, %c0_7, %c0_8] : memref<1x1x8xf32, #tpu.memory_space<vmem>>, vector<1x1x8xf32>
    %9 = vector.shape_cast %8 : vector<1x1x8xf32> to vector<1x8xf32>
    %c0_9 = arith.constant 0 : index
    %c0_10 = arith.constant 0 : index
    %10 = vector.load %arg5[%c0_9, %c0_10] : memref<128x128xbf16, #tpu.memory_space<vmem>>, vector<128x128xbf16>
    %11 = vector.extract_strided_slice %7 {offsets = [0, 0], sizes = [8, 8], strides = [1, 1]} : vector<8x384xbf16> to vector<8x8xbf16>
    %12 = vector.extract_strided_slice %7 {offsets = [0, 128], sizes = [8, 8], strides = [1, 1]} : vector<8x384xbf16> to vector<8x8xbf16>
    %13 = vector.extract_strided_slice %7 {offsets = [0, 256], sizes = [8, 8], strides = [1, 1]} : vector<8x384xbf16> to vector<8x8xbf16>
    %cst_11 = arith.constant dense<0.000000e+00> : vector<8x8xf32>
    %14 = tpu.matmul %11, %12, %cst_11 {dimension_numbers = #tpu.dot_dimension_numbers<[1], [1], [0], [0], [0, 0, 1, 0], [], []>} : vector<8x8xbf16>, vector<8x8xbf16>, vector<8x8xf32> -> vector<8x8xf32>
    %cst_12 = arith.constant 0.353553385 : f32
    %15 = vector.broadcast %cst_12 : f32 to vector<8x8xf32>
    %16 = arith.mulf %14, %15 : vector<8x8xf32>
    %17 = vector.broadcast %9 : vector<1x8xf32> to vector<8x8xf32>
    %18 = arith.addf %16, %17 : vector<8x8xf32>
    %cst_13 = arith.constant dense<0xFF800000> : vector<8xf32>
    %19 = vector.multi_reduction <maximumf>, %18, %cst_13 [1] : vector<8x8xf32> to vector<8xf32>
    %20 = vector.shape_cast %19 : vector<8xf32> to vector<8x1xf32>
    %21 = vector.broadcast %20 : vector<8x1xf32> to vector<8x8xf32>
    %22 = arith.subf %18, %21 : vector<8x8xf32>
    %23 = math.exp %22 : vector<8x8xf32>
    %cst_14 = arith.constant dense<0.000000e+00> : vector<8xf32>
    %24 = vector.multi_reduction <add>, %23, %cst_14 [1] : vector<8x8xf32> to vector<8xf32>
    %25 = vector.shape_cast %24 : vector<8xf32> to vector<8x1xf32>
    %26 = arith.truncf %23 : vector<8x8xf32> to vector<8x8xbf16>
    %cst_15 = arith.constant dense<0.000000e+00> : vector<8x8xf32>
    %27 = tpu.matmul %26, %13, %cst_15 {dimension_numbers = #tpu.dot_dimension_numbers<[1], [0], [0], [1], [0, 0, 1, 1], [], []>} : vector<8x8xbf16>, vector<8x8xbf16>, vector<8x8xf32> -> vector<8x8xf32>
    %28 = tpu.reciprocal %25 {approx = true} : vector<8x1xf32> -> vector<8x1xf32>
    %29 = vector.broadcast %28 : vector<8x1xf32> to vector<8x8xf32>
    %30 = arith.mulf %27, %29 : vector<8x8xf32>
    %31 = arith.truncf %30 : vector<8x8xf32> to vector<8x8xbf16>
    %32 = vector.extract_strided_slice %10 {offsets = [0, 0], sizes = [8, 128], strides = [1, 1]} : vector<128x128xbf16> to vector<8x128xbf16>
    %cst_16 = arith.constant dense<0.000000e+00> : vector<8x128xf32>
    %33 = tpu.matmul %31, %32, %cst_16 {dimension_numbers = #tpu.dot_dimension_numbers<[1], [0], [0], [1], [0, 0, 1, 1], [], []>} : vector<8x8xbf16>, vector<8x128xbf16>, vector<8x128xf32> -> vector<8x128xf32>
    %34 = vector.extract_strided_slice %7 {offsets = [0, 8], sizes = [8, 8], strides = [1, 1]} : vector<8x384xbf16> to vector<8x8xbf16>
    %35 = vector.extract_strided_slice %7 {offsets = [0, 136], sizes = [8, 8], strides = [1, 1]} : vector<8x384xbf16> to vector<8x8xbf16>
    %36 = vector.extract_strided_slice %7 {offsets = [0, 264], sizes = [8, 8], strides = [1, 1]} : vector<8x384xbf16> to vector<8x8xbf16>
    %cst_17 = arith.constant dense<0.000000e+00> : vector<8x8xf32>
    %37 = tpu.matmul %34, %35, %cst_17 {dimension_numbers = #tpu.dot_dimension_numbers<[1], [1], [0], [0], [0, 0, 1, 0], [], []>} : vector<8x8xbf16>, vector<8x8xbf16>, vector<8x8xf32> -> vector<8x8xf32>
    %cst_18 = arith.constant 0.353553385 : f32
    %38 = vector.broadcast %cst_18 : f32 to vector<8x8xf32>
    %39 = arith.mulf %37, %38 : vector<8x8xf32>
    %40 = vector.broadcast %9 : vector<1x8xf32> to vector<8x8xf32>
    %41 = arith.addf %39, %40 : vector<8x8xf32>
    %cst_19 = arith.constant dense<0xFF800000> : vector<8xf32>
    %42 = vector.multi_reduction <maximumf>, %41, %cst_19 [1] : vector<8x8xf32> to vector<8xf32>
    %43 = vector.shape_cast %42 : vector<8xf32> to vector<8x1xf32>
    %44 = vector.broadcast %43 : vector<8x1xf32> to vector<8x8xf32>
    %45 = arith.subf %41, %44 : vector<8x8xf32>
    %46 = math.exp %45 : vector<8x8xf32>
    %cst_20 = arith.constant dense<0.000000e+00> : vector<8xf32>
    %47 = vector.multi_reduction <add>, %46, %cst_20 [1] : vector<8x8xf32> to vector<8xf32>
    %48 = vector.shape_cast %47 : vector<8xf32> to vector<8x1xf32>
    %49 = arith.truncf %46 : vector<8x8xf32> to vector<8x8xbf16>
    %cst_21 = arith.constant dense<0.000000e+00> : vector<8x8xf32>
    %50 = tpu.matmul %49, %36, %cst_21 {dimension_numbers = #tpu.dot_dimension_numbers<[1], [0], [0], [1], [0, 0, 1, 1], [], []>} : vector<8x8xbf16>, vector<8x8xbf16>, vector<8x8xf32> -> vector<8x8xf32>
    %51 = tpu.reciprocal %48 {approx = true} : vector<8x1xf32> -> vector<8x1xf32>
    %52 = vector.broadcast %51 : vector<8x1xf32> to vector<8x8xf32>
    %53 = arith.mulf %50, %52 : vector<8x8xf32>
    %54 = arith.truncf %53 : vector<8x8xf32> to vector<8x8xbf16>
    %55 = vector.extract_strided_slice %10 {offsets = [8, 0], sizes = [8, 128], strides = [1, 1]} : vector<128x128xbf16> to vector<8x128xbf16>
    %cst_22 = arith.constant dense<0.000000e+00> : vector<8x128xf32>
    %56 = tpu.matmul %54, %55, %cst_22 {dimension_numbers = #tpu.dot_dimension_numbers<[1], [0], [0], [1], [0, 0, 1, 1], [], []>} : vector<8x8xbf16>, vector<8x128xbf16>, vector<8x128xf32> -> vector<8x128xf32>
    %57 = arith.addf %33, %56 : vector<8x128xf32>
    %58 = vector.extract_strided_slice %7 {offsets = [0, 16], sizes = [8, 8], strides = [1, 1]} : vector<8x384xbf16> to vector<8x8xbf16>
    %59 = vector.extract_strided_slice %7 {offsets = [0, 144], sizes = [8, 8], strides = [1, 1]} : vector<8x384xbf16> to vector<8x8xbf16>
    %60 = vector.extract_strided_slice %7 {offsets = [0, 272], sizes = [8, 8], strides = [1, 1]} : vector<8x384xbf16> to vector<8x8xbf16>
    %cst_23 = arith.constant dense<0.000000e+00> : vector<8x8xf32>
    %61 = tpu.matmul %58, %59, %cst_23 {dimension_numbers = #tpu.dot_dimension_numbers<[1], [1], [0], [0], [0, 0, 1, 0], [], []>} : vector<8x8xbf16>, vector<8x8xbf16>, vector<8x8xf32> -> vector<8x8xf32>
    %cst_24 = arith.constant 0.353553385 : f32
    %62 = vector.broadcast %cst_24 : f32 to vector<8x8xf32>
    %63 = arith.mulf %61, %62 : vector<8x8xf32>
    %64 = vector.broadcast %9 : vector<1x8xf32> to vector<8x8xf32>
    %65 = arith.addf %63, %64 : vector<8x8xf32>
    %cst_25 = arith.constant dense<0xFF800000> : vector<8xf32>
    %66 = vector.multi_reduction <maximumf>, %65, %cst_25 [1] : vector<8x8xf32> to vector<8xf32>
    %67 = vector.shape_cast %66 : vector<8xf32> to vector<8x1xf32>
    %68 = vector.broadcast %67 : vector<8x1xf32> to vector<8x8xf32>
    %69 = arith.subf %65, %68 : vector<8x8xf32>
    %70 = math.exp %69 : vector<8x8xf32>
    %cst_26 = arith.constant dense<0.000000e+00> : vector<8xf32>
    %71 = vector.multi_reduction <add>, %70, %cst_26 [1] : vector<8x8xf32> to vector<8xf32>
    %72 = vector.shape_cast %71 : vector<8xf32> to vector<8x1xf32>
    %73 = arith.truncf %70 : vector<8x8xf32> to vector<8x8xbf16>
    %cst_27 = arith.constant dense<0.000000e+00> : vector<8x8xf32>
    %74 = tpu.matmul %73, %60, %cst_27 {dimension_numbers = #tpu.dot_dimension_numbers<[1], [0], [0], [1], [0, 0, 1, 1], [], []>} : vector<8x8xbf16>, vector<8x8xbf16>, vector<8x8xf32> -> vector<8x8xf32>
    %75 = tpu.reciprocal %72 {approx = true} : vector<8x1xf32> -> vector<8x1xf32>
    %76 = vector.broadcast %75 : vector<8x1xf32> to vector<8x8xf32>
    %77 = arith.mulf %74, %76 : vector<8x8xf32>
    %78 = arith.truncf %77 : vector<8x8xf32> to vector<8x8xbf16>
    %79 = vector.extract_strided_slice %10 {offsets = [16, 0], sizes = [8, 128], strides = [1, 1]} : vector<128x128xbf16> to vector<8x128xbf16>
    %cst_28 = arith.constant dense<0.000000e+00> : vector<8x128xf32>
    %80 = tpu.matmul %78, %79, %cst_28 {dimension_numbers = #tpu.dot_dimension_numbers<[1], [0], [0], [1], [0, 0, 1, 1], [], []>} : vector<8x8xbf16>, vector<8x128xbf16>, vector<8x128xf32> -> vector<8x128xf32>
    %81 = arith.addf %57, %80 : vector<8x128xf32>
    %82 = vector.extract_strided_slice %7 {offsets = [0, 24], sizes = [8, 8], strides = [1, 1]} : vector<8x384xbf16> to vector<8x8xbf16>
    %83 = vector.extract_strided_slice %7 {offsets = [0, 152], sizes = [8, 8], strides = [1, 1]} : vector<8x384xbf16> to vector<8x8xbf16>
    %84 = vector.extract_strided_slice %7 {offsets = [0, 280], sizes = [8, 8], strides = [1, 1]} : vector<8x384xbf16> to vector<8x8xbf16>
    %cst_29 = arith.constant dense<0.000000e+00> : vector<8x8xf32>
    %85 = tpu.matmul %82, %83, %cst_29 {dimension_numbers = #tpu.dot_dimension_numbers<[1], [1], [0], [0], [0, 0, 1, 0], [], []>} : vector<8x8xbf16>, vector<8x8xbf16>, vector<8x8xf32> -> vector<8x8xf32>
    %cst_30 = arith.constant 0.353553385 : f32
    %86 = vector.broadcast %cst_30 : f32 to vector<8x8xf32>
    %87 = arith.mulf %85, %86 : vector<8x8xf32>
    %88 = vector.broadcast %9 : vector<1x8xf32> to vector<8x8xf32>
    %89 = arith.addf %87, %88 : vector<8x8xf32>
    %cst_31 = arith.constant dense<0xFF800000> : vector<8xf32>
    %90 = vector.multi_reduction <maximumf>, %89, %cst_31 [1] : vector<8x8xf32> to vector<8xf32>
    %91 = vector.shape_cast %90 : vector<8xf32> to vector<8x1xf32>
    %92 = vector.broadcast %91 : vector<8x1xf32> to vector<8x8xf32>
    %93 = arith.subf %89, %92 : vector<8x8xf32>
    %94 = math.exp %93 : vector<8x8xf32>
    %cst_32 = arith.constant dense<0.000000e+00> : vector<8xf32>
    %95 = vector.multi_reduction <add>, %94, %cst_32 [1] : vector<8x8xf32> to vector<8xf32>
    %96 = vector.shape_cast %95 : vector<8xf32> to vector<8x1xf32>
    %97 = arith.truncf %94 : vector<8x8xf32> to vector<8x8xbf16>
    %cst_33 = arith.constant dense<0.000000e+00> : vector<8x8xf32>
    %98 = tpu.matmul %97, %84, %cst_33 {dimension_numbers = #tpu.dot_dimension_numbers<[1], [0], [0], [1], [0, 0, 1, 1], [], []>} : vector<8x8xbf16>, vector<8x8xbf16>, vector<8x8xf32> -> vector<8x8xf32>
    %99 = tpu.reciprocal %96 {approx = true} : vector<8x1xf32> -> vector<8x1xf32>
    %100 = vector.broadcast %99 : vector<8x1xf32> to vector<8x8xf32>
    %101 = arith.mulf %98, %100 : vector<8x8xf32>
    %102 = arith.truncf %101 : vector<8x8xf32> to vector<8x8xbf16>
    %103 = vector.extract_strided_slice %10 {offsets = [24, 0], sizes = [8, 128], strides = [1, 1]} : vector<128x128xbf16> to vector<8x128xbf16>
    %cst_34 = arith.constant dense<0.000000e+00> : vector<8x128xf32>
    %104 = tpu.matmul %102, %103, %cst_34 {dimension_numbers = #tpu.dot_dimension_numbers<[1], [0], [0], [1], [0, 0, 1, 1], [], []>} : vector<8x8xbf16>, vector<8x128xbf16>, vector<8x128xf32> -> vector<8x128xf32>
    %105 = arith.addf %81, %104 : vector<8x128xf32>
    %c0_35 = arith.constant 0 : index
    %c0_36 = arith.constant 0 : index
    %106 = vector.load %arg6[%c0_35, %c0_36] : memref<1x128xf32, #tpu.memory_space<vmem>>, vector<1x128xf32>
    %107 = vector.broadcast %106 : vector<1x128xf32> to vector<8x128xf32>
    %108 = arith.addf %105, %107 : vector<8x128xf32>
    %109 = arith.extf %1 : vector<8x128xbf16> to vector<8x128xf32>
    %110 = arith.addf %108, %109 : vector<8x128xf32>
    %c0_37 = arith.constant 0 : index
    %c0_38 = arith.constant 0 : index
    %111 = vector.load %arg7[%c0_37, %c0_38] : memref<1x128xf32, #tpu.memory_space<vmem>>, vector<1x128xf32>
    %c0_39 = arith.constant 0 : index
    %c0_40 = arith.constant 0 : index
    %112 = vector.load %arg8[%c0_39, %c0_40] : memref<1x128xf32, #tpu.memory_space<vmem>>, vector<1x128xf32>
    %cst_41 = arith.constant dense<0.000000e+00> : vector<8xf32>
    %113 = vector.multi_reduction <add>, %110, %cst_41 [1] : vector<8x128xf32> to vector<8xf32>
    %114 = vector.shape_cast %113 : vector<8xf32> to vector<8x1xf32>
    %cst_42 = arith.constant 3.125000e-02 : f32
    %115 = vector.broadcast %cst_42 : f32 to vector<8x1xf32>
    %116 = arith.mulf %114, %115 : vector<8x1xf32>
    %117 = arith.mulf %110, %110 : vector<8x128xf32>
    %cst_43 = arith.constant dense<0.000000e+00> : vector<8xf32>
    %118 = vector.multi_reduction <add>, %117, %cst_43 [1] : vector<8x128xf32> to vector<8xf32>
    %119 = vector.shape_cast %118 : vector<8xf32> to vector<8x1xf32>
    %cst_44 = arith.constant 3.125000e-02 : f32
    %120 = vector.broadcast %cst_44 : f32 to vector<8x1xf32>
    %121 = arith.mulf %119, %120 : vector<8x1xf32>
    %122 = arith.mulf %116, %116 : vector<8x1xf32>
    %123 = arith.subf %121, %122 : vector<8x1xf32>
    %cst_45 = arith.constant 0.000000e+00 : f32
    %124 = vector.broadcast %cst_45 : f32 to vector<8x1xf32>
    %125 = arith.maximumf %123, %124 : vector<8x1xf32>
    %126 = vector.broadcast %116 : vector<8x1xf32> to vector<8x128xf32>
    %127 = arith.subf %110, %126 : vector<8x128xf32>
    %cst_46 = arith.constant 9.99999996E-13 : f32
    %128 = vector.broadcast %cst_46 : f32 to vector<8x1xf32>
    %129 = arith.addf %125, %128 : vector<8x1xf32>
    %130 = math.rsqrt %129 : vector<8x1xf32>
    %131 = vector.broadcast %130 : vector<8x1xf32> to vector<8x128xf32>
    %132 = arith.mulf %127, %131 : vector<8x128xf32>
    %133 = vector.broadcast %111 : vector<1x128xf32> to vector<8x128xf32>
    %134 = arith.mulf %132, %133 : vector<8x128xf32>
    %135 = vector.broadcast %112 : vector<1x128xf32> to vector<8x128xf32>
    %136 = arith.addf %134, %135 : vector<8x128xf32>
    %137 = arith.truncf %136 : vector<8x128xf32> to vector<8x128xbf16>
    %c0_47 = arith.constant 0 : index
    %c0_48 = arith.constant 0 : index
    %138 = vector.load %arg9[%c0_47, %c0_48] : memref<128x128xbf16, #tpu.memory_space<vmem>>, vector<128x128xbf16>
    %cst_49 = arith.constant dense<0.000000e+00> : vector<8x128xf32>
    %139 = tpu.matmul %137, %138, %cst_49 {dimension_numbers = #tpu.dot_dimension_numbers<[1], [0], [0], [1], [0, 0, 1, 1], [], []>} : vector<8x128xbf16>, vector<128x128xbf16>, vector<8x128xf32> -> vector<8x128xf32>
    %c0_50 = arith.constant 0 : index
    %c0_51 = arith.constant 0 : index
    %140 = vector.load %arg10[%c0_50, %c0_51] : memref<1x128xf32, #tpu.memory_space<vmem>>, vector<1x128xf32>
    %141 = vector.broadcast %140 : vector<1x128xf32> to vector<8x128xf32>
    %142 = arith.addf %139, %141 : vector<8x128xf32>
    %cst_52 = arith.constant 5.000000e-01 : f32
    %143 = vector.broadcast %cst_52 : f32 to vector<8x128xf32>
    %144 = arith.mulf %143, %142 : vector<8x128xf32>
    %cst_53 = arith.constant 0.707106769 : f32
    %145 = vector.broadcast %cst_53 : f32 to vector<8x128xf32>
    %146 = arith.mulf %142, %145 : vector<8x128xf32>
    %147 = math.erf %146 : vector<8x128xf32>
    %cst_54 = arith.constant 1.000000e+00 : f32
    %148 = vector.broadcast %cst_54 : f32 to vector<8x128xf32>
    %149 = arith.addf %148, %147 : vector<8x128xf32>
    %150 = arith.mulf %144, %149 : vector<8x128xf32>
    %151 = arith.truncf %150 : vector<8x128xf32> to vector<8x128xbf16>
    %c0_55 = arith.constant 0 : index
    %c0_56 = arith.constant 0 : index
    %152 = vector.load %arg11[%c0_55, %c0_56] : memref<128x128xbf16, #tpu.memory_space<vmem>>, vector<128x128xbf16>
    %cst_57 = arith.constant dense<0.000000e+00> : vector<8x128xf32>
    %153 = tpu.matmul %151, %152, %cst_57 {dimension_numbers = #tpu.dot_dimension_numbers<[1], [0], [0], [1], [0, 0, 1, 1], [], []>} : vector<8x128xbf16>, vector<128x128xbf16>, vector<8x128xf32> -> vector<8x128xf32>
    %c0_58 = arith.constant 0 : index
    %c0_59 = arith.constant 0 : index
    %154 = vector.load %arg12[%c0_58, %c0_59] : memref<1x128xf32, #tpu.memory_space<vmem>>, vector<1x128xf32>
    %155 = vector.broadcast %154 : vector<1x128xf32> to vector<8x128xf32>
    %156 = arith.addf %153, %155 : vector<8x128xf32>
    %157 = arith.addf %156, %136 : vector<8x128xf32>
    %c0_60 = arith.constant 0 : index
    %c0_61 = arith.constant 0 : index
    %158 = vector.load %arg13[%c0_60, %c0_61] : memref<1x128xf32, #tpu.memory_space<vmem>>, vector<1x128xf32>
    %c0_62 = arith.constant 0 : index
    %c0_63 = arith.constant 0 : index
    %159 = vector.load %arg14[%c0_62, %c0_63] : memref<1x128xf32, #tpu.memory_space<vmem>>, vector<1x128xf32>
    %cst_64 = arith.constant dense<0.000000e+00> : vector<8xf32>
    %160 = vector.multi_reduction <add>, %157, %cst_64 [1] : vector<8x128xf32> to vector<8xf32>
    %161 = vector.shape_cast %160 : vector<8xf32> to vector<8x1xf32>
    %cst_65 = arith.constant 3.125000e-02 : f32
    %162 = vector.broadcast %cst_65 : f32 to vector<8x1xf32>
    %163 = arith.mulf %161, %162 : vector<8x1xf32>
    %164 = arith.mulf %157, %157 : vector<8x128xf32>
    %cst_66 = arith.constant dense<0.000000e+00> : vector<8xf32>
    %165 = vector.multi_reduction <add>, %164, %cst_66 [1] : vector<8x128xf32> to vector<8xf32>
    %166 = vector.shape_cast %165 : vector<8xf32> to vector<8x1xf32>
    %cst_67 = arith.constant 3.125000e-02 : f32
    %167 = vector.broadcast %cst_67 : f32 to vector<8x1xf32>
    %168 = arith.mulf %166, %167 : vector<8x1xf32>
    %169 = arith.mulf %163, %163 : vector<8x1xf32>
    %170 = arith.subf %168, %169 : vector<8x1xf32>
    %cst_68 = arith.constant 0.000000e+00 : f32
    %171 = vector.broadcast %cst_68 : f32 to vector<8x1xf32>
    %172 = arith.maximumf %170, %171 : vector<8x1xf32>
    %173 = vector.broadcast %163 : vector<8x1xf32> to vector<8x128xf32>
    %174 = arith.subf %157, %173 : vector<8x128xf32>
    %cst_69 = arith.constant 9.99999996E-13 : f32
    %175 = vector.broadcast %cst_69 : f32 to vector<8x1xf32>
    %176 = arith.addf %172, %175 : vector<8x1xf32>
    %177 = math.rsqrt %176 : vector<8x1xf32>
    %178 = vector.broadcast %177 : vector<8x1xf32> to vector<8x128xf32>
    %179 = arith.mulf %174, %178 : vector<8x128xf32>
    %180 = vector.broadcast %158 : vector<1x128xf32> to vector<8x128xf32>
    %181 = arith.mulf %179, %180 : vector<8x128xf32>
    %182 = vector.broadcast %159 : vector<1x128xf32> to vector<8x128xf32>
    %183 = arith.addf %181, %182 : vector<8x128xf32>
    %184 = arith.truncf %183 : vector<8x128xf32> to vector<8x128xbf16>
    %c0_70 = arith.constant 0 : index
    %c0_71 = arith.constant 0 : index
    %c0_72 = arith.constant 0 : index
    %185 = vector.load %arg15[%c0_70, %c0_71, %c0_72] : memref<1x8x128xbf16, #tpu.memory_space<vmem>>, vector<1x8x128xbf16>
    %186 = vector.shape_cast %185 : vector<1x8x128xbf16> to vector<8x128xbf16>
    %187 = vector.shape_cast %184 : vector<8x128xbf16> to vector<1x8x128xbf16>
    tpu.vector_store %arg15[%c0_70, %c0_71, %c0_72], %187 {strides = array<i32>} : memref<1x8x128xbf16, #tpu.memory_space<vmem>>, vector<1x8x128xbf16>,
    return
  }
  func.func @transform_0(%arg0: i32) -> (i32, i32, i32) {
    %c0_i32 = arith.constant 0 : i32
    %c0_i32_0 = arith.constant 0 : i32
    %c0_i32_1 = arith.constant 0 : i32
    return %arg0, %c0_i32, %c0_i32_0 : i32, i32, i32
  }
  func.func @transform_1(%arg0: i32) -> (i32, i32, i32) {
    %c0_i32 = arith.constant 0 : i32
    %c0_i32_0 = arith.constant 0 : i32
    %c0_i32_1 = arith.constant 0 : i32
    return %arg0, %c0_i32, %c0_i32_0 : i32, i32, i32
  }
  func.func @transform_2(%arg0: i32) -> (i32, i32) {
    %c0_i32 = arith.constant 0 : i32
    %c0_i32_0 = arith.constant 0 : i32
    %c0_i32_1 = arith.constant 0 : i32
    return %c0_i32, %c0_i32_0 : i32, i32
  }
  func.func @transform_3(%arg0: i32) -> (i32, i32) {
    %c0_i32 = arith.constant 0 : i32
    %c0_i32_0 = arith.constant 0 : i32
    %c0_i32_1 = arith.constant 0 : i32
    return %c0_i32, %c0_i32_0 : i32, i32
  }
  func.func @transform_4(%arg0: i32) -> (i32, i32) {
    %c0_i32 = arith.constant 0 : i32
    %c0_i32_0 = arith.constant 0 : i32
    %c0_i32_1 = arith.constant 0 : i32
    return %c0_i32, %c0_i32_0 : i32, i32
  }
  func.func @transform_5(%arg0: i32) -> (i32, i32) {
    %c0_i32 = arith.constant 0 : i32
    %c0_i32_0 = arith.constant 0 : i32
    %c0_i32_1 = arith.constant 0 : i32
    return %c0_i32, %c0_i32_0 : i32, i32
  }
  func.func @transform_6(%arg0: i32) -> (i32, i32) {
    %c0_i32 = arith.constant 0 : i32
    %c0_i32_0 = arith.constant 0 : i32
    %c0_i32_1 = arith.constant 0 : i32
    return %c0_i32, %c0_i32_0 : i32, i32
  }
  func.func @transform_7(%arg0: i32) -> (i32, i32) {
    %c0_i32 = arith.constant 0 : i32
    %c0_i32_0 = arith.constant 0 : i32
    %c0_i32_1 = arith.constant 0 : i32
    return %c0_i32, %c0_i32_0 : i32, i32
  }
  func.func @transform_8(%arg0: i32) -> (i32, i32) {
    %c0_i32 = arith.constant 0 : i32
    %c0_i32_0 = arith.constant 0 : i32
    %c0_i32_1 = arith.constant 0 : i32
    return %c0_i32, %c0_i32_0 : i32, i32
  }
  func.func @transform_9(%arg0: i32) -> (i32, i32) {
    %c0_i32 = arith.constant 0 : i32
    %c0_i32_0 = arith.constant 0 : i32
    %c0_i32_1 = arith.constant 0 : i32
    return %c0_i32, %c0_i32_0 : i32, i32
  }
  func.func @transform_10(%arg0: i32) -> (i32, i32) {
    %c0_i32 = arith.constant 0 : i32
    %c0_i32_0 = arith.constant 0 : i32
    %c0_i32_1 = arith.constant 0 : i32
    return %c0_i32, %c0_i32_0 : i32, i32
  }
  func.func @transform_11(%arg0: i32) -> (i32, i32) {
    %c0_i32 = arith.constant 0 : i32
    %c0_i32_0 = arith.constant 0 : i32
    %c0_i32_1 = arith.constant 0 : i32
    return %c0_i32, %c0_i32_0 : i32, i32
  }
  func.func @transform_12(%arg0: i32) -> (i32, i32) {
    %c0_i32 = arith.constant 0 : i32
    %c0_i32_0 = arith.constant 0 : i32
    %c0_i32_1 = arith.constant 0 : i32
    return %c0_i32, %c0_i32_0 : i32, i32
  }
  func.func @transform_13(%arg0: i32) -> (i32, i32) {
    %c0_i32 = arith.constant 0 : i32
    %c0_i32_0 = arith.constant 0 : i32
    %c0_i32_1 = arith.constant 0 : i32
    return %c0_i32, %c0_i32_0 : i32, i32
  }
  func.func @transform_14(%arg0: i32) -> (i32, i32, i32) {
    %c0_i32 = arith.constant 0 : i32
    %c0_i32_0 = arith.constant 0 : i32
    %c0_i32_1 = arith.constant 0 : i32
    return %arg0, %c0_i32, %c0_i32_0 : i32, i32, i32
  }
}

module attributes {stable_mosaic.version = 11 : i64} {
  func.func @_dec_layer_kernel(%arg0: i32, %arg1: memref<1x8x128xbf16, #tpu.memory_space<vmem>>, %arg2: memref<1x8x128xbf16, #tpu.memory_space<vmem>>, %arg3: memref<128x384xbf16, #tpu.memory_space<vmem>>, %arg4: memref<1x384xf32, #tpu.memory_space<vmem>>, %arg5: memref<128x128xbf16, #tpu.memory_space<vmem>>, %arg6: memref<1x128xf32, #tpu.memory_space<vmem>>, %arg7: memref<1x128xf32, #tpu.memory_space<vmem>>, %arg8: memref<1x128xf32, #tpu.memory_space<vmem>>, %arg9: memref<128x128xbf16, #tpu.memory_space<vmem>>, %arg10: memref<1x128xf32, #tpu.memory_space<vmem>>, %arg11: memref<128x256xbf16, #tpu.memory_space<vmem>>, %arg12: memref<1x256xf32, #tpu.memory_space<vmem>>, %arg13: memref<128x128xbf16, #tpu.memory_space<vmem>>, %arg14: memref<1x128xf32, #tpu.memory_space<vmem>>, %arg15: memref<1x128xf32, #tpu.memory_space<vmem>>, %arg16: memref<1x128xf32, #tpu.memory_space<vmem>>, %arg17: memref<128x128xbf16, #tpu.memory_space<vmem>>, %arg18: memref<1x128xf32, #tpu.memory_space<vmem>>, %arg19: memref<128x128xbf16, #tpu.memory_space<vmem>>, %arg20: memref<1x128xf32, #tpu.memory_space<vmem>>, %arg21: memref<1x128xf32, #tpu.memory_space<vmem>>, %arg22: memref<1x128xf32, #tpu.memory_space<vmem>>, %arg23: memref<1x8x128xbf16, #tpu.memory_space<vmem>>) attributes {dimension_semantics = [#tpu.dimension_semantics<parallel>], iteration_bounds = array<i64: 2>, scalar_prefetch = 0 : i64, scratch_operands = 0 : i64, tpu.core_type = #tpu.core_type<tc>, window_params = [{transform_indices = @transform_0, window_bounds = array<i64: 1, 8, 128>}, {transform_indices = @transform_1, window_bounds = array<i64: 1, 8, 128>}, {pipeline_mode = #tpu.pipeline_mode<synchronous>, transform_indices = @transform_2, window_bounds = array<i64: 128, 384>}, {pipeline_mode = #tpu.pipeline_mode<synchronous>, transform_indices = @transform_3, window_bounds = array<i64: 1, 384>}, {pipeline_mode = #tpu.pipeline_mode<synchronous>, transform_indices = @transform_4, window_bounds = array<i64: 128, 128>}, {pipeline_mode = #tpu.pipeline_mode<synchronous>, transform_indices = @transform_5, window_bounds = array<i64: 1, 128>}, {pipeline_mode = #tpu.pipeline_mode<synchronous>, transform_indices = @transform_6, window_bounds = array<i64: 1, 128>}, {pipeline_mode = #tpu.pipeline_mode<synchronous>, transform_indices = @transform_7, window_bounds = array<i64: 1, 128>}, {pipeline_mode = #tpu.pipeline_mode<synchronous>, transform_indices = @transform_8, window_bounds = array<i64: 128, 128>}, {pipeline_mode = #tpu.pipeline_mode<synchronous>, transform_indices = @transform_9, window_bounds = array<i64: 1, 128>}, {pipeline_mode = #tpu.pipeline_mode<synchronous>, transform_indices = @transform_10, window_bounds = array<i64: 128, 256>}, {pipeline_mode = #tpu.pipeline_mode<synchronous>, transform_indices = @transform_11, window_bounds = array<i64: 1, 256>}, {pipeline_mode = #tpu.pipeline_mode<synchronous>, transform_indices = @transform_12, window_bounds = array<i64: 128, 128>}, {pipeline_mode = #tpu.pipeline_mode<synchronous>, transform_indices = @transform_13, window_bounds = array<i64: 1, 128>}, {pipeline_mode = #tpu.pipeline_mode<synchronous>, transform_indices = @transform_14, window_bounds = array<i64: 1, 128>}, {pipeline_mode = #tpu.pipeline_mode<synchronous>, transform_indices = @transform_15, window_bounds = array<i64: 1, 128>}, {pipeline_mode = #tpu.pipeline_mode<synchronous>, transform_indices = @transform_16, window_bounds = array<i64: 128, 128>}, {pipeline_mode = #tpu.pipeline_mode<synchronous>, transform_indices = @transform_17, window_bounds = array<i64: 1, 128>}, {pipeline_mode = #tpu.pipeline_mode<synchronous>, transform_indices = @transform_18, window_bounds = array<i64: 128, 128>}, {pipeline_mode = #tpu.pipeline_mode<synchronous>, transform_indices = @transform_19, window_bounds = array<i64: 1, 128>}, {pipeline_mode = #tpu.pipeline_mode<synchronous>, transform_indices = @transform_20, window_bounds = array<i64: 1, 128>}, {pipeline_mode = #tpu.pipeline_mode<synchronous>, transform_indices = @transform_21, window_bounds = array<i64: 1, 128>}, {transform_indices = @transform_22, window_bounds = array<i64: 1, 8, 128>}]} {
    %c0 = arith.constant 0 : index
    %c0_0 = arith.constant 0 : index
    %c0_1 = arith.constant 0 : index
    %0 = vector.load %arg1[%c0, %c0_0, %c0_1] : memref<1x8x128xbf16, #tpu.memory_space<vmem>>, vector<1x8x128xbf16>
    %1 = vector.shape_cast %0 : vector<1x8x128xbf16> to vector<8x128xbf16>
    %c0_2 = arith.constant 0 : index
    %c0_3 = arith.constant 0 : index
    %c0_4 = arith.constant 0 : index
    %2 = vector.load %arg2[%c0_2, %c0_3, %c0_4] : memref<1x8x128xbf16, #tpu.memory_space<vmem>>, vector<1x8x128xbf16>
    %3 = vector.shape_cast %2 : vector<1x8x128xbf16> to vector<8x128xbf16>
    %c0_5 = arith.constant 0 : index
    %c0_6 = arith.constant 0 : index
    %4 = vector.load %arg3[%c0_5, %c0_6] : memref<128x384xbf16, #tpu.memory_space<vmem>>, vector<128x384xbf16>
    %cst = arith.constant dense<0.000000e+00> : vector<8x384xf32>
    %5 = tpu.matmul %1, %4, %cst {dimension_numbers = #tpu.dot_dimension_numbers<[1], [0], [0], [1], [0, 0, 1, 1], [], []>} : vector<8x128xbf16>, vector<128x384xbf16>, vector<8x384xf32> -> vector<8x384xf32>
    %c0_7 = arith.constant 0 : index
    %c0_8 = arith.constant 0 : index
    %6 = vector.load %arg4[%c0_7, %c0_8] : memref<1x384xf32, #tpu.memory_space<vmem>>, vector<1x384xf32>
    %7 = vector.broadcast %6 : vector<1x384xf32> to vector<8x384xf32>
    %8 = arith.addf %5, %7 : vector<8x384xf32>
    %9 = arith.truncf %8 : vector<8x384xf32> to vector<8x384xbf16>
    %c0_9 = arith.constant 0 : index
    %c0_10 = arith.constant 0 : index
    %10 = vector.load %arg5[%c0_9, %c0_10] : memref<128x128xbf16, #tpu.memory_space<vmem>>, vector<128x128xbf16>
    %11 = tpu.iota {dimensions = array<i32: 0>} : vector<8x8xi32>
    %12 = tpu.iota {dimensions = array<i32: 1>} : vector<8x8xi32>
    %13 = arith.cmpi sgt, %12, %11 : vector<8x8xi32>
    %cst_11 = arith.constant -1.000000e+09 : f32
    %cst_12 = arith.constant 0.000000e+00 : f32
    %14 = vector.broadcast %cst_11 : f32 to vector<8x8xf32>
    %15 = vector.broadcast %cst_12 : f32 to vector<8x8xf32>
    %16 = arith.select %13, %14, %15 : vector<8x8xi1>, vector<8x8xf32>
    %17 = vector.extract_strided_slice %9 {offsets = [0, 0], sizes = [8, 8], strides = [1, 1]} : vector<8x384xbf16> to vector<8x8xbf16>
    %18 = vector.extract_strided_slice %9 {offsets = [0, 128], sizes = [8, 8], strides = [1, 1]} : vector<8x384xbf16> to vector<8x8xbf16>
    %19 = vector.extract_strided_slice %9 {offsets = [0, 256], sizes = [8, 8], strides = [1, 1]} : vector<8x384xbf16> to vector<8x8xbf16>
    %cst_13 = arith.constant dense<0.000000e+00> : vector<8x8xf32>
    %20 = tpu.matmul %17, %18, %cst_13 {dimension_numbers = #tpu.dot_dimension_numbers<[1], [1], [0], [0], [0, 0, 1, 0], [], []>} : vector<8x8xbf16>, vector<8x8xbf16>, vector<8x8xf32> -> vector<8x8xf32>
    %cst_14 = arith.constant 0.353553385 : f32
    %21 = vector.broadcast %cst_14 : f32 to vector<8x8xf32>
    %22 = arith.mulf %20, %21 : vector<8x8xf32>
    %23 = arith.addf %22, %16 : vector<8x8xf32>
    %cst_15 = arith.constant dense<0xFF800000> : vector<8xf32>
    %24 = vector.multi_reduction <maximumf>, %23, %cst_15 [1] : vector<8x8xf32> to vector<8xf32>
    %25 = vector.shape_cast %24 : vector<8xf32> to vector<8x1xf32>
    %26 = vector.broadcast %25 : vector<8x1xf32> to vector<8x8xf32>
    %27 = arith.subf %23, %26 : vector<8x8xf32>
    %28 = math.exp %27 : vector<8x8xf32>
    %cst_16 = arith.constant dense<0.000000e+00> : vector<8xf32>
    %29 = vector.multi_reduction <add>, %28, %cst_16 [1] : vector<8x8xf32> to vector<8xf32>
    %30 = vector.shape_cast %29 : vector<8xf32> to vector<8x1xf32>
    %31 = arith.truncf %28 : vector<8x8xf32> to vector<8x8xbf16>
    %cst_17 = arith.constant dense<0.000000e+00> : vector<8x8xf32>
    %32 = tpu.matmul %31, %19, %cst_17 {dimension_numbers = #tpu.dot_dimension_numbers<[1], [0], [0], [1], [0, 0, 1, 1], [], []>} : vector<8x8xbf16>, vector<8x8xbf16>, vector<8x8xf32> -> vector<8x8xf32>
    %33 = tpu.reciprocal %30 {approx = true} : vector<8x1xf32> -> vector<8x1xf32>
    %34 = vector.broadcast %33 : vector<8x1xf32> to vector<8x8xf32>
    %35 = arith.mulf %32, %34 : vector<8x8xf32>
    %36 = arith.truncf %35 : vector<8x8xf32> to vector<8x8xbf16>
    %37 = vector.extract_strided_slice %10 {offsets = [0, 0], sizes = [8, 128], strides = [1, 1]} : vector<128x128xbf16> to vector<8x128xbf16>
    %cst_18 = arith.constant dense<0.000000e+00> : vector<8x128xf32>
    %38 = tpu.matmul %36, %37, %cst_18 {dimension_numbers = #tpu.dot_dimension_numbers<[1], [0], [0], [1], [0, 0, 1, 1], [], []>} : vector<8x8xbf16>, vector<8x128xbf16>, vector<8x128xf32> -> vector<8x128xf32>
    %39 = vector.extract_strided_slice %9 {offsets = [0, 8], sizes = [8, 8], strides = [1, 1]} : vector<8x384xbf16> to vector<8x8xbf16>
    %40 = vector.extract_strided_slice %9 {offsets = [0, 136], sizes = [8, 8], strides = [1, 1]} : vector<8x384xbf16> to vector<8x8xbf16>
    %41 = vector.extract_strided_slice %9 {offsets = [0, 264], sizes = [8, 8], strides = [1, 1]} : vector<8x384xbf16> to vector<8x8xbf16>
    %cst_19 = arith.constant dense<0.000000e+00> : vector<8x8xf32>
    %42 = tpu.matmul %39, %40, %cst_19 {dimension_numbers = #tpu.dot_dimension_numbers<[1], [1], [0], [0], [0, 0, 1, 0], [], []>} : vector<8x8xbf16>, vector<8x8xbf16>, vector<8x8xf32> -> vector<8x8xf32>
    %cst_20 = arith.constant 0.353553385 : f32
    %43 = vector.broadcast %cst_20 : f32 to vector<8x8xf32>
    %44 = arith.mulf %42, %43 : vector<8x8xf32>
    %45 = arith.addf %44, %16 : vector<8x8xf32>
    %cst_21 = arith.constant dense<0xFF800000> : vector<8xf32>
    %46 = vector.multi_reduction <maximumf>, %45, %cst_21 [1] : vector<8x8xf32> to vector<8xf32>
    %47 = vector.shape_cast %46 : vector<8xf32> to vector<8x1xf32>
    %48 = vector.broadcast %47 : vector<8x1xf32> to vector<8x8xf32>
    %49 = arith.subf %45, %48 : vector<8x8xf32>
    %50 = math.exp %49 : vector<8x8xf32>
    %cst_22 = arith.constant dense<0.000000e+00> : vector<8xf32>
    %51 = vector.multi_reduction <add>, %50, %cst_22 [1] : vector<8x8xf32> to vector<8xf32>
    %52 = vector.shape_cast %51 : vector<8xf32> to vector<8x1xf32>
    %53 = arith.truncf %50 : vector<8x8xf32> to vector<8x8xbf16>
    %cst_23 = arith.constant dense<0.000000e+00> : vector<8x8xf32>
    %54 = tpu.matmul %53, %41, %cst_23 {dimension_numbers = #tpu.dot_dimension_numbers<[1], [0], [0], [1], [0, 0, 1, 1], [], []>} : vector<8x8xbf16>, vector<8x8xbf16>, vector<8x8xf32> -> vector<8x8xf32>
    %55 = tpu.reciprocal %52 {approx = true} : vector<8x1xf32> -> vector<8x1xf32>
    %56 = vector.broadcast %55 : vector<8x1xf32> to vector<8x8xf32>
    %57 = arith.mulf %54, %56 : vector<8x8xf32>
    %58 = arith.truncf %57 : vector<8x8xf32> to vector<8x8xbf16>
    %59 = vector.extract_strided_slice %10 {offsets = [8, 0], sizes = [8, 128], strides = [1, 1]} : vector<128x128xbf16> to vector<8x128xbf16>
    %cst_24 = arith.constant dense<0.000000e+00> : vector<8x128xf32>
    %60 = tpu.matmul %58, %59, %cst_24 {dimension_numbers = #tpu.dot_dimension_numbers<[1], [0], [0], [1], [0, 0, 1, 1], [], []>} : vector<8x8xbf16>, vector<8x128xbf16>, vector<8x128xf32> -> vector<8x128xf32>
    %61 = arith.addf %38, %60 : vector<8x128xf32>
    %62 = vector.extract_strided_slice %9 {offsets = [0, 16], sizes = [8, 8], strides = [1, 1]} : vector<8x384xbf16> to vector<8x8xbf16>
    %63 = vector.extract_strided_slice %9 {offsets = [0, 144], sizes = [8, 8], strides = [1, 1]} : vector<8x384xbf16> to vector<8x8xbf16>
    %64 = vector.extract_strided_slice %9 {offsets = [0, 272], sizes = [8, 8], strides = [1, 1]} : vector<8x384xbf16> to vector<8x8xbf16>
    %cst_25 = arith.constant dense<0.000000e+00> : vector<8x8xf32>
    %65 = tpu.matmul %62, %63, %cst_25 {dimension_numbers = #tpu.dot_dimension_numbers<[1], [1], [0], [0], [0, 0, 1, 0], [], []>} : vector<8x8xbf16>, vector<8x8xbf16>, vector<8x8xf32> -> vector<8x8xf32>
    %cst_26 = arith.constant 0.353553385 : f32
    %66 = vector.broadcast %cst_26 : f32 to vector<8x8xf32>
    %67 = arith.mulf %65, %66 : vector<8x8xf32>
    %68 = arith.addf %67, %16 : vector<8x8xf32>
    %cst_27 = arith.constant dense<0xFF800000> : vector<8xf32>
    %69 = vector.multi_reduction <maximumf>, %68, %cst_27 [1] : vector<8x8xf32> to vector<8xf32>
    %70 = vector.shape_cast %69 : vector<8xf32> to vector<8x1xf32>
    %71 = vector.broadcast %70 : vector<8x1xf32> to vector<8x8xf32>
    %72 = arith.subf %68, %71 : vector<8x8xf32>
    %73 = math.exp %72 : vector<8x8xf32>
    %cst_28 = arith.constant dense<0.000000e+00> : vector<8xf32>
    %74 = vector.multi_reduction <add>, %73, %cst_28 [1] : vector<8x8xf32> to vector<8xf32>
    %75 = vector.shape_cast %74 : vector<8xf32> to vector<8x1xf32>
    %76 = arith.truncf %73 : vector<8x8xf32> to vector<8x8xbf16>
    %cst_29 = arith.constant dense<0.000000e+00> : vector<8x8xf32>
    %77 = tpu.matmul %76, %64, %cst_29 {dimension_numbers = #tpu.dot_dimension_numbers<[1], [0], [0], [1], [0, 0, 1, 1], [], []>} : vector<8x8xbf16>, vector<8x8xbf16>, vector<8x8xf32> -> vector<8x8xf32>
    %78 = tpu.reciprocal %75 {approx = true} : vector<8x1xf32> -> vector<8x1xf32>
    %79 = vector.broadcast %78 : vector<8x1xf32> to vector<8x8xf32>
    %80 = arith.mulf %77, %79 : vector<8x8xf32>
    %81 = arith.truncf %80 : vector<8x8xf32> to vector<8x8xbf16>
    %82 = vector.extract_strided_slice %10 {offsets = [16, 0], sizes = [8, 128], strides = [1, 1]} : vector<128x128xbf16> to vector<8x128xbf16>
    %cst_30 = arith.constant dense<0.000000e+00> : vector<8x128xf32>
    %83 = tpu.matmul %81, %82, %cst_30 {dimension_numbers = #tpu.dot_dimension_numbers<[1], [0], [0], [1], [0, 0, 1, 1], [], []>} : vector<8x8xbf16>, vector<8x128xbf16>, vector<8x128xf32> -> vector<8x128xf32>
    %84 = arith.addf %61, %83 : vector<8x128xf32>
    %85 = vector.extract_strided_slice %9 {offsets = [0, 24], sizes = [8, 8], strides = [1, 1]} : vector<8x384xbf16> to vector<8x8xbf16>
    %86 = vector.extract_strided_slice %9 {offsets = [0, 152], sizes = [8, 8], strides = [1, 1]} : vector<8x384xbf16> to vector<8x8xbf16>
    %87 = vector.extract_strided_slice %9 {offsets = [0, 280], sizes = [8, 8], strides = [1, 1]} : vector<8x384xbf16> to vector<8x8xbf16>
    %cst_31 = arith.constant dense<0.000000e+00> : vector<8x8xf32>
    %88 = tpu.matmul %85, %86, %cst_31 {dimension_numbers = #tpu.dot_dimension_numbers<[1], [1], [0], [0], [0, 0, 1, 0], [], []>} : vector<8x8xbf16>, vector<8x8xbf16>, vector<8x8xf32> -> vector<8x8xf32>
    %cst_32 = arith.constant 0.353553385 : f32
    %89 = vector.broadcast %cst_32 : f32 to vector<8x8xf32>
    %90 = arith.mulf %88, %89 : vector<8x8xf32>
    %91 = arith.addf %90, %16 : vector<8x8xf32>
    %cst_33 = arith.constant dense<0xFF800000> : vector<8xf32>
    %92 = vector.multi_reduction <maximumf>, %91, %cst_33 [1] : vector<8x8xf32> to vector<8xf32>
    %93 = vector.shape_cast %92 : vector<8xf32> to vector<8x1xf32>
    %94 = vector.broadcast %93 : vector<8x1xf32> to vector<8x8xf32>
    %95 = arith.subf %91, %94 : vector<8x8xf32>
    %96 = math.exp %95 : vector<8x8xf32>
    %cst_34 = arith.constant dense<0.000000e+00> : vector<8xf32>
    %97 = vector.multi_reduction <add>, %96, %cst_34 [1] : vector<8x8xf32> to vector<8xf32>
    %98 = vector.shape_cast %97 : vector<8xf32> to vector<8x1xf32>
    %99 = arith.truncf %96 : vector<8x8xf32> to vector<8x8xbf16>
    %cst_35 = arith.constant dense<0.000000e+00> : vector<8x8xf32>
    %100 = tpu.matmul %99, %87, %cst_35 {dimension_numbers = #tpu.dot_dimension_numbers<[1], [0], [0], [1], [0, 0, 1, 1], [], []>} : vector<8x8xbf16>, vector<8x8xbf16>, vector<8x8xf32> -> vector<8x8xf32>
    %101 = tpu.reciprocal %98 {approx = true} : vector<8x1xf32> -> vector<8x1xf32>
    %102 = vector.broadcast %101 : vector<8x1xf32> to vector<8x8xf32>
    %103 = arith.mulf %100, %102 : vector<8x8xf32>
    %104 = arith.truncf %103 : vector<8x8xf32> to vector<8x8xbf16>
    %105 = vector.extract_strided_slice %10 {offsets = [24, 0], sizes = [8, 128], strides = [1, 1]} : vector<128x128xbf16> to vector<8x128xbf16>
    %cst_36 = arith.constant dense<0.000000e+00> : vector<8x128xf32>
    %106 = tpu.matmul %104, %105, %cst_36 {dimension_numbers = #tpu.dot_dimension_numbers<[1], [0], [0], [1], [0, 0, 1, 1], [], []>} : vector<8x8xbf16>, vector<8x128xbf16>, vector<8x128xf32> -> vector<8x128xf32>
    %107 = arith.addf %84, %106 : vector<8x128xf32>
    %c0_37 = arith.constant 0 : index
    %c0_38 = arith.constant 0 : index
    %108 = vector.load %arg6[%c0_37, %c0_38] : memref<1x128xf32, #tpu.memory_space<vmem>>, vector<1x128xf32>
    %109 = vector.broadcast %108 : vector<1x128xf32> to vector<8x128xf32>
    %110 = arith.addf %107, %109 : vector<8x128xf32>
    %111 = arith.extf %1 : vector<8x128xbf16> to vector<8x128xf32>
    %112 = arith.addf %110, %111 : vector<8x128xf32>
    %c0_39 = arith.constant 0 : index
    %c0_40 = arith.constant 0 : index
    %113 = vector.load %arg7[%c0_39, %c0_40] : memref<1x128xf32, #tpu.memory_space<vmem>>, vector<1x128xf32>
    %c0_41 = arith.constant 0 : index
    %c0_42 = arith.constant 0 : index
    %114 = vector.load %arg8[%c0_41, %c0_42] : memref<1x128xf32, #tpu.memory_space<vmem>>, vector<1x128xf32>
    %cst_43 = arith.constant dense<0.000000e+00> : vector<8xf32>
    %115 = vector.multi_reduction <add>, %112, %cst_43 [1] : vector<8x128xf32> to vector<8xf32>
    %116 = vector.shape_cast %115 : vector<8xf32> to vector<8x1xf32>
    %cst_44 = arith.constant 3.125000e-02 : f32
    %117 = vector.broadcast %cst_44 : f32 to vector<8x1xf32>
    %118 = arith.mulf %116, %117 : vector<8x1xf32>
    %119 = arith.mulf %112, %112 : vector<8x128xf32>
    %cst_45 = arith.constant dense<0.000000e+00> : vector<8xf32>
    %120 = vector.multi_reduction <add>, %119, %cst_45 [1] : vector<8x128xf32> to vector<8xf32>
    %121 = vector.shape_cast %120 : vector<8xf32> to vector<8x1xf32>
    %cst_46 = arith.constant 3.125000e-02 : f32
    %122 = vector.broadcast %cst_46 : f32 to vector<8x1xf32>
    %123 = arith.mulf %121, %122 : vector<8x1xf32>
    %124 = arith.mulf %118, %118 : vector<8x1xf32>
    %125 = arith.subf %123, %124 : vector<8x1xf32>
    %cst_47 = arith.constant 0.000000e+00 : f32
    %126 = vector.broadcast %cst_47 : f32 to vector<8x1xf32>
    %127 = arith.maximumf %125, %126 : vector<8x1xf32>
    %128 = vector.broadcast %118 : vector<8x1xf32> to vector<8x128xf32>
    %129 = arith.subf %112, %128 : vector<8x128xf32>
    %cst_48 = arith.constant 9.99999974E-6 : f32
    %130 = vector.broadcast %cst_48 : f32 to vector<8x1xf32>
    %131 = arith.addf %127, %130 : vector<8x1xf32>
    %132 = math.rsqrt %131 : vector<8x1xf32>
    %133 = vector.broadcast %132 : vector<8x1xf32> to vector<8x128xf32>
    %134 = arith.mulf %129, %133 : vector<8x128xf32>
    %135 = vector.broadcast %113 : vector<1x128xf32> to vector<8x128xf32>
    %136 = arith.mulf %134, %135 : vector<8x128xf32>
    %137 = vector.broadcast %114 : vector<1x128xf32> to vector<8x128xf32>
    %138 = arith.addf %136, %137 : vector<8x128xf32>
    %139 = arith.truncf %138 : vector<8x128xf32> to vector<8x128xbf16>
    %c0_49 = arith.constant 0 : index
    %c0_50 = arith.constant 0 : index
    %140 = vector.load %arg9[%c0_49, %c0_50] : memref<128x128xbf16, #tpu.memory_space<vmem>>, vector<128x128xbf16>
    %cst_51 = arith.constant dense<0.000000e+00> : vector<8x128xf32>
    %141 = tpu.matmul %139, %140, %cst_51 {dimension_numbers = #tpu.dot_dimension_numbers<[1], [0], [0], [1], [0, 0, 1, 1], [], []>} : vector<8x128xbf16>, vector<128x128xbf16>, vector<8x128xf32> -> vector<8x128xf32>
    %c0_52 = arith.constant 0 : index
    %c0_53 = arith.constant 0 : index
    %142 = vector.load %arg10[%c0_52, %c0_53] : memref<1x128xf32, #tpu.memory_space<vmem>>, vector<1x128xf32>
    %143 = vector.broadcast %142 : vector<1x128xf32> to vector<8x128xf32>
    %144 = arith.addf %141, %143 : vector<8x128xf32>
    %145 = arith.truncf %144 : vector<8x128xf32> to vector<8x128xbf16>
    %c0_54 = arith.constant 0 : index
    %c0_55 = arith.constant 0 : index
    %146 = vector.load %arg11[%c0_54, %c0_55] : memref<128x256xbf16, #tpu.memory_space<vmem>>, vector<128x256xbf16>
    %cst_56 = arith.constant dense<0.000000e+00> : vector<8x256xf32>
    %147 = tpu.matmul %3, %146, %cst_56 {dimension_numbers = #tpu.dot_dimension_numbers<[1], [0], [0], [1], [0, 0, 1, 1], [], []>} : vector<8x128xbf16>, vector<128x256xbf16>, vector<8x256xf32> -> vector<8x256xf32>
    %c0_57 = arith.constant 0 : index
    %c0_58 = arith.constant 0 : index
    %148 = vector.load %arg12[%c0_57, %c0_58] : memref<1x256xf32, #tpu.memory_space<vmem>>, vector<1x256xf32>
    %149 = vector.broadcast %148 : vector<1x256xf32> to vector<8x256xf32>
    %150 = arith.addf %147, %149 : vector<8x256xf32>
    %151 = arith.truncf %150 : vector<8x256xf32> to vector<8x256xbf16>
    %c0_59 = arith.constant 0 : index
    %c0_60 = arith.constant 0 : index
    %152 = vector.load %arg13[%c0_59, %c0_60] : memref<128x128xbf16, #tpu.memory_space<vmem>>, vector<128x128xbf16>
    %153 = vector.extract_strided_slice %145 {offsets = [0, 0], sizes = [8, 8], strides = [1, 1]} : vector<8x128xbf16> to vector<8x8xbf16>
    %154 = vector.extract_strided_slice %151 {offsets = [0, 0], sizes = [8, 8], strides = [1, 1]} : vector<8x256xbf16> to vector<8x8xbf16>
    %155 = vector.extract_strided_slice %151 {offsets = [0, 128], sizes = [8, 8], strides = [1, 1]} : vector<8x256xbf16> to vector<8x8xbf16>
    %cst_61 = arith.constant dense<0.000000e+00> : vector<8x8xf32>
    %156 = tpu.matmul %153, %154, %cst_61 {dimension_numbers = #tpu.dot_dimension_numbers<[1], [1], [0], [0], [0, 0, 1, 0], [], []>} : vector<8x8xbf16>, vector<8x8xbf16>, vector<8x8xf32> -> vector<8x8xf32>
    %cst_62 = arith.constant 0.353553385 : f32
    %157 = vector.broadcast %cst_62 : f32 to vector<8x8xf32>
    %158 = arith.mulf %156, %157 : vector<8x8xf32>
    %cst_63 = arith.constant dense<0xFF800000> : vector<8xf32>
    %159 = vector.multi_reduction <maximumf>, %158, %cst_63 [1] : vector<8x8xf32> to vector<8xf32>
    %160 = vector.shape_cast %159 : vector<8xf32> to vector<8x1xf32>
    %161 = vector.broadcast %160 : vector<8x1xf32> to vector<8x8xf32>
    %162 = arith.subf %158, %161 : vector<8x8xf32>
    %163 = math.exp %162 : vector<8x8xf32>
    %cst_64 = arith.constant dense<0.000000e+00> : vector<8xf32>
    %164 = vector.multi_reduction <add>, %163, %cst_64 [1] : vector<8x8xf32> to vector<8xf32>
    %165 = vector.shape_cast %164 : vector<8xf32> to vector<8x1xf32>
    %166 = arith.truncf %163 : vector<8x8xf32> to vector<8x8xbf16>
    %cst_65 = arith.constant dense<0.000000e+00> : vector<8x8xf32>
    %167 = tpu.matmul %166, %155, %cst_65 {dimension_numbers = #tpu.dot_dimension_numbers<[1], [0], [0], [1], [0, 0, 1, 1], [], []>} : vector<8x8xbf16>, vector<8x8xbf16>, vector<8x8xf32> -> vector<8x8xf32>
    %168 = tpu.reciprocal %165 {approx = true} : vector<8x1xf32> -> vector<8x1xf32>
    %169 = vector.broadcast %168 : vector<8x1xf32> to vector<8x8xf32>
    %170 = arith.mulf %167, %169 : vector<8x8xf32>
    %171 = arith.truncf %170 : vector<8x8xf32> to vector<8x8xbf16>
    %172 = vector.extract_strided_slice %152 {offsets = [0, 0], sizes = [8, 128], strides = [1, 1]} : vector<128x128xbf16> to vector<8x128xbf16>
    %cst_66 = arith.constant dense<0.000000e+00> : vector<8x128xf32>
    %173 = tpu.matmul %171, %172, %cst_66 {dimension_numbers = #tpu.dot_dimension_numbers<[1], [0], [0], [1], [0, 0, 1, 1], [], []>} : vector<8x8xbf16>, vector<8x128xbf16>, vector<8x128xf32> -> vector<8x128xf32>
    %174 = vector.extract_strided_slice %145 {offsets = [0, 8], sizes = [8, 8], strides = [1, 1]} : vector<8x128xbf16> to vector<8x8xbf16>
    %175 = vector.extract_strided_slice %151 {offsets = [0, 8], sizes = [8, 8], strides = [1, 1]} : vector<8x256xbf16> to vector<8x8xbf16>
    %176 = vector.extract_strided_slice %151 {offsets = [0, 136], sizes = [8, 8], strides = [1, 1]} : vector<8x256xbf16> to vector<8x8xbf16>
    %cst_67 = arith.constant dense<0.000000e+00> : vector<8x8xf32>
    %177 = tpu.matmul %174, %175, %cst_67 {dimension_numbers = #tpu.dot_dimension_numbers<[1], [1], [0], [0], [0, 0, 1, 0], [], []>} : vector<8x8xbf16>, vector<8x8xbf16>, vector<8x8xf32> -> vector<8x8xf32>
    %cst_68 = arith.constant 0.353553385 : f32
    %178 = vector.broadcast %cst_68 : f32 to vector<8x8xf32>
    %179 = arith.mulf %177, %178 : vector<8x8xf32>
    %cst_69 = arith.constant dense<0xFF800000> : vector<8xf32>
    %180 = vector.multi_reduction <maximumf>, %179, %cst_69 [1] : vector<8x8xf32> to vector<8xf32>
    %181 = vector.shape_cast %180 : vector<8xf32> to vector<8x1xf32>
    %182 = vector.broadcast %181 : vector<8x1xf32> to vector<8x8xf32>
    %183 = arith.subf %179, %182 : vector<8x8xf32>
    %184 = math.exp %183 : vector<8x8xf32>
    %cst_70 = arith.constant dense<0.000000e+00> : vector<8xf32>
    %185 = vector.multi_reduction <add>, %184, %cst_70 [1] : vector<8x8xf32> to vector<8xf32>
    %186 = vector.shape_cast %185 : vector<8xf32> to vector<8x1xf32>
    %187 = arith.truncf %184 : vector<8x8xf32> to vector<8x8xbf16>
    %cst_71 = arith.constant dense<0.000000e+00> : vector<8x8xf32>
    %188 = tpu.matmul %187, %176, %cst_71 {dimension_numbers = #tpu.dot_dimension_numbers<[1], [0], [0], [1], [0, 0, 1, 1], [], []>} : vector<8x8xbf16>, vector<8x8xbf16>, vector<8x8xf32> -> vector<8x8xf32>
    %189 = tpu.reciprocal %186 {approx = true} : vector<8x1xf32> -> vector<8x1xf32>
    %190 = vector.broadcast %189 : vector<8x1xf32> to vector<8x8xf32>
    %191 = arith.mulf %188, %190 : vector<8x8xf32>
    %192 = arith.truncf %191 : vector<8x8xf32> to vector<8x8xbf16>
    %193 = vector.extract_strided_slice %152 {offsets = [8, 0], sizes = [8, 128], strides = [1, 1]} : vector<128x128xbf16> to vector<8x128xbf16>
    %cst_72 = arith.constant dense<0.000000e+00> : vector<8x128xf32>
    %194 = tpu.matmul %192, %193, %cst_72 {dimension_numbers = #tpu.dot_dimension_numbers<[1], [0], [0], [1], [0, 0, 1, 1], [], []>} : vector<8x8xbf16>, vector<8x128xbf16>, vector<8x128xf32> -> vector<8x128xf32>
    %195 = arith.addf %173, %194 : vector<8x128xf32>
    %196 = vector.extract_strided_slice %145 {offsets = [0, 16], sizes = [8, 8], strides = [1, 1]} : vector<8x128xbf16> to vector<8x8xbf16>
    %197 = vector.extract_strided_slice %151 {offsets = [0, 16], sizes = [8, 8], strides = [1, 1]} : vector<8x256xbf16> to vector<8x8xbf16>
    %198 = vector.extract_strided_slice %151 {offsets = [0, 144], sizes = [8, 8], strides = [1, 1]} : vector<8x256xbf16> to vector<8x8xbf16>
    %cst_73 = arith.constant dense<0.000000e+00> : vector<8x8xf32>
    %199 = tpu.matmul %196, %197, %cst_73 {dimension_numbers = #tpu.dot_dimension_numbers<[1], [1], [0], [0], [0, 0, 1, 0], [], []>} : vector<8x8xbf16>, vector<8x8xbf16>, vector<8x8xf32> -> vector<8x8xf32>
    %cst_74 = arith.constant 0.353553385 : f32
    %200 = vector.broadcast %cst_74 : f32 to vector<8x8xf32>
    %201 = arith.mulf %199, %200 : vector<8x8xf32>
    %cst_75 = arith.constant dense<0xFF800000> : vector<8xf32>
    %202 = vector.multi_reduction <maximumf>, %201, %cst_75 [1] : vector<8x8xf32> to vector<8xf32>
    %203 = vector.shape_cast %202 : vector<8xf32> to vector<8x1xf32>
    %204 = vector.broadcast %203 : vector<8x1xf32> to vector<8x8xf32>
    %205 = arith.subf %201, %204 : vector<8x8xf32>
    %206 = math.exp %205 : vector<8x8xf32>
    %cst_76 = arith.constant dense<0.000000e+00> : vector<8xf32>
    %207 = vector.multi_reduction <add>, %206, %cst_76 [1] : vector<8x8xf32> to vector<8xf32>
    %208 = vector.shape_cast %207 : vector<8xf32> to vector<8x1xf32>
    %209 = arith.truncf %206 : vector<8x8xf32> to vector<8x8xbf16>
    %cst_77 = arith.constant dense<0.000000e+00> : vector<8x8xf32>
    %210 = tpu.matmul %209, %198, %cst_77 {dimension_numbers = #tpu.dot_dimension_numbers<[1], [0], [0], [1], [0, 0, 1, 1], [], []>} : vector<8x8xbf16>, vector<8x8xbf16>, vector<8x8xf32> -> vector<8x8xf32>
    %211 = tpu.reciprocal %208 {approx = true} : vector<8x1xf32> -> vector<8x1xf32>
    %212 = vector.broadcast %211 : vector<8x1xf32> to vector<8x8xf32>
    %213 = arith.mulf %210, %212 : vector<8x8xf32>
    %214 = arith.truncf %213 : vector<8x8xf32> to vector<8x8xbf16>
    %215 = vector.extract_strided_slice %152 {offsets = [16, 0], sizes = [8, 128], strides = [1, 1]} : vector<128x128xbf16> to vector<8x128xbf16>
    %cst_78 = arith.constant dense<0.000000e+00> : vector<8x128xf32>
    %216 = tpu.matmul %214, %215, %cst_78 {dimension_numbers = #tpu.dot_dimension_numbers<[1], [0], [0], [1], [0, 0, 1, 1], [], []>} : vector<8x8xbf16>, vector<8x128xbf16>, vector<8x128xf32> -> vector<8x128xf32>
    %217 = arith.addf %195, %216 : vector<8x128xf32>
    %218 = vector.extract_strided_slice %145 {offsets = [0, 24], sizes = [8, 8], strides = [1, 1]} : vector<8x128xbf16> to vector<8x8xbf16>
    %219 = vector.extract_strided_slice %151 {offsets = [0, 24], sizes = [8, 8], strides = [1, 1]} : vector<8x256xbf16> to vector<8x8xbf16>
    %220 = vector.extract_strided_slice %151 {offsets = [0, 152], sizes = [8, 8], strides = [1, 1]} : vector<8x256xbf16> to vector<8x8xbf16>
    %cst_79 = arith.constant dense<0.000000e+00> : vector<8x8xf32>
    %221 = tpu.matmul %218, %219, %cst_79 {dimension_numbers = #tpu.dot_dimension_numbers<[1], [1], [0], [0], [0, 0, 1, 0], [], []>} : vector<8x8xbf16>, vector<8x8xbf16>, vector<8x8xf32> -> vector<8x8xf32>
    %cst_80 = arith.constant 0.353553385 : f32
    %222 = vector.broadcast %cst_80 : f32 to vector<8x8xf32>
    %223 = arith.mulf %221, %222 : vector<8x8xf32>
    %cst_81 = arith.constant dense<0xFF800000> : vector<8xf32>
    %224 = vector.multi_reduction <maximumf>, %223, %cst_81 [1] : vector<8x8xf32> to vector<8xf32>
    %225 = vector.shape_cast %224 : vector<8xf32> to vector<8x1xf32>
    %226 = vector.broadcast %225 : vector<8x1xf32> to vector<8x8xf32>
    %227 = arith.subf %223, %226 : vector<8x8xf32>
    %228 = math.exp %227 : vector<8x8xf32>
    %cst_82 = arith.constant dense<0.000000e+00> : vector<8xf32>
    %229 = vector.multi_reduction <add>, %228, %cst_82 [1] : vector<8x8xf32> to vector<8xf32>
    %230 = vector.shape_cast %229 : vector<8xf32> to vector<8x1xf32>
    %231 = arith.truncf %228 : vector<8x8xf32> to vector<8x8xbf16>
    %cst_83 = arith.constant dense<0.000000e+00> : vector<8x8xf32>
    %232 = tpu.matmul %231, %220, %cst_83 {dimension_numbers = #tpu.dot_dimension_numbers<[1], [0], [0], [1], [0, 0, 1, 1], [], []>} : vector<8x8xbf16>, vector<8x8xbf16>, vector<8x8xf32> -> vector<8x8xf32>
    %233 = tpu.reciprocal %230 {approx = true} : vector<8x1xf32> -> vector<8x1xf32>
    %234 = vector.broadcast %233 : vector<8x1xf32> to vector<8x8xf32>
    %235 = arith.mulf %232, %234 : vector<8x8xf32>
    %236 = arith.truncf %235 : vector<8x8xf32> to vector<8x8xbf16>
    %237 = vector.extract_strided_slice %152 {offsets = [24, 0], sizes = [8, 128], strides = [1, 1]} : vector<128x128xbf16> to vector<8x128xbf16>
    %cst_84 = arith.constant dense<0.000000e+00> : vector<8x128xf32>
    %238 = tpu.matmul %236, %237, %cst_84 {dimension_numbers = #tpu.dot_dimension_numbers<[1], [0], [0], [1], [0, 0, 1, 1], [], []>} : vector<8x8xbf16>, vector<8x128xbf16>, vector<8x128xf32> -> vector<8x128xf32>
    %239 = arith.addf %217, %238 : vector<8x128xf32>
    %c0_85 = arith.constant 0 : index
    %c0_86 = arith.constant 0 : index
    %240 = vector.load %arg14[%c0_85, %c0_86] : memref<1x128xf32, #tpu.memory_space<vmem>>, vector<1x128xf32>
    %241 = vector.broadcast %240 : vector<1x128xf32> to vector<8x128xf32>
    %242 = arith.addf %239, %241 : vector<8x128xf32>
    %243 = arith.addf %242, %138 : vector<8x128xf32>
    %c0_87 = arith.constant 0 : index
    %c0_88 = arith.constant 0 : index
    %244 = vector.load %arg15[%c0_87, %c0_88] : memref<1x128xf32, #tpu.memory_space<vmem>>, vector<1x128xf32>
    %c0_89 = arith.constant 0 : index
    %c0_90 = arith.constant 0 : index
    %245 = vector.load %arg16[%c0_89, %c0_90] : memref<1x128xf32, #tpu.memory_space<vmem>>, vector<1x128xf32>
    %cst_91 = arith.constant dense<0.000000e+00> : vector<8xf32>
    %246 = vector.multi_reduction <add>, %243, %cst_91 [1] : vector<8x128xf32> to vector<8xf32>
    %247 = vector.shape_cast %246 : vector<8xf32> to vector<8x1xf32>
    %cst_92 = arith.constant 3.125000e-02 : f32
    %248 = vector.broadcast %cst_92 : f32 to vector<8x1xf32>
    %249 = arith.mulf %247, %248 : vector<8x1xf32>
    %250 = arith.mulf %243, %243 : vector<8x128xf32>
    %cst_93 = arith.constant dense<0.000000e+00> : vector<8xf32>
    %251 = vector.multi_reduction <add>, %250, %cst_93 [1] : vector<8x128xf32> to vector<8xf32>
    %252 = vector.shape_cast %251 : vector<8xf32> to vector<8x1xf32>
    %cst_94 = arith.constant 3.125000e-02 : f32
    %253 = vector.broadcast %cst_94 : f32 to vector<8x1xf32>
    %254 = arith.mulf %252, %253 : vector<8x1xf32>
    %255 = arith.mulf %249, %249 : vector<8x1xf32>
    %256 = arith.subf %254, %255 : vector<8x1xf32>
    %cst_95 = arith.constant 0.000000e+00 : f32
    %257 = vector.broadcast %cst_95 : f32 to vector<8x1xf32>
    %258 = arith.maximumf %256, %257 : vector<8x1xf32>
    %259 = vector.broadcast %249 : vector<8x1xf32> to vector<8x128xf32>
    %260 = arith.subf %243, %259 : vector<8x128xf32>
    %cst_96 = arith.constant 9.99999974E-6 : f32
    %261 = vector.broadcast %cst_96 : f32 to vector<8x1xf32>
    %262 = arith.addf %258, %261 : vector<8x1xf32>
    %263 = math.rsqrt %262 : vector<8x1xf32>
    %264 = vector.broadcast %263 : vector<8x1xf32> to vector<8x128xf32>
    %265 = arith.mulf %260, %264 : vector<8x128xf32>
    %266 = vector.broadcast %244 : vector<1x128xf32> to vector<8x128xf32>
    %267 = arith.mulf %265, %266 : vector<8x128xf32>
    %268 = vector.broadcast %245 : vector<1x128xf32> to vector<8x128xf32>
    %269 = arith.addf %267, %268 : vector<8x128xf32>
    %270 = arith.truncf %269 : vector<8x128xf32> to vector<8x128xbf16>
    %c0_97 = arith.constant 0 : index
    %c0_98 = arith.constant 0 : index
    %271 = vector.load %arg17[%c0_97, %c0_98] : memref<128x128xbf16, #tpu.memory_space<vmem>>, vector<128x128xbf16>
    %cst_99 = arith.constant dense<0.000000e+00> : vector<8x128xf32>
    %272 = tpu.matmul %270, %271, %cst_99 {dimension_numbers = #tpu.dot_dimension_numbers<[1], [0], [0], [1], [0, 0, 1, 1], [], []>} : vector<8x128xbf16>, vector<128x128xbf16>, vector<8x128xf32> -> vector<8x128xf32>
    %c0_100 = arith.constant 0 : index
    %c0_101 = arith.constant 0 : index
    %273 = vector.load %arg18[%c0_100, %c0_101] : memref<1x128xf32, #tpu.memory_space<vmem>>, vector<1x128xf32>
    %274 = vector.broadcast %273 : vector<1x128xf32> to vector<8x128xf32>
    %275 = arith.addf %272, %274 : vector<8x128xf32>
    %cst_102 = arith.constant 0.000000e+00 : f32
    %276 = vector.broadcast %cst_102 : f32 to vector<8x128xf32>
    %277 = arith.maximumf %275, %276 : vector<8x128xf32>
    %278 = arith.truncf %277 : vector<8x128xf32> to vector<8x128xbf16>
    %c0_103 = arith.constant 0 : index
    %c0_104 = arith.constant 0 : index
    %279 = vector.load %arg19[%c0_103, %c0_104] : memref<128x128xbf16, #tpu.memory_space<vmem>>, vector<128x128xbf16>
    %cst_105 = arith.constant dense<0.000000e+00> : vector<8x128xf32>
    %280 = tpu.matmul %278, %279, %cst_105 {dimension_numbers = #tpu.dot_dimension_numbers<[1], [0], [0], [1], [0, 0, 1, 1], [], []>} : vector<8x128xbf16>, vector<128x128xbf16>, vector<8x128xf32> -> vector<8x128xf32>
    %c0_106 = arith.constant 0 : index
    %c0_107 = arith.constant 0 : index
    %281 = vector.load %arg20[%c0_106, %c0_107] : memref<1x128xf32, #tpu.memory_space<vmem>>, vector<1x128xf32>
    %282 = vector.broadcast %281 : vector<1x128xf32> to vector<8x128xf32>
    %283 = arith.addf %280, %282 : vector<8x128xf32>
    %284 = arith.addf %283, %269 : vector<8x128xf32>
    %c0_108 = arith.constant 0 : index
    %c0_109 = arith.constant 0 : index
    %285 = vector.load %arg21[%c0_108, %c0_109] : memref<1x128xf32, #tpu.memory_space<vmem>>, vector<1x128xf32>
    %c0_110 = arith.constant 0 : index
    %c0_111 = arith.constant 0 : index
    %286 = vector.load %arg22[%c0_110, %c0_111] : memref<1x128xf32, #tpu.memory_space<vmem>>, vector<1x128xf32>
    %cst_112 = arith.constant dense<0.000000e+00> : vector<8xf32>
    %287 = vector.multi_reduction <add>, %284, %cst_112 [1] : vector<8x128xf32> to vector<8xf32>
    %288 = vector.shape_cast %287 : vector<8xf32> to vector<8x1xf32>
    %cst_113 = arith.constant 3.125000e-02 : f32
    %289 = vector.broadcast %cst_113 : f32 to vector<8x1xf32>
    %290 = arith.mulf %288, %289 : vector<8x1xf32>
    %291 = arith.mulf %284, %284 : vector<8x128xf32>
    %cst_114 = arith.constant dense<0.000000e+00> : vector<8xf32>
    %292 = vector.multi_reduction <add>, %291, %cst_114 [1] : vector<8x128xf32> to vector<8xf32>
    %293 = vector.shape_cast %292 : vector<8xf32> to vector<8x1xf32>
    %cst_115 = arith.constant 3.125000e-02 : f32
    %294 = vector.broadcast %cst_115 : f32 to vector<8x1xf32>
    %295 = arith.mulf %293, %294 : vector<8x1xf32>
    %296 = arith.mulf %290, %290 : vector<8x1xf32>
    %297 = arith.subf %295, %296 : vector<8x1xf32>
    %cst_116 = arith.constant 0.000000e+00 : f32
    %298 = vector.broadcast %cst_116 : f32 to vector<8x1xf32>
    %299 = arith.maximumf %297, %298 : vector<8x1xf32>
    %300 = vector.broadcast %290 : vector<8x1xf32> to vector<8x128xf32>
    %301 = arith.subf %284, %300 : vector<8x128xf32>
    %cst_117 = arith.constant 9.99999974E-6 : f32
    %302 = vector.broadcast %cst_117 : f32 to vector<8x1xf32>
    %303 = arith.addf %299, %302 : vector<8x1xf32>
    %304 = math.rsqrt %303 : vector<8x1xf32>
    %305 = vector.broadcast %304 : vector<8x1xf32> to vector<8x128xf32>
    %306 = arith.mulf %301, %305 : vector<8x128xf32>
    %307 = vector.broadcast %285 : vector<1x128xf32> to vector<8x128xf32>
    %308 = arith.mulf %306, %307 : vector<8x128xf32>
    %309 = vector.broadcast %286 : vector<1x128xf32> to vector<8x128xf32>
    %310 = arith.addf %308, %309 : vector<8x128xf32>
    %311 = arith.truncf %310 : vector<8x128xf32> to vector<8x128xbf16>
    %c0_118 = arith.constant 0 : index
    %c0_119 = arith.constant 0 : index
    %c0_120 = arith.constant 0 : index
    %312 = vector.load %arg23[%c0_118, %c0_119, %c0_120] : memref<1x8x128xbf16, #tpu.memory_space<vmem>>, vector<1x8x128xbf16>
    %313 = vector.shape_cast %312 : vector<1x8x128xbf16> to vector<8x128xbf16>
    %314 = vector.shape_cast %311 : vector<8x128xbf16> to vector<1x8x128xbf16>
    tpu.vector_store %arg23[%c0_118, %c0_119, %c0_120], %314 {strides = array<i32>} : memref<1x8x128xbf16, #tpu.memory_space<vmem>>, vector<1x8x128xbf16>,
    return
  }
  func.func @transform_0(%arg0: i32) -> (i32, i32, i32) {
    %c0_i32 = arith.constant 0 : i32
    %c0_i32_0 = arith.constant 0 : i32
    %c0_i32_1 = arith.constant 0 : i32
    return %arg0, %c0_i32, %c0_i32_0 : i32, i32, i32
  }
  func.func @transform_1(%arg0: i32) -> (i32, i32, i32) {
    %c0_i32 = arith.constant 0 : i32
    %c0_i32_0 = arith.constant 0 : i32
    %c0_i32_1 = arith.constant 0 : i32
    return %arg0, %c0_i32, %c0_i32_0 : i32, i32, i32
  }
  func.func @transform_2(%arg0: i32) -> (i32, i32) {
    %c0_i32 = arith.constant 0 : i32
    %c0_i32_0 = arith.constant 0 : i32
    %c0_i32_1 = arith.constant 0 : i32
    return %c0_i32, %c0_i32_0 : i32, i32
  }
  func.func @transform_3(%arg0: i32) -> (i32, i32) {
    %c0_i32 = arith.constant 0 : i32
    %c0_i32_0 = arith.constant 0 : i32
    %c0_i32_1 = arith.constant 0 : i32
    return %c0_i32, %c0_i32_0 : i32, i32
  }
  func.func @transform_4(%arg0: i32) -> (i32, i32) {
    %c0_i32 = arith.constant 0 : i32
    %c0_i32_0 = arith.constant 0 : i32
    %c0_i32_1 = arith.constant 0 : i32
    return %c0_i32, %c0_i32_0 : i32, i32
  }
  func.func @transform_5(%arg0: i32) -> (i32, i32) {
    %c0_i32 = arith.constant 0 : i32
    %c0_i32_0 = arith.constant 0 : i32
    %c0_i32_1 = arith.constant 0 : i32
    return %c0_i32, %c0_i32_0 : i32, i32
  }
  func.func @transform_6(%arg0: i32) -> (i32, i32) {
    %c0_i32 = arith.constant 0 : i32
    %c0_i32_0 = arith.constant 0 : i32
    %c0_i32_1 = arith.constant 0 : i32
    return %c0_i32, %c0_i32_0 : i32, i32
  }
  func.func @transform_7(%arg0: i32) -> (i32, i32) {
    %c0_i32 = arith.constant 0 : i32
    %c0_i32_0 = arith.constant 0 : i32
    %c0_i32_1 = arith.constant 0 : i32
    return %c0_i32, %c0_i32_0 : i32, i32
  }
  func.func @transform_8(%arg0: i32) -> (i32, i32) {
    %c0_i32 = arith.constant 0 : i32
    %c0_i32_0 = arith.constant 0 : i32
    %c0_i32_1 = arith.constant 0 : i32
    return %c0_i32, %c0_i32_0 : i32, i32
  }
  func.func @transform_9(%arg0: i32) -> (i32, i32) {
    %c0_i32 = arith.constant 0 : i32
    %c0_i32_0 = arith.constant 0 : i32
    %c0_i32_1 = arith.constant 0 : i32
    return %c0_i32, %c0_i32_0 : i32, i32
  }
  func.func @transform_10(%arg0: i32) -> (i32, i32) {
    %c0_i32 = arith.constant 0 : i32
    %c0_i32_0 = arith.constant 0 : i32
    %c0_i32_1 = arith.constant 0 : i32
    return %c0_i32, %c0_i32_0 : i32, i32
  }
  func.func @transform_11(%arg0: i32) -> (i32, i32) {
    %c0_i32 = arith.constant 0 : i32
    %c0_i32_0 = arith.constant 0 : i32
    %c0_i32_1 = arith.constant 0 : i32
    return %c0_i32, %c0_i32_0 : i32, i32
  }
  func.func @transform_12(%arg0: i32) -> (i32, i32) {
    %c0_i32 = arith.constant 0 : i32
    %c0_i32_0 = arith.constant 0 : i32
    %c0_i32_1 = arith.constant 0 : i32
    return %c0_i32, %c0_i32_0 : i32, i32
  }
  func.func @transform_13(%arg0: i32) -> (i32, i32) {
    %c0_i32 = arith.constant 0 : i32
    %c0_i32_0 = arith.constant 0 : i32
    %c0_i32_1 = arith.constant 0 : i32
    return %c0_i32, %c0_i32_0 : i32, i32
  }
  func.func @transform_14(%arg0: i32) -> (i32, i32) {
    %c0_i32 = arith.constant 0 : i32
    %c0_i32_0 = arith.constant 0 : i32
    %c0_i32_1 = arith.constant 0 : i32
    return %c0_i32, %c0_i32_0 : i32, i32
  }
  func.func @transform_15(%arg0: i32) -> (i32, i32) {
    %c0_i32 = arith.constant 0 : i32
    %c0_i32_0 = arith.constant 0 : i32
    %c0_i32_1 = arith.constant 0 : i32
    return %c0_i32, %c0_i32_0 : i32, i32
  }
  func.func @transform_16(%arg0: i32) -> (i32, i32) {
    %c0_i32 = arith.constant 0 : i32
    %c0_i32_0 = arith.constant 0 : i32
    %c0_i32_1 = arith.constant 0 : i32
    return %c0_i32, %c0_i32_0 : i32, i32
  }
  func.func @transform_17(%arg0: i32) -> (i32, i32) {
    %c0_i32 = arith.constant 0 : i32
    %c0_i32_0 = arith.constant 0 : i32
    %c0_i32_1 = arith.constant 0 : i32
    return %c0_i32, %c0_i32_0 : i32, i32
  }
  func.func @transform_18(%arg0: i32) -> (i32, i32) {
    %c0_i32 = arith.constant 0 : i32
    %c0_i32_0 = arith.constant 0 : i32
    %c0_i32_1 = arith.constant 0 : i32
    return %c0_i32, %c0_i32_0 : i32, i32
  }
  func.func @transform_19(%arg0: i32) -> (i32, i32) {
    %c0_i32 = arith.constant 0 : i32
    %c0_i32_0 = arith.constant 0 : i32
    %c0_i32_1 = arith.constant 0 : i32
    return %c0_i32, %c0_i32_0 : i32, i32
  }
  func.func @transform_20(%arg0: i32) -> (i32, i32) {
    %c0_i32 = arith.constant 0 : i32
    %c0_i32_0 = arith.constant 0 : i32
    %c0_i32_1 = arith.constant 0 : i32
    return %c0_i32, %c0_i32_0 : i32, i32
  }
  func.func @transform_21(%arg0: i32) -> (i32, i32) {
    %c0_i32 = arith.constant 0 : i32
    %c0_i32_0 = arith.constant 0 : i32
    %c0_i32_1 = arith.constant 0 : i32
    return %c0_i32, %c0_i32_0 : i32, i32
  }
  func.func @transform_22(%arg0: i32) -> (i32, i32, i32) {
    %c0_i32 = arith.constant 0 : i32
    %c0_i32_0 = arith.constant 0 : i32
    %c0_i32_1 = arith.constant 0 : i32
    return %arg0, %c0_i32, %c0_i32_0 : i32, i32, i32
  }
}

</mosaic_0001>

<bundles_post_ra>
// kernel: forward.6
= control target key start
LH: loop header
LB: loop body
LE: loop exit
PB: predicated region body
PF: predicated region fallthrough
CT: control target
= control target key end

     0   :  { %s128_s0 = inlined_call_operand.vmem [shape: f32[16,128], index: 0, kind: input, shape index: {}]   ;;  %s129_s1 = inlined_call_operand.vmem [shape: f32[1,128], index: 1, kind: input, shape index: {}]   ;;  %s130_s2 = inlined_call_operand.vmem [shape: f32[1,128], index: 2, kind: input, shape index: {}]   ;;  %s131_s3 = inlined_call_operand.vmem [shape: bf16[16,128], index: 3, kind: output, shape index: {}]  }
   0x1   :  { %v14_v0 = vld [vmem:[%s128_s0] sm:$0xff]  ;;  %v15_v2 = vld [vmem:[%s128_s0 + $0x8] sm:$0xff] }
   0x2   :  { %18 = vadd.xlane.f32.xlu0 %v14_v0  ;;  %v24_v1 = vmul.f32 %v14_v0, %v14_v0  ;;  %v25_v3 = vmul.f32 %v15_v2, %v15_v2  ;;  %v87_v33 = vld [vmem:[%s129_s1] ss:$0 sm:$0xff] }
   0x3   :  { %v88_v38 = vld [vmem:[%s130_s2] ss:$0 sm:$0xff] }
   0x4   :  { %26 = vadd.xlane.f32.xlu1 %v24_v1 }
   0xa   :  { %20 = vadd.xlane.f32.xlu0 %v15_v2 }
   0xc   :  { %28 = vadd.xlane.f32.xlu1 %v25_v3 }
  0x75   :  { %v19_v4 = vpop.xlane.xlu0 %18 }
  0x76   :  { %v22_v5 = vmul.f32 0.03125, %v19_v4 }
  0x77   :  { %v27_v6 = vpop.xlane.xlu1 %26 }
  0x78   :  { %v32_v7 = vmul.f32 %v22_v5, %v22_v5  ;;  %v30_v8 = vmul.f32 0.03125, %v27_v6  ;;  %v38_v31 = vsub.f32 %v14_v0, %v22_v5 }
  0x7a   :  { %v34_v9 = vsub.f32 %v30_v8, %v32_v7 }
  0x7c   :  { %v36_v10 = vmax.f32 %v34_v9, 0.0 }
  0x7d   :  { %v21_v11 = vpop.xlane.xlu0 %20 }
  0x7e   :  { %v40_v12 = vadd.f32 1e-12, %v36_v10  ;;  %v23_v13 = vmul.f32 0.03125, %v21_v11 }
  0x7f   :  { %v29_v14 = vpop.xlane.xlu1 %28 }
  0x80   :  { %89 = vrsqrt.f32 %v40_v12  ;;  %v33_v15 = vmul.f32 %v23_v13, %v23_v13  ;;  %v31_v16 = vmul.f32 0.03125, %v29_v14  ;;  %vm48_vm1 = vweird.f32 %v40_v12 }
  0x81   :  { %v39_v36 = vsub.f32 %v15_v2, %v23_v13 }
  0x82   :  { %v35_v17 = vsub.f32 %v31_v16, %v33_v15 }
  0x84   :  { %v37_v18 = vmax.f32 %v35_v17, 0.0 }
  0x86   :  { %v90_v19 = vpop.eup %89  ;;  %v41_v21 = vadd.f32 1e-12, %v37_v18 }
  0x87   :  { %v43_v20 = vmul.f32 %v90_v19, %v40_v12  ;;  %vm49_vm0 = vweird.f32 %v90_v19 }
  0x88   :  { %91 = vrsqrt.f32 %v41_v21  ;;  %vm50_vm2 = vmor %vm48_vm1, %vm49_vm0  ;;  %vm58_vm4 = vweird.f32 %v41_v21 }
  0x89   :  { %v44_v22 = vmul.f32 %v90_v19, %v43_v20 }
  0x8b   :  { %v45_v23 = vmul.f32 0.5, %v44_v22 }
  0x8d   :  { %v46_v24 = vsub.f32 1.5, %v45_v23 }
  0x8e   :  { %v92_v25 = vpop.eup %91 }
  0x8f   :  { %v47_v26 = vmul.f32 %v90_v19, %v46_v24  ;;  %v53_v27 = vmul.f32 %v92_v25, %v41_v21  ;;  %vm59_vm3 = vweird.f32 %v92_v25 }
  0x90   :  { %vm60_vm5 = vmor %vm58_vm4, %vm59_vm3 }
  0x91   :  { %v54_v28 = vmul.f32 %v92_v25, %v53_v27  ;;  %v51_v29 = vsel %vm50_vm2, %v90_v19, %v47_v26 }
  0x92   :  { %v62_v34 = vmul.f32 %v51_v29, %v38_v31 }
  0x93   :  { %v55_v30 = vmul.f32 0.5, %v54_v28 }
  0x94   :  { %v67_v39 = vmul.f32 %v87_v33, %v62_v34 }
  0x95   :  { %v56_v32 = vsub.f32 1.5, %v55_v30 }
  0x96   :  { %v72_v42 = vadd.f32 %v88_v38, %v67_v39 }
  0x97   :  { %v57_v35 = vmul.f32 %v92_v25, %v56_v32 }
  0x99   :  { %v61_v37 = vsel %vm60_vm5, %v92_v25, %v57_v35 }
  0x9a   :  { %v63_v40 = vmul.f32 %v61_v37, %v39_v36 }
  0x9c   :  { %v68_v41 = vmul.f32 %v87_v33, %v63_v40 }
  0x9e   :  { %v73_v43 = vadd.f32 %v88_v38, %v68_v41 }
  0xa0   :  { %v85_v44 = vpack.c.bf16 %v73_v43, %v72_v42 }
  0xa2   :  { %86 = vst [vmem:[%s131_s3] sm:$0xff] %v85_v44  }

// kernel: forward.11
= control target key start
LH: loop header
LB: loop body
LE: loop exit
PB: predicated region body
PF: predicated region fallthrough
CT: control target
= control target key end

     0   :  { %s235_s1 = inlined_call_operand.vmem [shape: bf16[128,128], index: 1, kind: input, shape index: {}]   ;;  %s236_s2 = inlined_call_operand.vmem [shape: f32[1,128], index: 2, kind: input, shape index: {}]   ;;  %s237_s0 = inlined_call_operand.vmem [shape: bf16[16,128], index: 0, kind: input, shape index: {}]   ;;  %s238_s3 = inlined_call_operand.vmem [shape: f32[16,128], index: 3, kind: output, shape index: {}]  }
   0x1   :  { %v177_v0 = vld [vmem:[%s235_s1 + $0x38] sm:$0xff]  ;;  %v176_v1 = vld [vmem:[%s235_s1 + $0x30] sm:$0xff]  ;;  %v175_v2 = vld [vmem:[%s235_s1 + $0x28] sm:$0xff] }
   0x2   :  { %86 = vmatpush.bf16.msra.mxu0 %v177_v0  ;;  %v174_v3 = vld [vmem:[%s235_s1 + $0x20] sm:$0xff]  ;;  %v173_v4 = vld [vmem:[%s235_s1 + $0x18] sm:$0xff]  ;;  %v172_v5 = vld [vmem:[%s235_s1 + $0x10] sm:$0xff] }
   0x3   :  { %v171_v6 = vld [vmem:[%s235_s1 + $0x8] sm:$0xff]  ;;  %v170_v7 = vld [vmem:[%s235_s1] sm:$0xff] }
   0x4   :  { %v169_v8 = vld [vmem:[%s237_s0] sm:$0xff] }
   0x5   :  { %v178_v9 = vld [vmem:[%s236_s2] ss:$0 sm:$0xff] }
   0x6   :  { %87 = vmatpush.bf16.msra.mxu0 %v176_v1 }
   0xa   :  { %88 = vmatpush.bf16.msra.mxu0 %v175_v2 }
   0xe   :  { %89 = vmatpush.bf16.msra.mxu0 %v174_v3 }
  0x12   :  { %90 = vmatpush.bf16.msra.mxu0 %v173_v4 }
  0x16   :  { %91 = vmatpush.bf16.msra.mxu0 %v172_v5 }
  0x1a   :  { %92 = vmatpush.bf16.msra.mxu0 %v171_v6 }
  0x1e   :  { %93 = vmatpush.bf16.msra.mxu0 %v170_v7 }
  0x21   :  { %94 = vmatmul.bf16.vlgmr.msra.gmra.mxu0 %v169_v8 }
  0x9e   :  { %v95_v10 = vpop.f32.mrf.mxu0 }
  0x9f   :  { %v125_v11 = vadd.f32 %v178_v9, %v95_v10 }
  0xa1   :  { %127 = vst [vmem:[%s238_s3] sm:$0xff] %v125_v11 }
  0xa6   :  { %v97_v12 = vpop.f32.mrf.mxu0 }
  0xa7   :  { %v126_v13 = vadd.f32 %v178_v9, %v97_v12 }
  0xa9   :  { %128 = vst [vmem:[%s238_s3 + $0x8] sm:$0xff] %v126_v13 }

// kernel: forward.7
= control target key start
LH: loop header
LB: loop body
LE: loop exit
PB: predicated region body
PF: predicated region fallthrough
CT: control target
= control target key end

     0   :  { %s1709_s29 = smov 0   ;;  %s2048_s0 = inlined_call_operand.vmem [shape: bf16[2,8,128], index: 0, kind: input, shape index: {}]   ;;  %s2049_s1 = inlined_call_operand.vmem [shape: f32[2,1,8], index: 1, kind: input, shape index: {}]   ;;  %s2050_s2 = inlined_call_operand.vmem [shape: bf16[128,384], index: 2, kind: input, shape index: {}]   ;;  %s2051_s3 = inlined_call_operand.vmem [shape: f32[1,384], index: 3, kind: input, shape index: {}]   ;;  %s2052_s4 = inlined_call_operand.vmem [shape: bf16[128,128], index: 4, kind: input, shape index: {}]   ;;  %s2053_s5 = inlined_call_operand.vmem [shape: f32[1,128], index: 5, kind: input, shape index: {}]   ;;  %s2054_s6 = inlined_call_operand.vmem [shape: f32[1,128], index: 6, kind: input, shape index: {}, may-alias: {6,12}]   ;;  %s2055_s7 = inlined_call_operand.vmem [shape: f32[1,128], index: 7, kind: input, shape index: {}, may-alias: {7,13}]   ;;  %s2056_s8 = inlined_call_operand.vmem [shape: bf16[128,128], index: 8, kind: input, shape index: {}]   ;;  %s2057_s9 = inlined_call_operand.vmem [shape: f32[1,128], index: 9, kind: input, shape index: {}]   ;;  %s2058_s10 = inlined_call_operand.vmem [shape: bf16[128,128], index: 10, kind: input, shape index: {}]   ;;  %s2059_s11 = inlined_call_operand.vmem [shape: f32[1,128], index: 11, kind: input, shape index: {}]   ;;  %s2060_s12 = inlined_call_operand.vmem [shape: f32[1,128], index: 12, kind: input, shape index: {}, may-alias: {6,12}]   ;;  %s2061_s13 = inlined_call_operand.vmem [shape: f32[1,128], index: 13, kind: input, shape index: {}, may-alias: {7,13}]   ;;  %s2062_s14 = inlined_call_operand.vmem [shape: bf16[2,8,128], index: 14, kind: output, shape index: {}]  }
   0x1 LB: > { %s1360_s30 = sadd.s32 4294967295, %s1629_s29   ;;  %p1364_p0 = scmp.ge.s32.totalorder %s1629_s29, 1  ;;  %s1629_s29 = sphi %s1709_s29, %s24_s29  }
   0x2   : > { %p419_p1 = scmp.lt.s32.totalorder %s1629_s29, 3 }
   0x4   : > { %p420_p2 = pnand %p1364_p0, %p419_p1 }
   0x5   : > { %p466_p3 = scmp.lt.s32.totalorder (!%p420_p2), %s1360_s30, 1  ;;  %s1631_s24 = smov (!%p420_p2), 120  }
   0x6   : > { %423 = sbr.rel (%p420_p2) target bundleno = 2034 (0x7f2), region = 76  ;;  %s1633_s19 = smov (!%p420_p2), 112  }
   0xb   : > { %v1453_v0 = vld [vmem:[%s2050_s2 + $0xa8] sm:$0xf]  ;;  %v1564_v1 = vld [vmem:[%s2050_s2 + $0xb0] sm:$0xf0]  ;;  %v1563_v2 = vld [vmem:[%s2050_s2 + $0xac] sm:$0xf] }
   0xc   : > { %v1454_v3 = vor.u32 %v1564_v1, %v1453_v0  ;;  %v1455_v4 = vld [vmem:[%s2050_s2 + $0xb4] sm:$0xf0]  ;;  %v1441_v5 = vld [vmem:[%s2050_s2 + $0x90] sm:$0xf]  ;;  %v1561_v6 = vld [vmem:[%s2050_s2 + $0x98] sm:$0xf0] }
   0xd   : > { %v1458_v7 = vor.u32 %v1563_v2, %v1455_v4  ;;  %v1560_v8 = vld [vmem:[%s2050_s2 + $0x94] sm:$0xf]  ;;  %v1443_v9 = vld [vmem:[%s2050_s2 + $0x9c] sm:$0xf0]  ;;  %v1442_v10 = vor.u32 %v1561_v6, %v1441_v5  ;;  %v1429_v12 = vld [vmem:[%s2050_s2 + $0x78] sm:$0xf] }
   0xe   : > { %647 = vmatpush.bf16.msra.mxu0 %v1454_v3  ;;  %v1446_v11 = vor.u32 %v1560_v8, %v1443_v9  ;;  %v1558_v13 = vld [vmem:[%s2050_s2 + $0x80] sm:$0xf0]  ;;  %v1557_v14 = vld [vmem:[%s2050_s2 + $0x7c] sm:$0xf]  ;;  %v1431_v15 = vld [vmem:[%s2050_s2 + $0x84] sm:$0xf0] }
   0xf   : > { %660 = vmatpush.bf16.msra.mxu1 %v1458_v7  ;;  %v1430_v16 = vor.u32 %v1558_v13, %v1429_v12  ;;  %v1434_v17 = vor.u32 %v1557_v14, %v1431_v15  ;;  %v1417_v18 = vld [vmem:[%s2050_s2 + $0x60] sm:$0xf]  ;;  %v1555_v19 = vld [vmem:[%s2050_s2 + $0x68] sm:$0xf0]  ;;  %v1554_v20 = vld [vmem:[%s2050_s2 + $0x64] sm:$0xf] }
  0x10   : > { %v1419_v21 = vld [vmem:[%s2050_s2 + $0x6c] sm:$0xf0]  ;;  %v1405_v22 = vld [vmem:[%s2050_s2 + $0x48] sm:$0xf]  ;;  %v1552_v23 = vld [vmem:[%s2050_s2 + $0x50] sm:$0xf0]  ;;  %v1418_v24 = vor.u32 %v1555_v19, %v1417_v18 }
  0x11   : > { %v1551_v25 = vld [vmem:[%s2050_s2 + $0x4c] sm:$0xf]  ;;  %v1407_v26 = vld [vmem:[%s2050_s2 + $0x54] sm:$0xf0]  ;;  %v1422_v27 = vor.u32 %v1554_v20, %v1419_v21  ;;  %s2064_s30 = smov (!%p466_p3, %s1360_s30), 1  ;;  %v1406_v28 = vor.u32 %v1552_v23, %v1405_v22  ;;  %vm696_vm0 = vcmask 64512  }
  0x12   : > { %648 = vmatpush.bf16.msra.mxu0 %v1442_v10  ;;  %s472_s15 = scalar_lea.vmem %s2049_s1, %s2064_s30  ;;  %v1410_v29 = vor.u32 %v1551_v25, %v1407_v26  ;;  %v1393_v30 = vld [vmem:[%s2050_s2 + $0x30] sm:$0xf]  ;;  %v1549_v31 = vld [vmem:[%s2050_s2 + $0x38] sm:$0xf0]  ;;  %v1548_v32 = vld [vmem:[%s2050_s2 + $0x34] sm:$0xf] }
  0x13   : > { %661 = vmatpush.bf16.msra.mxu1 %v1446_v11  ;;  %v1395_v33 = vld [vmem:[%s2050_s2 + $0x3c] sm:$0xf0]  ;;  %v1394_v34 = vor.u32 %v1549_v31, %v1393_v30  ;;  %v1381_v36 = vld [vmem:[%s2050_s2 + $0x18] sm:$0xf]  ;;  %v1546_v37 = vld [vmem:[%s2050_s2 + $0x20] sm:$0xf0] }
  0x14   : > { %v1398_v35 = vor.u32 %v1548_v32, %v1395_v33  ;;  %v1545_v38 = vld [vmem:[%s2050_s2 + $0x1c] sm:$0xf]  ;;  %v1383_v39 = vld [vmem:[%s2050_s2 + $0x24] sm:$0xf0]  ;;  %v1382_v40 = vor.u32 %v1546_v37, %v1381_v36  ;;  %v1369_v42 = vld [vmem:[%s2050_s2] sm:$0xf] }
  0x15   : > { %v1386_v41 = vor.u32 %v1545_v38, %v1383_v39  ;;  %v1543_v43 = vld [vmem:[%s2050_s2 + $0x8] sm:$0xf0]  ;;  %v1542_v44 = vld [vmem:[%s2050_s2 + $0x4] sm:$0xf]  ;;  %v1371_v45 = vld [vmem:[%s2050_s2 + $0xc] sm:$0xf0] }
  0x16   : > { %649 = vmatpush.bf16.msra.mxu0 %v1430_v16  ;;  %s1365_s27 = sshll.u32 %s2064_s30, 2  ;;  %v1370_v46 = vor.u32 %v1543_v43, %v1369_v42  ;;  %v1374_v47 = vor.u32 %v1542_v44, %v1371_v45  ;;  %v1461_v49 = vld [vmem:[%s2050_s2 + $0xb0] sm:$0xf]  ;;  %v1565_v50 = vld [vmem:[%s2050_s2 + $0xb8] sm:$0xf0]  ;;  %vm734_vm1 = vcmask 1043456  }
  0x17   : > { %662 = vmatpush.bf16.msra.mxu1 %v1434_v17  ;;  %s469_s17 = scalar_lea.vmem %s2048_s0, %s1365_s27  ;;  %v1449_v51 = vld [vmem:[%s2050_s2 + $0x98] sm:$0xf]  ;;  %v1462_v52 = vor.u32 %v1565_v50, %v1461_v49  ;;  %v1562_v53 = vld [vmem:[%s2050_s2 + $0xa0] sm:$0xf0]  ;;  %v1437_v55 = vld [vmem:[%s2050_s2 + $0x80] sm:$0xf] }
  0x18   : > { %v1829_v48 = vld [vmem:[%s469_s17] sm:$0xf]  ;;  %v1450_v54 = vor.u32 %v1562_v53, %v1449_v51  ;;  %v1559_v56 = vld [vmem:[%s2050_s2 + $0x88] sm:$0xf0]  ;;  %v1425_v59 = vld [vmem:[%s2050_s2 + $0x68] sm:$0xf] }
  0x19   : > { %673 = vmatpush.bf16.msra.mxu2 %v1462_v52  ;;  %v1438_v57 = vor.u32 %v1559_v56, %v1437_v55  ;;  %v511_v58 = vld [vmem:[%s2051_s3] sm:$0x7]  ;;  %v1556_v60 = vld [vmem:[%s2050_s2 + $0x70] sm:$0xf0]  ;;  %v1413_v0 = vld [vmem:[%s2050_s2 + $0x50] sm:$0xf] }
  0x1a   : > { %650 = vmatpush.bf16.msra.mxu0 %v1418_v24  ;;  %v513_v61 = vperm.slane %v511_v58, 0  ;;  %v1426_v62 = vor.u32 %v1556_v60, %v1425_v59  ;;  %v514_v63 = vperm.slane %v511_v58, 1  ;;  %v1553_v1 = vld [vmem:[%s2050_s2 + $0x58] sm:$0xf0]  ;;  %v1401_v7 = vld [vmem:[%s2050_s2 + $0x38] sm:$0xf] }
  0x1b   : > { %663 = vmatpush.bf16.msra.mxu1 %v1422_v27  ;;  %v1414_v5 = vor.u32 %v1553_v1, %v1413_v0  ;;  %v1550_v8 = vld [vmem:[%s2050_s2 + $0x40] sm:$0xf0]  ;;  %v1389_v13 = vld [vmem:[%s2050_s2 + $0x20] sm:$0xf]  ;;  %v1547_v14 = vld [vmem:[%s2050_s2 + $0x28] sm:$0xf0] }
  0x1c   : > { %v1402_v10 = vor.u32 %v1550_v8, %v1401_v7  ;;  %v1390_v19 = vor.u32 %v1547_v14, %v1389_v13  ;;  %v1377_v21 = vld [vmem:[%s2050_s2 + $0x8] sm:$0xf]  ;;  %v1544_v22 = vld [vmem:[%s2050_s2 + $0x10] sm:$0xf0]  ;;  %v1898_v24 = vld [vmem:[%s472_s15] ss:$0 sm:$0xff] }
  0x1d   : > { %674 = vmatpush.bf16.msra.mxu2 %v1450_v54  ;;  %v1378_v23 = vor.u32 %v1544_v22, %v1377_v21  ;;  %v515_v25 = vperm.slane %v511_v58, 2  ;;  %s1632_s15 = smov 104   ;;  %v689_v50 = vld [vmem:[%s2052_s4] sm:$0xf]  ;;  %v690_v1 = vld [vmem:[%s2052_s4 + $0x4] sm:$0xf] }
  0x1e   : > { %651 = vmatpush.bf16.msra.mxu0 %v1406_v28  ;;  %v841_v51 = vsel %vm734_vm1, %v689_v50, 0  ;;  %v692_v50 = vld [vmem:[%s2052_s4 + $0xc] sm:$0xf] }
  0x1f   : > { %664 = vmatpush.bf16.msra.mxu1 %v1410_v29 }
  0x21   : > { %675 = vmatpush.bf16.msra.mxu2 %v1438_v57 }
  0x22   : > { %652 = vmatpush.bf16.msra.mxu0 %v1394_v34 }
  0x23   : > { %665 = vmatpush.bf16.msra.mxu1 %v1398_v35 }
  0x25   : > { %676 = vmatpush.bf16.msra.mxu2 %v1426_v62 }
  0x26   : > { %653 = vmatpush.bf16.msra.mxu0 %v1382_v40 }
  0x27   : > { %666 = vmatpush.bf16.msra.mxu1 %v1386_v41 }
  0x29   : > { %677 = vmatpush.bf16.msra.mxu2 %v1414_v5 }
  0x2a   : > { %654 = vmatpush.bf16.msra.mxu0 %v1370_v46 }
  0x2b   : > { %667 = vmatpush.bf16.msra.mxu1 %v1374_v47 }
  0x2d   : > { %655 = vmatmul.bf16.vlgmr.msra.gmra.mxu0 %v1829_v48  ;;  %678 = vmatpush.bf16.msra.mxu2 %v1402_v10 }
  0x2e   : > { %668 = vmatmul.bf16.vlgmr.msra.gmra.mxu1 %v1829_v48 }
  0x31   : > { %679 = vmatpush.bf16.msra.mxu2 %v1390_v19 }
  0x35   : > { %680 = vmatpush.bf16.msra.mxu2 %v1378_v23 }
  0x38   : > { %681 = vmatmul.bf16.vlgmr.msra.gmra.mxu2 %v1829_v48 }
  0x39   : > { %850 = vmatpush.bf16.msrb.mxu2 %v841_v51  ;;  %v998_v51 = vsel %vm734_vm1, %v692_v50, 0 }
  0xaa   : > { %v656_v2 = vpop.f32.mrf.mxu0 }
  0xab   : > { %v657_v3 = vadd.f32 %v656_v2, %v513_v61  ;;  %v669_v4 = vpop.f32.mrf.mxu1  ;;  %v822_v2 = vsel %vm734_vm1, %v690_v1, 0 }
  0xac   : > { %v670_v6 = vadd.f32 %v669_v4, %v514_v63 }
  0xae   : > { %v686_v9 = vpack.c.bf16 %v670_v6, %v657_v3 }
  0xb0   : > { %v694_v11 = vunpack.c.h.b16 %v686_v9  ;;  %v754_v12 = vunpack.c.l.b16 %v686_v9 }
  0xb2   : > { %v1878_v15 = vpack.c.b16 %v694_v11, %v694_v11  ;;  %v658_v16 = vpop.f32.mrf.mxu0  ;;  %v1880_v17 = vpack.c.b16 %v754_v12, %v754_v12 }
  0xb3   : > { %v671_v18 = vpop.f32.mrf.mxu1 }
  0xb4   : > { %756 = vrot.lane.b32.xlu1 %v1880_v17, %s1631_s24  ;;  %v701_v20 = vsel %vm696_vm0, %v1878_v15, 0 }
  0xb5   : > { %710 = vmatpush.bf16.xpose.msra.mxu3 %v701_v20 }
  0xbb   : > { %v682_v28 = vpop.f32.mrf.mxu2 }
  0xbc   : > { %1463 = vmatmul.msk.bf16.vlgmr.msra.gmra.mxu3 %vm696_vm0, %v686_v9  ;;  %v683_v30 = vadd.f32 %v682_v28, %v515_v25 }
  0xbe   : > { %v687_v32 = vpack.c.bf16 %v683_v30, %v683_v30 }
  0xc0   : > { %v792_v33 = vunpack.c.l.b16 %v687_v32  ;;  %v736_v37 = vsel %vm734_vm1, %v687_v32, 0 }
  0xc1   : > { %745 = vmatpush.bf16.msrb.mxu3 %v736_v37 }
  0xc2   : > { %v1902_v35 = vpack.c.b16 %v792_v33, %v792_v33 }
  0xc3   : > { %v684_v36 = vpop.f32.mrf.mxu2 }
  0xc4   : > { %794 = vrot.lane.b32.xlu2 %v1902_v35, %s1631_s24 }
 0x11e   : > { %v795_v44 = vpop.permute.xlu2 %794 }
 0x11f   : > { %v800_v45 = vsel %vm734_vm1, %v795_v44, 0 }
 0x120   : > { %809 = vmatpush.bf16.msrb.mxu0 %v800_v45 }
 0x126   : > { %v757_v49 = vpop.permute.xlu1 %756 }
 0x13f   : > { %v712_v26 = vpop.f32.mrf.mxu3 }
 0x140   : > { %v716_v27 = vmul.f32 0.35355338, %v712_v26 }
 0x142   : > { %v720_v29 = vadd.f32 %v1898_v24, %v716_v27 }
 0x144   : > { %v721_v31 = vsel %vm696_vm0, %v720_v29, -inf }
 0x145   : > { %722 = vmax.xlane.f32.xlu0 %v721_v31 }
 0x147   : > { %v714_v34 = vpop.f32.mrf.mxu3 }
 0x159   : > { %758 = vrot.lane.b32.xlu0 %v1878_v15, %s1631_s24  ;;  %s476_s24 = scalar_lea.vmem %s2062_s14, %s1365_s27 }
 0x1b8   : > { %v723_v38 = vpop.xlane.xlu0 %722 }
 0x1b9   : > { %v724_v39 = vsub.f32 %v720_v29, %v723_v38 }
 0x1bb   : > { %v725_v40 = vmul.f32 1.442695, %v724_v39 }
 0x1bd   : > { %1601 = vpow2.f32 %v725_v40 }
 0x1c3   : > { %v1602_v41 = vpop.eup %1601 }
 0x1c4   : > { %v727_v42 = vsel %vm696_vm0, %v1602_v41, 0.0  ;;  %v730_v43 = vpack.c.bf16 %v1602_v41, %v1602_v41 }
 0x1c5   : > { %728 = vadd.xlane.f32.xlu2 %v727_v42 }
 0x1c6   : > { %1464 = vmatmul.msk.bf16.vlgmr.msrb.gmra.mxu3 %vm696_vm0, %v730_v43 }
 0x1cb   : > { %v759_v46 = vpop.permute.xlu0 %758 }
 0x1cc   : > { %v764_v47 = vsel %vm696_vm0, %v759_v46, 0 }
 0x1cd   : > { %773 = vmatpush.bf16.xpose.msra.mxu3 %v764_v47 }
 0x1d5   : > { %831 = vmatpush.bf16.msrb.mxu3 %v822_v2 }
 0x1d6   : > { %1465 = vmatmul.msk.bf16.vlgmr.msra.gmra.mxu3 %vm696_vm0, %v757_v49 }
 0x1dd   : > { %937 = vrot.lane.b32.xlu2 %v1878_v15, %s1632_s15 }
 0x1e5   : > { %856 = vrot.lane.b32.xlu2 %v1880_v17, %s1633_s19 }
 0x238   : > { %v729_v52 = vpop.xlane.xlu2 %728 }
 0x239   : > { %1603 = vrcp.f32 %v729_v52  ;;  %v691_v52 = vld [vmem:[%s2052_s4 + $0x8] sm:$0xf] }
 0x23f   : > { %v1604_v55 = vpop.eup %1603 }
 0x240   : > { %v938_v53 = vpop.permute.xlu2 %937 }
 0x241   : > { %v943_v54 = vsel %vm696_vm0, %v938_v53, 0  ;;  %v919_v53 = vsel %vm734_vm1, %v691_v52, 0 }
 0x242   : > { %952 = vmatpush.bf16.xpose.msra.mxu2 %v943_v54  ;;  %928 = vmatpush.bf16.msrb.mxu1 %v919_v53 }
 0x248   : > { %v857_v22 = vpop.permute.xlu2 %856 }
 0x249   : > { %v747_v56 = vpop.f32.mrf.mxu3 }
 0x24a   : > { %v752_v57 = vmul.f32 %v1604_v55, %v747_v56 }
 0x24c   : > { %v753_v58 = vpack.c.bf16 %v752_v57, %v752_v57 }
 0x24e   : > { %1468 = vmatmul.msk.bf16.vlgmr.msrb.gmra.mxu2 %vm696_vm0, %v753_v58 }
 0x251   : > { %v749_v59 = vpop.f32.mrf.mxu3 }
 0x259   : > { %v775_v60 = vpop.f32.mrf.mxu3 }
 0x25a   : > { %v779_v61 = vmul.f32 0.35355338, %v775_v60 }
 0x25c   : > { %v780_v62 = vadd.f32 %v1898_v24, %v779_v61 }
 0x25e   : > { %v781_v63 = vsel %vm696_vm0, %v780_v62, -inf }
 0x25f   : > { %782 = vmax.xlane.f32.xlu1 %v781_v63 }
 0x261   : > { %v777_v0 = vpop.f32.mrf.mxu3 }
 0x278   : > { %858 = vrot.lane.b32.xlu1 %v1878_v15, %s1633_s19 }
 0x2d1   : > { %v1930_v3 = vpop.f32.mrf.mxu2 }
 0x2d2   : > { %v783_v4 = vpop.xlane.xlu1 %782 }
 0x2d3   : > { %v784_v5 = vsub.f32 %v780_v62, %v783_v4 }
 0x2d5   : > { %v785_v6 = vmul.f32 1.442695, %v784_v5 }
 0x2d7   : > { %1605 = vpow2.f32 %v785_v6 }
 0x2d9   : > { %v854_v7 = vpop.f32.mrf.mxu2 }
 0x2da   : > { %v1594_v7 = vld [vmem:[%s2053_s5] ss:$0 sm:$0xff] }
 0x2dd   : > { %v1606_v8 = vpop.eup %1605 }
 0x2de   : > { %v787_v9 = vsel %vm696_vm0, %v1606_v8, 0.0  ;;  %v790_v10 = vpack.c.bf16 %v1606_v8, %v1606_v8 }
 0x2df   : > { %788 = vadd.xlane.f32.xlu0 %v787_v9 }
 0x2e0   : > { %1466 = vmatmul.msk.bf16.vlgmr.msrb.gmra.mxu0 %vm696_vm0, %v790_v10  ;;  %v1019_v10 = vunpack.c.l.bf16 %v1829_v48  ;;  %v1571_v48 = vld [vmem:[%s2056_s8 + $0x28] sm:$0xff] }
 0x2ea   : > { %v859_v11 = vpop.permute.xlu1 %858 }
 0x2eb   : > { %v864_v12 = vsel %vm696_vm0, %v859_v11, 0 }
 0x2ec   : > { %873 = vmatpush.bf16.xpose.msra.mxu3 %v864_v12 }
 0x2f3   : > { %935 = vrot.lane.b32.xlu0 %v1880_v17, %s1632_s15 }
 0x2fb   : > { %970 = vrot.lane.b32.xlu0 %v1902_v35, %s1632_s15 }
 0x303   : > { %891 = vrot.lane.b32.xlu0 %v1902_v35, %s1633_s19 }
 0x352   : > { %v789_v13 = vpop.xlane.xlu0 %788 }
 0x353   : > { %1607 = vrcp.f32 %v789_v13 }
 0x359   : > { %v1608_v14 = vpop.eup %1607 }
 0x35d   : > { %v811_v15 = vpop.f32.mrf.mxu0 }
 0x35e   : > { %v816_v16 = vmul.f32 %v1608_v14, %v811_v15  ;;  %v1572_v15 = vld [vmem:[%s2056_s8 + $0x30] sm:$0xff] }
 0x360   : > { %v817_v18 = vpack.c.bf16 %v816_v16, %v816_v16  ;;  %v1570_v16 = vld [vmem:[%s2056_s8 + $0x20] sm:$0xff] }
 0x362   : > { %1467 = vmatmul.msk.bf16.vlgmr.msrb.gmra.mxu3 %vm696_vm0, %v817_v18  ;;  %v1569_v18 = vld [vmem:[%s2056_s8 + $0x18] sm:$0xff] }
 0x365   : > { %v813_v19 = vpop.f32.mrf.mxu0  ;;  %v936_v20 = vpop.permute.xlu0 %935 }
 0x366   : > { %1472 = vmatmul.msk.bf16.vlgmr.msra.gmra.mxu2 %vm696_vm0, %v936_v20  ;;  %v1568_v19 = vld [vmem:[%s2056_s8 + $0x10] sm:$0xff]  ;;  %v1567_v20 = vld [vmem:[%s2056_s8 + $0x8] sm:$0xff] }
 0x36d   : > { %v971_v21 = vpop.permute.xlu0 %970 }
 0x36e   : > { %v976_v17 = vsel %vm734_vm1, %v971_v21, 0  ;;  %v1566_v21 = vld [vmem:[%s2056_s8] sm:$0xff] }
 0x36f   : > { %985 = vmatpush.bf16.msrb.mxu3 %v976_v17 }
 0x372   : > { %1469 = vmatmul.msk.bf16.vlgmr.msra.gmra.mxu3 %vm696_vm0, %v857_v22 }
 0x375   : > { %v892_v23 = vpop.permute.xlu0 %891 }
 0x376   : > { %v897_v25 = vsel %vm734_vm1, %v892_v23, 0 }
 0x377   : > { %906 = vmatpush.bf16.msra.mxu0 %v897_v25 }
 0x37b   : > { %1007 = vmatpush.bf16.msrb.mxu0 %v998_v51  ;;  %v1578_v51 = vld [vmem:[%s2058_s10 + $0x20] sm:$0xff] }
 0x3e5   : > { %v833_v26 = vpop.f32.mrf.mxu3 }
 0x3e6   : > { %v853_v4 = vadd.f32 %v1930_v3, %v833_v26  ;;  %v1573_v3 = vld [vmem:[%s2056_s8 + $0x38] sm:$0xff] }
 0x3e7   : > { %1123 = vmatpush.bf16.msra.mxu1 %v1573_v3 }
 0x3e9   : > { %v954_v27 = vpop.f32.mrf.mxu2 }
 0x3ea   : > { %v958_v28 = vmul.f32 0.35355338, %v954_v27 }
 0x3eb   : > { %1124 = vmatpush.bf16.msra.mxu1 %v1572_v15 }
 0x3ec   : > { %v959_v29 = vadd.f32 %v1898_v24, %v958_v28 }
 0x3ed   : > { %v835_v30 = vpop.f32.mrf.mxu3 }
 0x3ee   : > { %v960_v31 = vsel %vm696_vm0, %v959_v29, -inf }
 0x3ef   : > { %961 = vmax.xlane.f32.xlu1 %v960_v31  ;;  %1125 = vmatpush.bf16.msra.mxu1 %v1571_v48 }
 0x3f1   : > { %v956_v32 = vpop.f32.mrf.mxu2 }
 0x3f3   : > { %1126 = vmatpush.bf16.msra.mxu1 %v1570_v16 }
 0x3f5   : > { %v875_v33 = vpop.f32.mrf.mxu3 }
 0x3f6   : > { %v879_v34 = vmul.f32 0.35355338, %v875_v33 }
 0x3f7   : > { %1127 = vmatpush.bf16.msra.mxu1 %v1569_v18 }
 0x3f8   : > { %v880_v35 = vadd.f32 %v1898_v24, %v879_v34 }
 0x3fa   : > { %v881_v36 = vsel %vm696_vm0, %v880_v35, -inf }
 0x3fb   : > { %882 = vmax.xlane.f32.xlu2 %v881_v36  ;;  %1128 = vmatpush.bf16.msra.mxu1 %v1568_v19 }
 0x3fd   : > { %v877_v37 = vpop.f32.mrf.mxu3 }
 0x3fe   : > { %v1595_v37 = vld [vmem:[%s2054_s6] ss:$0 sm:$0xff] }
 0x3ff   : > { %1129 = vmatpush.bf16.msra.mxu1 %v1567_v20 }
 0x403   : > { %1130 = vmatpush.bf16.msra.mxu1 %v1566_v21 }
 0x462   : > { %v962_v38 = vpop.xlane.xlu1 %961 }
 0x463   : > { %v963_v39 = vsub.f32 %v959_v29, %v962_v38 }
 0x465   : > { %v964_v40 = vmul.f32 1.442695, %v963_v39 }
 0x467   : > { %1609 = vpow2.f32 %v964_v40  ;;  %v1596_v40 = vld [vmem:[%s2055_s7] ss:$0 sm:$0xff] }
 0x46d   : > { %v1610_v41 = vpop.eup %1609 }
 0x46e   : > { %v969_v42 = vpack.c.bf16 %v1610_v41, %v1610_v41  ;;  %v883_v43 = vpop.xlane.xlu2 %882  ;;  %v966_v44 = vsel %vm696_vm0, %v1610_v41, 0.0 }
 0x46f   : > { %v884_v45 = vsub.f32 %v880_v35, %v883_v43  ;;  %967 = vadd.xlane.f32.xlu1 %v966_v44  ;;  %v1581_v44 = vld [vmem:[%s2058_s10 + $0x38] sm:$0xff] }
 0x470   : > { %1473 = vmatmul.msk.bf16.vlgmr.msrb.gmra.mxu3 %vm696_vm0, %v969_v42  ;;  %1249 = vmatpush.bf16.msrb.mxu2 %v1581_v44 }
 0x471   : > { %v885_v46 = vmul.f32 1.442695, %v884_v45  ;;  %v1580_v45 = vld [vmem:[%s2058_s10 + $0x30] sm:$0xff] }
 0x473   : > { %1611 = vpow2.f32 %v885_v46  ;;  %v1597_v46 = vld [vmem:[%s2057_s9] ss:$0 sm:$0xff] }
 0x474   : > { %1250 = vmatpush.bf16.msrb.mxu2 %v1580_v45 }
 0x479   : > { %v1612_v24 = vpop.eup %1611 }
 0x47a   : > { %v890_v47 = vpack.c.bf16 %v1612_v24, %v1612_v24  ;;  %v887_v49 = vsel %vm696_vm0, %v1612_v24, 0.0 }
 0x47b   : > { %888 = vadd.xlane.f32.xlu0 %v887_v49 }
 0x47c   : > { %1470 = vmatmul.msk.bf16.vlgmr.msra.gmra.mxu0 %vm696_vm0, %v890_v47  ;;  %v1579_v47 = vld [vmem:[%s2058_s10 + $0x28] sm:$0xff] }
 0x47d   : > { %1251 = vmatpush.bf16.msrb.mxu2 %v1579_v47 }
 0x481   : > { %1252 = vmatpush.bf16.msrb.mxu2 %v1578_v51 }
 0x4e2   : > { %v968_v54 = vpop.xlane.xlu1 %967 }
 0x4e3   : > { %1613 = vrcp.f32 %v968_v54 }
 0x4e9   : > { %v1614_v56 = vpop.eup %1613 }
 0x4ee   : > { %v889_v55 = vpop.xlane.xlu0 %888 }
 0x4ef   : > { %1615 = vrcp.f32 %v889_v55  ;;  %v1577_v55 = vld [vmem:[%s2058_s10 + $0x18] sm:$0xff] }
 0x4f0   : > { %1253 = vmatpush.bf16.msrb.mxu2 %v1577_v55  ;;  %v1600_v55 = vld [vmem:[%s2061_s13] ss:$0 sm:$0xff] }
 0x4f3   : > { %v987_v57 = vpop.f32.mrf.mxu3 }
 0x4f4   : > { %v992_v58 = vmul.f32 %v1614_v56, %v987_v57 }
 0x4f5   : > { %v1616_v60 = vpop.eup %1615 }
 0x4f6   : > { %v993_v59 = vpack.c.bf16 %v992_v58, %v992_v58 }
 0x4f8   : > { %1474 = vmatmul.msk.bf16.vlgmr.msrb.gmra.mxu0 %vm696_vm0, %v993_v59 }
 0x4f9   : > { %v908_v61 = vpop.f32.mrf.mxu0 }
 0x4fa   : > { %v913_v62 = vmul.f32 %v1616_v60, %v908_v61  ;;  %v1576_v60 = vld [vmem:[%s2058_s10 + $0x10] sm:$0xff] }
 0x4fb   : > { %v989_v63 = vpop.f32.mrf.mxu3  ;;  %1254 = vmatpush.bf16.msrb.mxu2 %v1576_v60 }
 0x4fc   : > { %v914_v0 = vpack.c.bf16 %v913_v62, %v913_v62 }
 0x4fe   : > { %1471 = vmatmul.msk.bf16.vlgmr.msrb.gmra.mxu1 %vm696_vm0, %v914_v0 }
 0x501   : > { %v910_v1 = vpop.f32.mrf.mxu0 }
 0x502   : > { %v1575_v1 = vld [vmem:[%s2058_s10 + $0x8] sm:$0xff] }
 0x503   : > { %1255 = vmatpush.bf16.msrb.mxu2 %v1575_v1 }
 0x575   : > { %v1009_v2 = vpop.f32.mrf.mxu0 }
 0x57b   : > { %v930_v5 = vpop.f32.mrf.mxu1 }
 0x57c   : > { %v934_v6 = vadd.f32 %v930_v5, %v853_v4 }
 0x57d   : > { %v1011_v8 = vpop.f32.mrf.mxu0 }
 0x57e   : > { %v1013_v9 = vadd.f32 %v1009_v2, %v934_v6  ;;  %v1574_v6 = vld [vmem:[%s2058_s10] sm:$0xff] }
 0x57f   : > { %1256 = vmatpush.bf16.msrb.mxu2 %v1574_v6 }
 0x580   : > { %v1018_v11 = vadd.f32 %v1594_v7, %v1013_v9 }
 0x582   : > { %v1020_v12 = vadd.f32 %v1019_v10, %v1018_v11 }
 0x583   : > { %v932_v13 = vpop.f32.mrf.mxu1 }
 0x584   : > { %1023 = vadd.xlane.f32.xlu2 %v1020_v12  ;;  %v1026_v14 = vmul.f32 %v1020_v12, %v1020_v12 }
 0x586   : > { %1027 = vadd.xlane.f32.xlu1 %v1026_v14 }
 0x5f7   : > { %v1024_v17 = vpop.xlane.xlu2 %1023 }
 0x5f8   : > { %v1025_v22 = vmul.f32 0.03125, %v1024_v17 }
 0x5f9   : > { %v1028_v23 = vpop.xlane.xlu1 %1027 }
 0x5fa   : > { %v1030_v25 = vmul.f32 %v1025_v22, %v1025_v22  ;;  %v1029_v26 = vmul.f32 0.03125, %v1028_v23  ;;  %v1033_v36 = vsub.f32 %v1020_v12, %v1025_v22 }
 0x5fc   : > { %v1031_v27 = vsub.f32 %v1029_v26, %v1030_v25 }
 0x5fe   : > { %v1032_v28 = vmax.f32 %v1031_v27, 0.0 }
 0x600   : > { %v1034_v29 = vadd.f32 1e-12, %v1032_v28 }
 0x602   : > { %1617 = vrsqrt.f32 %v1034_v29  ;;  %vm1041_vm3 = vweird.f32 %v1034_v29 }
 0x608   : > { %v1618_v30 = vpop.eup %1617 }
 0x609   : > { %v1036_v31 = vmul.f32 %v1618_v30, %v1034_v29  ;;  %vm1042_vm2 = vweird.f32 %v1618_v30 }
 0x60a   : > { %vm1043_vm4 = vmor %vm1041_vm3, %vm1042_vm2 }
 0x60b   : > { %v1037_v32 = vmul.f32 %v1618_v30, %v1036_v31 }
 0x60d   : > { %v1038_v33 = vmul.f32 0.5, %v1037_v32  ;;  %v1598_v32 = vld [vmem:[%s2059_s11] ss:$0 sm:$0xff] }
 0x60f   : > { %v1039_v34 = vsub.f32 1.5, %v1038_v33 }
 0x611   : > { %v1040_v35 = vmul.f32 %v1618_v30, %v1039_v34 }
 0x613   : > { %v1044_v38 = vsel %vm1043_vm4, %v1618_v30, %v1040_v35 }
 0x614   : > { %v1045_v39 = vmul.f32 %v1044_v38, %v1033_v36 }
 0x616   : > { %v1049_v41 = vmul.f32 %v1595_v37, %v1045_v39 }
 0x618   : > { %v1999_v42 = vadd.f32 %v1596_v40, %v1049_v41 }
 0x61a   : > { %v1054_v43 = vpack.c.bf16 %v1999_v42, %v1999_v42 }
 0x61c   : > { %1131 = vmatmul.bf16.vlgmr.msra.gmra.mxu1 %v1054_v43 }
 0x699   : > { %v1132_v24 = vpop.f32.mrf.mxu1 }
 0x69a   : > { %v1133_v49 = vadd.f32 %v1597_v46, %v1132_v24 }
 0x69c   : > { %v1137_v50 = vmul.f32 0.70710677, %v1133_v49  ;;  %v1136_v28 = vmul.f32 0.5, %v1133_v49 }
 0x69e   : > { %v1138_v52 = vmul.f32 %v1137_v50, %v1137_v50 }
 0x6a0   : > { %v1139_v53 = vmin.f32 %v1138_v52, 16.0 }
 0x6a1   : > { %v1134_v54 = vpop.f32.mrf.mxu1 }
 0x6a2   : > { %v1140_v56 = vmul.f32 2.1237322e-06, %v1139_v53  ;;  %v1151_v57 = vmul.f32 3.8918573e-05, %v1139_v53 }
 0x6a4   : > { %v1141_v58 = vadd.f32 0.00028619796, %v1140_v56  ;;  %v1152_v59 = vadd.f32 0.001143296, %v1151_v57 }
 0x6a6   : > { %v1142_v61 = vmul.f32 %v1141_v58, %v1139_v53  ;;  %v1153_v62 = vmul.f32 %v1152_v59, %v1139_v53 }
 0x6a8   : > { %v1154_v63 = vadd.f32 0.014752088, %v1153_v62  ;;  %v1143_v0 = vadd.f32 0.0036580483, %v1142_v61 }
 0x6aa   : > { %v1155_v2 = vmul.f32 %v1154_v63, %v1139_v53  ;;  %v1144_v5 = vmul.f32 %v1143_v0, %v1139_v53 }
 0x6ac   : > { %v1156_v4 = vadd.f32 0.112945676, %v1155_v2  ;;  %v1145_v9 = vadd.f32 0.05243302, %v1144_v5 }
 0x6ae   : > { %v1157_v7 = vmul.f32 %v1156_v4, %v1139_v53  ;;  %v1146_v12 = vmul.f32 %v1145_v9, %v1139_v53 }
 0x6b0   : > { %v1158_v8 = vadd.f32 0.4994258, %v1157_v7  ;;  %v1147_v13 = vadd.f32 0.18741608, %v1146_v12 }
 0x6b2   : > { %v1159_v10 = vmul.f32 %v1158_v8, %v1139_v53  ;;  %v1148_v3 = vmul.f32 %v1147_v13, %v1139_v53  ;;  %v1599_v53 = vld [vmem:[%s2060_s12] ss:$0 sm:$0xff] }
 0x6b4   : > { %v1160_v11 = vadd.f32 1.0, %v1159_v10  ;;  %v1149_v18 = vadd.f32 1.1283791, %v1148_v3 }
 0x6b6   : > { %1619 = vrcp.f32 %v1160_v11  ;;  %v1172_v16 = vand.u32 2147483648, %v1160_v11  ;;  %v1170_v20 = vand.u32 2147483647, %v1160_v11  ;;  %vm1166_vm6 = vweird.f32 %v1160_v11 }
 0x6b7   : > { %v1150_v22 = vmul.f32 %v1149_v18, %v1137_v50 }
 0x6b8   : > { %v1173_v17 = vor.u32 1.1754944e-38, %v1172_v16  ;;  %vm1171_vm8 = vcmp.eq.f32.partialorder %v1170_v20, 8.507059e+37 }
 0x6bc   : > { %v1620_v14 = vpop.eup %1619 }
 0x6bd   : > { %v1162_v15 = vmul.f32 %v1620_v14, %v1160_v11  ;;  %vm1167_vm5 = vweird.f32 %v1620_v14 }
 0x6be   : > { %vm1168_vm7 = vmor %vm1166_vm6, %vm1167_vm5 }
 0x6bf   : > { %v1163_v48 = vsub.f32 1.0, %v1162_v15 }
 0x6c1   : > { %v1164_v19 = vmul.f32 %v1620_v14, %v1163_v48 }
 0x6c3   : > { %v1165_v21 = vadd.f32 %v1620_v14, %v1164_v19 }
 0x6c5   : > { %v1169_v23 = vsel %vm1168_vm7, %v1620_v14, %v1165_v21 }
 0x6c6   : > { %v1174_v25 = vsel %vm1171_vm8, %v1173_v17, %v1169_v23 }
 0x6c7   : > { %v1175_v26 = vmul.f32 %v1174_v25, %v1150_v22 }
 0x6c9   : > { %v1507_v27 = vclamps-f32 %v1175_v26, 1.0 }
 0x6cb   : > { %v1178_v29 = vadd.f32 1.0, %v1507_v27 }
 0x6cd   : > { %v1179_v30 = vmul.f32 %v1178_v29, %v1136_v28 }
 0x6cf   : > { %v1180_v31 = vpack.c.bf16 %v1179_v30, %v1179_v30 }
 0x6d1   : > { %1257 = vmatmul.bf16.vlgmr.msrb.gmra.mxu2 %v1180_v31 }
 0x754   : > { %v1258_v33 = vpop.f32.mrf.mxu2 }
 0x755   : > { %v1259_v34 = vadd.f32 %v1598_v32, %v1258_v33 }
 0x757   : > { %v1262_v35 = vadd.f32 %v1259_v34, %v1999_v42 }
 0x759   : > { %1265 = vadd.xlane.f32.xlu2 %v1262_v35  ;;  %v1268_v36 = vmul.f32 %v1262_v35, %v1262_v35 }
 0x75b   : > { %1269 = vadd.xlane.f32.xlu1 %v1268_v36 }
 0x75c   : > { %v1260_v37 = vpop.f32.mrf.mxu2 }
 0x7cc   : > { %v1266_v38 = vpop.xlane.xlu2 %1265 }
 0x7cd   : > { %v1267_v39 = vmul.f32 0.03125, %v1266_v38 }
 0x7ce   : > { %v1270_v40 = vpop.xlane.xlu1 %1269 }
 0x7cf   : > { %v1272_v41 = vmul.f32 %v1267_v39, %v1267_v39  ;;  %v1271_v43 = vmul.f32 0.03125, %v1270_v40  ;;  %v1275_v52 = vsub.f32 %v1262_v35, %v1267_v39 }
 0x7d1   : > { %v1273_v44 = vsub.f32 %v1271_v43, %v1272_v41 }
 0x7d3   : > { %v1274_v45 = vmax.f32 %v1273_v44, 0.0 }
 0x7d5   : > { %v1276_v46 = vadd.f32 1e-12, %v1274_v45 }
 0x7d7   : > { %1621 = vrsqrt.f32 %v1276_v46  ;;  %vm1283_vm10 = vweird.f32 %v1276_v46 }
 0x7dd   : > { %v1622_v24 = vpop.eup %1621 }
 0x7de   : > { %v1278_v47 = vmul.f32 %v1622_v24, %v1276_v46  ;;  %vm1284_vm9 = vweird.f32 %v1622_v24 }
 0x7df   : > { %vm1285_vm11 = vmor %vm1283_vm10, %vm1284_vm9 }
 0x7e0   : > { %v1279_v49 = vmul.f32 %v1622_v24, %v1278_v47 }
 0x7e2   : > { %v1280_v50 = vmul.f32 0.5, %v1279_v49 }
 0x7e4   : > { %v1281_v51 = vsub.f32 1.5, %v1280_v50 }
 0x7e6   : > { %v1282_v42 = vmul.f32 %v1622_v24, %v1281_v51 }
 0x7e8   : > { %v1286_v54 = vsel %vm1285_vm11, %v1622_v24, %v1282_v42 }
 0x7e9   : > { %v1287_v56 = vmul.f32 %v1286_v54, %v1275_v52 }
 0x7eb   : > { %v1291_v57 = vmul.f32 %v1599_v53, %v1287_v56 }
 0x7ed   : > { %v1295_v58 = vadd.f32 %v1600_v55, %v1291_v57 }
 0x7ef   : > { %v1296_v59 = vpack.c.bf16 %v1295_v58, %v1295_v58 }
 0x7f1   : > { %1297 = vst [vmem:[%s476_s24] sm:$0xf] %v1296_v59 }
 0x7f2 PF: > { %s24_s29 = sadd.s32 1, %s1629_s29  }
 0x7f3   : > { %p21_p4 = scmp.ge.s32.totalorder %s24_s29, 4  }
 0x7f5   :  { %23 = sbr.rel (!%p21_p4) target bundleno = 1 (0x1), region = 109 }

// kernel: forward.9
= control target key start
LH: loop header
LB: loop body
LE: loop exit
PB: predicated region body
PF: predicated region fallthrough
CT: control target
= control target key end

     0   :  { %s3177_s0 = inlined_call_operand.vmem [shape: bf16[2,8,128], index: 0, kind: input, shape index: {}]   ;;  %s3178_s1 = inlined_call_operand.vmem [shape: bf16[2,8,128], index: 1, kind: input, shape index: {}]   ;;  %s3179_s2 = inlined_call_operand.vmem [shape: bf16[128,384], index: 2, kind: input, shape index: {}]   ;;  %s3180_s3 = inlined_call_operand.vmem [shape: f32[1,384], index: 3, kind: input, shape index: {}]   ;;  %s3181_s4 = inlined_call_operand.vmem [shape: bf16[128,128], index: 4, kind: input, shape index: {}]   ;;  %s3182_s5 = inlined_call_operand.vmem [shape: f32[1,128], index: 5, kind: input, shape index: {}]   ;;  %s3183_s6 = inlined_call_operand.vmem [shape: f32[1,128], index: 6, kind: input, shape index: {}, may-alias: {6,14,20}]   ;;  %s3184_s7 = inlined_call_operand.vmem [shape: f32[1,128], index: 7, kind: input, shape index: {}, may-alias: {7,15,21}]   ;;  %s3185_s8 = inlined_call_operand.vmem [shape: bf16[128,128], index: 8, kind: input, shape index: {}]   ;;  %s3186_s9 = inlined_call_operand.vmem [shape: f32[1,128], index: 9, kind: input, shape index: {}]   ;;  %s3187_s10 = inlined_call_operand.vmem [shape: bf16[128,256], index: 10, kind: input, shape index: {}]   ;;  %s3188_s11 = inlined_call_operand.vmem [shape: f32[1,256], index: 11, kind: input, shape index: {}]   ;;  %s3189_s12 = inlined_call_operand.vmem [shape: bf16[128,128], index: 12, kind: input, shape index: {}]   ;;  %s3190_s13 = inlined_call_operand.vmem [shape: f32[1,128], index: 13, kind: input, shape index: {}]   ;;  %s3191_s14 = inlined_call_operand.vmem [shape: f32[1,128], index: 14, kind: input, shape index: {}, may-alias: {6,14,20}]   ;;  %s3192_s15 = inlined_call_operand.vmem [shape: f32[1,128], index: 15, kind: input, shape index: {}, may-alias: {7,15,21}]   ;;  %s3193_s16 = inlined_call_operand.vmem [shape: bf16[128,128], index: 16, kind: input, shape index: {}]   ;;  %s3194_s17 = inlined_call_operand.vmem [shape: f32[1,128], index: 17, kind: input, shape index: {}]   ;;  %s3195_s18 = inlined_call_operand.vmem [shape: bf16[128,128], index: 18, kind: input, shape index: {}]   ;;  %s3196_s19 = inlined_call_operand.vmem [shape: f32[1,128], index: 19, kind: input, shape index: {}]   ;;  %s3197_s20 = inlined_call_operand.vmem [shape: f32[1,128], index: 20, kind: input, shape index: {}, may-alias: {6,14,20}]   ;;  %s3198_s21 = inlined_call_operand.vmem [shape: f32[1,128], index: 21, kind: input, shape index: {}, may-alias: {7,15,21}]   ;;  %s3199_s22 = inlined_call_operand.vmem [shape: bf16[2,8,128], index: 22, kind: output, shape index: {}]  }
   0x1   :  { %3209 = sst [smem:[#allocation2_spill]] %s3177_s0 }
   0x2   :  { %3210 = sst [smem:[#allocation3_spill]] %s3178_s1 }
   0x3   :  { %3211 = sst [smem:[#allocation4_spill]] %s3179_s2 }
   0x4   :  { %3212 = sst [smem:[#allocation5_spill]] %s3180_s3  ;;  %s2651_s3 = smov 0  }
   0x5   :  { %3213 = sst [smem:[#allocation6_spill]] %s3181_s4 }
   0x6   :  { %3214 = sst [smem:[#allocation7_spill]] %s3182_s5 }
   0x7   :  { %3215 = sst [smem:[#allocation8_spill]] %s3183_s6 }
   0x8 LB: > { %s2109_s28 = sadd.s32 4294967295, %s2530_s3   ;;  %p2113_p0 = scmp.ge.s32.totalorder %s2530_s3, 1  ;;  %s2530_s3 = sphi %s2651_s3, %s32_s3  }
   0x9   : > { %p620_p1 = scmp.lt.s32.totalorder %s2530_s3, 3 }
   0xb   : > { %p621_p2 = pnand %p2113_p0, %p620_p1 }
   0xc   : > { %s3216_s4 = sld [smem:[#allocation4_spill]] (!%p621_p2)  ;;  %p684_p3 = scmp.lt.s32.totalorder (!%p621_p2), %s2109_s28, 1 }
   0xd   : > { %624 = sbr.rel (%p621_p2) target bundleno = 2950 (0xb86), region = 108  ;;  %s3217_s6 = sld [smem:[#allocation2_spill]] (!%p621_p2) }
   0xe   : > { %s3204_s25 = smov (!%p621_p2), 120   ;;  %s3202_s26 = smov (!%p621_p2), 112  }
   0xf   : > { %s3219_s30 = sld [smem:[#allocation6_spill]] (!%p621_p2)  ;;  %s3223_s1 = smov (!%p621_p2), 104  }
  0x10   : > { %s3220_s27 = sld [smem:[#allocation7_spill]] (!%p621_p2) }
  0x12   : > { %v2203_v0 = vld [vmem:[%s3216_s4 + $0xa8] sm:$0xf]  ;;  %v2421_v1 = vld [vmem:[%s3216_s4 + $0xb0] sm:$0xf0]  ;;  %v2420_v2 = vld [vmem:[%s3216_s4 + $0xac] sm:$0xf] }
  0x13   : > { %v2204_v3 = vor.u32 %v2421_v1, %v2203_v0  ;;  %v2205_v4 = vld [vmem:[%s3216_s4 + $0xb4] sm:$0xf0]  ;;  %v2191_v5 = vld [vmem:[%s3216_s4 + $0x90] sm:$0xf]  ;;  %v2418_v6 = vld [vmem:[%s3216_s4 + $0x98] sm:$0xf0] }
  0x14   : > { %v2208_v7 = vor.u32 %v2420_v2, %v2205_v4  ;;  %v2417_v8 = vld [vmem:[%s3216_s4 + $0x94] sm:$0xf]  ;;  %v2193_v9 = vld [vmem:[%s3216_s4 + $0x9c] sm:$0xf0]  ;;  %v2192_v10 = vor.u32 %v2418_v6, %v2191_v5  ;;  %v2179_v12 = vld [vmem:[%s3216_s4 + $0x78] sm:$0xf] }
  0x15   : > { %867 = vmatpush.bf16.msra.mxu0 %v2204_v3  ;;  %v2196_v11 = vor.u32 %v2417_v8, %v2193_v9  ;;  %v2415_v13 = vld [vmem:[%s3216_s4 + $0x80] sm:$0xf0]  ;;  %v2414_v14 = vld [vmem:[%s3216_s4 + $0x7c] sm:$0xf]  ;;  %v2181_v15 = vld [vmem:[%s3216_s4 + $0x84] sm:$0xf0] }
  0x16   : > { %880 = vmatpush.bf16.msra.mxu1 %v2208_v7  ;;  %v2180_v16 = vor.u32 %v2415_v13, %v2179_v12  ;;  %v2184_v17 = vor.u32 %v2414_v14, %v2181_v15  ;;  %v2167_v18 = vld [vmem:[%s3216_s4 + $0x60] sm:$0xf]  ;;  %v2412_v19 = vld [vmem:[%s3216_s4 + $0x68] sm:$0xf0]  ;;  %v2411_v20 = vld [vmem:[%s3216_s4 + $0x64] sm:$0xf] }
  0x17   : > { %v2169_v21 = vld [vmem:[%s3216_s4 + $0x6c] sm:$0xf0]  ;;  %v2168_v22 = vor.u32 %v2412_v19, %v2167_v18  ;;  %v2422_v24 = vld [vmem:[%s3216_s4 + $0xb8] sm:$0xf0]  ;;  %v2199_v25 = vld [vmem:[%s3216_s4 + $0x98] sm:$0xf] }
  0x18   : > { %v2211_v23 = vld [vmem:[%s3216_s4 + $0xb0] sm:$0xf]  ;;  %v2172_v26 = vor.u32 %v2411_v20, %v2169_v21  ;;  %v2155_v27 = vld [vmem:[%s3216_s4 + $0x48] sm:$0xf]  ;;  %v2409_v28 = vld [vmem:[%s3216_s4 + $0x50] sm:$0xf0] }
  0x19   : > { %868 = vmatpush.bf16.msra.mxu0 %v2192_v10  ;;  %v2212_v29 = vor.u32 %v2422_v24, %v2211_v23  ;;  %v2419_v30 = vld [vmem:[%s3216_s4 + $0xa0] sm:$0xf0]  ;;  %v2408_v31 = vld [vmem:[%s3216_s4 + $0x4c] sm:$0xf]  ;;  %v2157_v32 = vld [vmem:[%s3216_s4 + $0x54] sm:$0xf0]  ;;  %v2156_v34 = vor.u32 %v2409_v28, %v2155_v27 }
  0x1a   : > { %881 = vmatpush.bf16.msra.mxu1 %v2196_v11  ;;  %v2200_v33 = vor.u32 %v2419_v30, %v2199_v25  ;;  %v2143_v35 = vld [vmem:[%s3216_s4 + $0x30] sm:$0xf]  ;;  %v2187_v36 = vld [vmem:[%s3216_s4 + $0x80] sm:$0xf]  ;;  %v2416_v37 = vld [vmem:[%s3216_s4 + $0x88] sm:$0xf0]  ;;  %v2160_v38 = vor.u32 %v2408_v31, %v2157_v32 }
  0x1b   : > { %893 = vmatpush.bf16.msra.mxu2 %v2212_v29  ;;  %v2406_v39 = vld [vmem:[%s3216_s4 + $0x38] sm:$0xf0]  ;;  %v2405_v40 = vld [vmem:[%s3216_s4 + $0x34] sm:$0xf]  ;;  %v2145_v41 = vld [vmem:[%s3216_s4 + $0x3c] sm:$0xf0]  ;;  %v2188_v45 = vor.u32 %v2416_v37, %v2187_v36 }
  0x1c   : > { %v2175_v42 = vld [vmem:[%s3216_s4 + $0x68] sm:$0xf]  ;;  %v2131_v43 = vld [vmem:[%s3216_s4 + $0x18] sm:$0xf]  ;;  %v2403_v44 = vld [vmem:[%s3216_s4 + $0x20] sm:$0xf0]  ;;  %v2144_v47 = vor.u32 %v2406_v39, %v2143_v35  ;;  %v2148_v50 = vor.u32 %v2405_v40, %v2145_v41 }
  0x1d   : > { %869 = vmatpush.bf16.msra.mxu0 %v2180_v16  ;;  %v2413_v46 = vld [vmem:[%s3216_s4 + $0x70] sm:$0xf0]  ;;  %v2402_v48 = vld [vmem:[%s3216_s4 + $0x1c] sm:$0xf]  ;;  %v2133_v49 = vld [vmem:[%s3216_s4 + $0x24] sm:$0xf0]  ;;  %v2132_v52 = vor.u32 %v2403_v44, %v2131_v43 }
  0x1e   : > { %882 = vmatpush.bf16.msra.mxu1 %v2184_v17  ;;  %s3227_s28 = smov (!%p684_p3, %s2109_s28), 1  ;;  %v2176_v51 = vor.u32 %v2413_v46, %v2175_v42  ;;  %v2163_v53 = vld [vmem:[%s3216_s4 + $0x50] sm:$0xf]  ;;  %v2410_v54 = vld [vmem:[%s3216_s4 + $0x58] sm:$0xf0]  ;;  %v2136_v55 = vor.u32 %v2402_v48, %v2133_v49  ;;  %vm921_vm0 = vcmask 64512  }
  0x1f   : > { %894 = vmatpush.bf16.msra.mxu2 %v2200_v33  ;;  %v2119_v56 = vld [vmem:[%s3216_s4] sm:$0xf]  ;;  %v2400_v57 = vld [vmem:[%s3216_s4 + $0x8] sm:$0xf0]  ;;  %v2399_v58 = vld [vmem:[%s3216_s4 + $0x4] sm:$0xf]  ;;  %v2164_v60 = vor.u32 %v2410_v54, %v2163_v53 }
  0x20   : > { %v2121_v59 = vld [vmem:[%s3216_s4 + $0xc] sm:$0xf0]  ;;  %s2789_s29 = sshll.u32 %s3227_s28, 2  ;;  %v2120_v61 = vor.u32 %v2400_v57, %v2119_v56  ;;  %v2151_v62 = vld [vmem:[%s3216_s4 + $0x38] sm:$0xf]  ;;  %vm956_vm1 = vcmask 1043456  }
  0x21   : > { %870 = vmatpush.bf16.msra.mxu0 %v2168_v22  ;;  %v2407_v63 = vld [vmem:[%s3216_s4 + $0x40] sm:$0xf0]  ;;  %v2124_v0 = vor.u32 %v2399_v58, %v2121_v59  ;;  %s687_s28 = scalar_lea.vmem %s3217_s6, %s2789_s29  ;;  %v2139_v3 = vld [vmem:[%s3216_s4 + $0x20] sm:$0xf]  ;;  %v2404_v4 = vld [vmem:[%s3216_s4 + $0x28] sm:$0xf0] }
  0x22   : > { %883 = vmatpush.bf16.msra.mxu1 %v2172_v26  ;;  %v2152_v1 = vor.u32 %v2407_v63, %v2151_v62  ;;  %v2801_v2 = vld [vmem:[%s687_s28] sm:$0xf]  ;;  %v2140_v5 = vor.u32 %v2404_v4, %v2139_v3  ;;  %v2127_v6 = vld [vmem:[%s3216_s4 + $0x8] sm:$0xf]  ;;  %v2401_v7 = vld [vmem:[%s3216_s4 + $0x10] sm:$0xf0]  ;;  %s695_s4 = scalar_lea.vmem %s3199_s22, %s2789_s29 }
  0x23   : > { %895 = vmatpush.bf16.msra.mxu2 %v2188_v45  ;;  %v2128_v8 = vor.u32 %v2401_v7, %v2127_v6  ;;  %s3218_s6 = sld [smem:[#allocation5_spill]]  ;;  %s3206_s28 = smov 104   ;;  %v908_v24 = vld [vmem:[%s3219_s30] sm:$0xf]  ;;  %v2535_v42 = vmov 0.0  }
  0x24   : > { %v1063_v25 = vsel %vm956_vm1, %v908_v24, 0 }
  0x25   : > { %871 = vmatpush.bf16.msra.mxu0 %v2156_v34 }
  0x26   : > { %884 = vmatpush.bf16.msra.mxu1 %v2160_v38  ;;  %v912_v38 = vlaneseq }
  0x27   : > { %896 = vmatpush.bf16.msra.mxu2 %v2176_v51 }
  0x28   : > { %v913_v39 = vshrl.u32 %v912_v38, 7  ;;  %v915_v40 = vand.u32 127, %v912_v38 }
  0x29   : > { %872 = vmatpush.bf16.msra.mxu0 %v2144_v47  ;;  %v731_v9 = vld [vmem:[%s3218_s6] sm:$0x7]  ;;  %s3222_s6 = sld [smem:[#allocation8_spill]] }
  0x2a   : > { %885 = vmatpush.bf16.msra.mxu1 %v2148_v50  ;;  %v733_v10 = vperm.slane %v731_v9, 0  ;;  %v734_v11 = vperm.slane %v731_v9, 1  ;;  %v735_v26 = vperm.slane %v731_v9, 2  ;;  %vm916_vm2 = vcmp.gt.s32.totalorder %v915_v40, %v913_v39 }
  0x2b   : > { %897 = vmatpush.bf16.msra.mxu2 %v2164_v60  ;;  %v2839_v43 = vsel %vm916_vm2, -1e+09, %v2535_v42 }
  0x2d   : > { %873 = vmatpush.bf16.msra.mxu0 %v2132_v52 }
  0x2e   : > { %886 = vmatpush.bf16.msra.mxu1 %v2136_v55 }
  0x2f   : > { %898 = vmatpush.bf16.msra.mxu2 %v2152_v1 }
  0x31   : > { %874 = vmatpush.bf16.msra.mxu0 %v2120_v61 }
  0x32   : > { %887 = vmatpush.bf16.msra.mxu1 %v2124_v0 }
  0x33   : > { %899 = vmatpush.bf16.msra.mxu2 %v2140_v5 }
  0x34   : > { %875 = vmatmul.bf16.vlgmr.msra.gmra.mxu0 %v2801_v2 }
  0x35   : > { %888 = vmatmul.bf16.vlgmr.msra.gmra.mxu1 %v2801_v2 }
  0x37   : > { %900 = vmatpush.bf16.msra.mxu2 %v2128_v8 }
  0x3a   : > { %901 = vmatmul.bf16.vlgmr.msra.gmra.mxu2 %v2801_v2 }
  0xb1   : > { %v876_v12 = vpop.f32.mrf.mxu0 }
  0xb2   : > { %v877_v13 = vadd.f32 %v876_v12, %v733_v10  ;;  %v889_v14 = vpop.f32.mrf.mxu1 }
  0xb3   : > { %v890_v15 = vadd.f32 %v889_v14, %v734_v11 }
  0xb5   : > { %v906_v16 = vpack.c.bf16 %v890_v15, %v877_v13 }
  0xb7   : > { %v919_v17 = vunpack.c.h.b16 %v906_v16  ;;  %v976_v22 = vunpack.c.l.b16 %v906_v16 }
  0xb9   : > { %v878_v18 = vpop.f32.mrf.mxu0  ;;  %v920_v19 = vpack.c.b16 %v919_v17, %v919_v17  ;;  %v977_v23 = vpack.c.b16 %v976_v22, %v976_v22 }
  0xba   : > { %v891_v20 = vpop.f32.mrf.mxu1 }
  0xbb   : > { %1159 = vrot.lane.b32.xlu2 %v920_v19, %s3206_s28  ;;  %980 = vrot.lane.b32.xlu1 %v920_v19, %s3204_s25  ;;  %v926_v21 = vsel %vm921_vm0, %v920_v19, 0 }
  0xbc   : > { %935 = vmatpush.bf16.xpose.msrb.mxu2 %v926_v21 }
  0xbd   : > { %v902_v27 = vpop.f32.mrf.mxu2 }
  0xbe   : > { %v903_v28 = vadd.f32 %v902_v27, %v735_v26 }
  0xc0   : > { %v907_v29 = vpack.c.bf16 %v903_v28, %v903_v28 }
  0xc2   : > { %v1014_v30 = vunpack.c.l.b16 %v907_v29  ;;  %v958_v33 = vsel %vm956_vm1, %v907_v29, 0 }
  0xc3   : > { %1080 = vrot.lane.b32.xlu2 %v920_v19, %s3202_s26  ;;  %978 = vrot.lane.b32.xlu1 %v977_v23, %s3204_s25 }
  0xc4   : > { %2213 = vmatmul.msk.bf16.vlgmr.msrb.gmra.mxu2 %vm921_vm0, %v906_v16  ;;  %v2832_v31 = vpack.c.b16 %v1014_v30, %v1014_v30  ;;  %967 = vmatpush.bf16.msra.mxu3 %v958_v33 }
  0xc5   : > { %1072 = vmatpush.bf16.msra.mxu2 %v1063_v25  ;;  %v904_v32 = vpop.f32.mrf.mxu2 }
  0xcb   : > { %1078 = vrot.lane.b32.xlu1 %v977_v23, %s3202_s26 }
  0xd3   : > { %1016 = vrot.lane.b32.xlu1 %v2832_v31, %s3204_s25  ;;  %s3224_s25 = smov 120  }
 0x115   : > { %v1160_v34 = vpop.permute.xlu2 %1159 }
 0x116   : > { %v1165_v35 = vsel %vm921_vm0, %v1160_v34, 0 }
 0x117   : > { %1174 = vmatpush.bf16.xpose.msrb.mxu2 %v1165_v35  ;;  %v909_v35 = vld [vmem:[%s3219_s30 + $0x4] sm:$0xf] }
 0x11d   : > { %v1081_v56 = vpop.permute.xlu2 %1080 }
 0x11e   : > { %v1086_v59 = vsel %vm921_vm0, %v1081_v56, 0 }
 0x12d   : > { %v981_v36 = vpop.permute.xlu1 %980 }
 0x12e   : > { %v986_v37 = vsel %vm921_vm0, %v981_v36, 0  ;;  %v1044_v36 = vsel %vm956_vm1, %v909_v35, 0 }
 0x12f   : > { %995 = vmatpush.bf16.xpose.msrb.mxu3 %v986_v37 }
 0x135   : > { %v979_v48 = vpop.permute.xlu1 %978 }
 0x13d   : > { %v1079_v49 = vpop.permute.xlu1 %1078 }
 0x145   : > { %v1017_v50 = vpop.permute.xlu1 %1016 }
 0x146   : > { %v1022_v51 = vsel %vm956_vm1, %v1017_v50, 0 }
 0x147   : > { %v937_v41 = vpop.f32.mrf.mxu2  ;;  %1031 = vmatpush.bf16.msrb.mxu1 %v1022_v51  ;;  %v911_v51 = vld [vmem:[%s3219_s30 + $0xc] sm:$0xf] }
 0x148   : > { %v941_v44 = vmul.f32 0.35355338, %v937_v41 }
 0x14a   : > { %v942_v45 = vadd.f32 %v941_v44, %v2839_v43 }
 0x14b   : > { %1053 = vmatpush.bf16.msra.mxu1 %v1044_v36 }
 0x14c   : > { %v943_v46 = vsel %vm921_vm0, %v942_v45, -inf }
 0x14d   : > { %944 = vmax.xlane.f32.xlu0 %v943_v46 }
 0x14f   : > { %v939_v47 = vpop.f32.mrf.mxu2 }
 0x1c0   : > { %v945_v52 = vpop.xlane.xlu0 %944 }
 0x1c1   : > { %v946_v53 = vsub.f32 %v942_v45, %v945_v52  ;;  %v1220_v52 = vsel %vm956_vm1, %v911_v51, 0  ;;  %v2277_v51 = vld [vmem:[%s3187_s10 + $0x28] sm:$0xf0] }
 0x1c3   : > { %v947_v54 = vmul.f32 1.442695, %v946_v53  ;;  %v910_v53 = vld [vmem:[%s3219_s30 + $0x8] sm:$0xf] }
 0x1c5   : > { %2486 = vpow2.f32 %v947_v54  ;;  %v1141_v54 = vsel %vm956_vm1, %v910_v53, 0  ;;  %v2430_v53 = vld [vmem:[%s3185_s8 + $0x38] sm:$0xff] }
 0x1cb   : > { %v2487_v55 = vpop.eup %2486 }
 0x1cc   : > { %v949_v57 = vsel %vm921_vm0, %v2487_v55, 0.0  ;;  %v952_v58 = vpack.c.bf16 %v2487_v55, %v2487_v55 }
 0x1cd   : > { %950 = vadd.xlane.f32.xlu0 %v949_v57 }
 0x1ce   : > { %2214 = vmatmul.msk.bf16.vlgmr.msra.gmra.mxu3 %vm921_vm0, %v952_v58 }
 0x1cf   : > { %1095 = vmatpush.bf16.xpose.msra.mxu3 %v1086_v59 }
 0x1de   : > { %2215 = vmatmul.msk.bf16.vlgmr.msrb.gmra.mxu3 %vm921_vm0, %v979_v48 }
 0x1e1   : > { %1157 = vrot.lane.b32.xlu0 %v977_v23, %s3206_s28 }
 0x1ee   : > { %2219 = vmatmul.msk.bf16.vlgmr.msra.gmra.mxu3 %vm921_vm0, %v1079_v49 }
 0x240   : > { %v951_v60 = vpop.xlane.xlu0 %950 }
 0x241   : > { %2488 = vrcp.f32 %v951_v60 }
 0x247   : > { %v2489_v61 = vpop.eup %2488 }
 0x251   : > { %v969_v62 = vpop.f32.mrf.mxu3 }
 0x252   : > { %v974_v63 = vmul.f32 %v2489_v61, %v969_v62 }
 0x253   : > { %v1158_v6 = vpop.permute.xlu0 %1157 }
 0x254   : > { %v975_v0 = vpack.c.bf16 %v974_v63, %v974_v63 }
 0x256   : > { %2218 = vmatmul.msk.bf16.vlgmr.msra.gmra.mxu2 %vm921_vm0, %v975_v0 }
 0x259   : > { %v971_v1 = vpop.f32.mrf.mxu3 }
 0x261   : > { %v997_v3 = vpop.f32.mrf.mxu3 }
 0x262   : > { %v1001_v4 = vmul.f32 0.35355338, %v997_v3 }
 0x264   : > { %v1002_v5 = vadd.f32 %v1001_v4, %v2839_v43 }
 0x266   : > { %2222 = vmatmul.msk.bf16.vlgmr.msrb.gmra.mxu2 %vm921_vm0, %v1158_v6  ;;  %v1003_v7 = vsel %vm921_vm0, %v1002_v5, -inf  ;;  %v2315_v6 = vld [vmem:[%s3187_s10 + $0x70] sm:$0xf] }
 0x267   : > { %1004 = vmax.xlane.f32.xlu2 %v1003_v7  ;;  %v2446_v7 = vld [vmem:[%s3187_s10 + $0x74] sm:$0xf0] }
 0x269   : > { %v999_v8 = vpop.f32.mrf.mxu3 }
 0x26a   : > { %v2445_v8 = vld [vmem:[%s3187_s10 + $0x74] sm:$0xf] }
 0x271   : > { %v1097_v9 = vpop.f32.mrf.mxu3 }
 0x272   : > { %v1101_v10 = vmul.f32 0.35355338, %v1097_v9  ;;  %v2316_v9 = vor.u32 %v2446_v7, %v2315_v6  ;;  %v2427_v6 = vld [vmem:[%s3185_s8 + $0x20] sm:$0xff]  ;;  %v2426_v7 = vld [vmem:[%s3185_s8 + $0x18] sm:$0xff] }
 0x274   : > { %v1102_v11 = vadd.f32 %v1101_v10, %v2839_v43  ;;  %v2317_v10 = vld [vmem:[%s3187_s10 + $0x78] sm:$0xf0]  ;;  %1461 = vmatpush.bf16.msra.mxu2 %v2316_v9  ;;  %v2424_v9 = vld [vmem:[%s3185_s8 + $0x8] sm:$0xff] }
 0x276   : > { %v1103_v12 = vsel %vm921_vm0, %v1102_v11, -inf }
 0x277   : > { %1104 = vmax.xlane.f32.xlu0 %v1103_v12  ;;  %v2444_v12 = vld [vmem:[%s3187_s10 + $0x64] sm:$0xf0] }
 0x279   : > { %v1099_v13 = vpop.f32.mrf.mxu3 }
 0x27a   : > { %v2320_v13 = vor.u32 %v2445_v8, %v2317_v10  ;;  %v2425_v8 = vld [vmem:[%s3185_s8 + $0x10] sm:$0xff]  ;;  %v2423_v10 = vld [vmem:[%s3185_s8] sm:$0xff] }
 0x27f   : > { %1192 = vrot.lane.b32.xlu2 %v2832_v31, %s3206_s28 }
 0x2d9   : > { %v2858_v14 = vpop.f32.mrf.mxu2 }
 0x2da   : > { %v1005_v15 = vpop.xlane.xlu2 %1004 }
 0x2db   : > { %v1006_v16 = vsub.f32 %v1002_v5, %v1005_v15  ;;  %v2443_v15 = vld [vmem:[%s3187_s10 + $0x64] sm:$0xf] }
 0x2dd   : > { %v1007_v17 = vmul.f32 1.442695, %v1006_v16  ;;  %v2309_v16 = vld [vmem:[%s3187_s10 + $0x68] sm:$0xf0] }
 0x2df   : > { %2490 = vpow2.f32 %v1007_v17 }
 0x2e1   : > { %v1076_v18 = vpop.f32.mrf.mxu2 }
 0x2e2   : > { %v1193_v19 = vpop.permute.xlu2 %1192  ;;  %v2312_v18 = vor.u32 %v2443_v15, %v2309_v16 }
 0x2e3   : > { %v1198_v20 = vsel %vm956_vm1, %v1193_v19, 0  ;;  %v2299_v19 = vld [vmem:[%s3187_s10 + $0x50] sm:$0xf] }
 0x2e4   : > { %1207 = vmatpush.bf16.msrb.mxu3 %v1198_v20  ;;  %v2442_v20 = vld [vmem:[%s3187_s10 + $0x54] sm:$0xf0] }
 0x2e5   : > { %v2491_v21 = vpop.eup %2490 }
 0x2e6   : > { %v1009_v22 = vsel %vm921_vm0, %v2491_v21, 0.0  ;;  %v1012_v23 = vpack.c.bf16 %v2491_v21, %v2491_v21  ;;  %v2441_v21 = vld [vmem:[%s3187_s10 + $0x54] sm:$0xf] }
 0x2e7   : > { %1010 = vadd.xlane.f32.xlu0 %v1009_v22  ;;  %v2301_v22 = vld [vmem:[%s3187_s10 + $0x58] sm:$0xf0] }
 0x2e8   : > { %2216 = vmatmul.msk.bf16.vlgmr.msrb.gmra.mxu1 %vm921_vm0, %v1012_v23  ;;  %1474 = vmatpush.bf16.msra.mxu3 %v2320_v13  ;;  %v2300_v23 = vor.u32 %v2442_v20, %v2299_v19 }
 0x2e9   : > { %v1176_v24 = vpop.f32.mrf.mxu2  ;;  %1150 = vmatpush.bf16.msrb.mxu1 %v1141_v54  ;;  %v2267_v54 = vld [vmem:[%s3187_s10 + $0x10] sm:$0xf] }
 0x2ea   : > { %v1180_v25 = vmul.f32 0.35355338, %v1176_v24  ;;  %v1105_v26 = vpop.xlane.xlu0 %1104  ;;  %v2304_v24 = vor.u32 %v2441_v21, %v2301_v22 }
 0x2eb   : > { %v1106_v27 = vsub.f32 %v1102_v11, %v1105_v26  ;;  %v2307_v11 = vld [vmem:[%s3187_s10 + $0x60] sm:$0xf]  ;;  %v2440_v26 = vld [vmem:[%s3187_s10 + $0x44] sm:$0xf0] }
 0x2ec   : > { %v1181_v28 = vadd.f32 %v1180_v25, %v2839_v43  ;;  %v2308_v17 = vor.u32 %v2444_v12, %v2307_v11  ;;  %1475 = vmatpush.bf16.msra.mxu3 %v2312_v18  ;;  %v2291_v25 = vld [vmem:[%s3187_s10 + $0x40] sm:$0xf] }
 0x2ed   : > { %v1107_v29 = vmul.f32 1.442695, %v1106_v27  ;;  %v2439_v27 = vld [vmem:[%s3187_s10 + $0x44] sm:$0xf] }
 0x2ee   : > { %v1182_v30 = vsel %vm921_vm0, %v1181_v28, -inf  ;;  %1462 = vmatpush.bf16.msra.mxu2 %v2308_v17 }
 0x2ef   : > { %2492 = vpow2.f32 %v1107_v29  ;;  %1183 = vmax.xlane.f32.xlu1 %v1182_v30  ;;  %v2292_v29 = vor.u32 %v2440_v26, %v2291_v25 }
 0x2f0   : > { %1476 = vmatpush.bf16.msra.mxu3 %v2304_v24 }
 0x2f1   : > { %v1178_v32 = vpop.f32.mrf.mxu2 }
 0x2f2   : > { %1463 = vmatpush.bf16.msra.mxu2 %v2300_v23 }
 0x2f5   : > { %v2493_v33 = vpop.eup %2492 }
 0x2f6   : > { %v1109_v34 = vsel %vm921_vm0, %v2493_v33, 0.0  ;;  %v1112_v50 = vpack.c.bf16 %v2493_v33, %v2493_v33  ;;  %1464 = vmatpush.bf16.msra.mxu2 %v2292_v29 }
 0x2f7   : > { %1110 = vadd.xlane.f32.xlu2 %v1109_v34 }
 0x308   : > { %1113 = vrot.lane.b32.xlu1 %v2832_v31, %s3202_s26  ;;  %s3221_s26 = sld [smem:[#allocation3_spill]] }
 0x30e   : > { %s691_s28 = scalar_lea.vmem %s3221_s26, %s2789_s29  ;;  %s3225_s26 = smov 112  }
 0x35a   : > { %v1011_v37 = vpop.xlane.xlu0 %1010 }
 0x35b   : > { %2494 = vrcp.f32 %v1011_v37  ;;  %v2475_v37 = vld [vmem:[%s3220_s27] ss:$0 sm:$0xff] }
 0x361   : > { %v2495_v40 = vpop.eup %2494 }
 0x362   : > { %v1184_v38 = vpop.xlane.xlu1 %1183 }
 0x363   : > { %v1185_v39 = vsub.f32 %v1181_v28, %v1184_v38  ;;  %v2293_v28 = vld [vmem:[%s3187_s10 + $0x48] sm:$0xf0] }
 0x364   : > { %v2296_v32 = vor.u32 %v2439_v27, %v2293_v28  ;;  %v2476_v27 = vld [vmem:[%s3222_s6] ss:$0 sm:$0xff] }
 0x365   : > { %v1186_v41 = vmul.f32 1.442695, %v1185_v39  ;;  %v1033_v42 = vpop.f32.mrf.mxu1  ;;  %v1241_v39 = vunpack.c.l.bf16 %v2801_v2  ;;  %v2437_v2 = vld [vmem:[%s3187_s10 + $0x34] sm:$0xf] }
 0x366   : > { %v1038_v43 = vmul.f32 %v2495_v40, %v1033_v42  ;;  %1477 = vmatpush.bf16.msra.mxu3 %v2296_v32 }
 0x367   : > { %2496 = vpow2.f32 %v1186_v41 }
 0x368   : > { %v1039_v44 = vpack.c.bf16 %v1038_v43, %v1038_v43 }
 0x36a   : > { %2217 = vmatmul.msk.bf16.vlgmr.msra.gmra.mxu1 %vm921_vm0, %v1039_v44  ;;  %v1111_v59 = vpop.xlane.xlu2 %1110  ;;  %v2438_v44 = vld [vmem:[%s3187_s10 + $0x34] sm:$0xf0] }
 0x36b   : > { %1345 = vmatpush.bf16.msra.mxu1 %v2430_v53 }
 0x36d   : > { %v2497_v31 = vpop.eup %2496  ;;  %v1035_v45 = vpop.f32.mrf.mxu1 }
 0x36e   : > { %v1191_v46 = vpack.c.bf16 %v2497_v31, %v2497_v31  ;;  %v1188_v47 = vsel %vm921_vm0, %v2497_v31, 0.0  ;;  %v2285_v45 = vld [vmem:[%s3187_s10 + $0x38] sm:$0xf0] }
 0x36f   : > { %1189 = vadd.xlane.f32.xlu0 %v1188_v47  ;;  %v2275_v47 = vld [vmem:[%s3187_s10 + $0x20] sm:$0xf] }
 0x370   : > { %2223 = vmatmul.msk.bf16.vlgmr.msrb.gmra.mxu3 %vm921_vm0, %v1191_v46  ;;  %v2288_v46 = vor.u32 %v2437_v2, %v2285_v45 }
 0x372   : > { %1478 = vmatpush.bf16.msra.mxu3 %v2288_v46 }
 0x37a   : > { %v1114_v48 = vpop.permute.xlu1 %1113 }
 0x37b   : > { %v1119_v49 = vsel %vm956_vm1, %v1114_v48, 0  ;;  %v2436_v48 = vld [vmem:[%s3187_s10 + $0x24] sm:$0xf0] }
 0x37c   : > { %1128 = vmatpush.bf16.msrb.mxu0 %v1119_v49  ;;  %v2435_v49 = vld [vmem:[%s3187_s10 + $0x24] sm:$0xf] }
 0x37f   : > { %2220 = vmatmul.msk.bf16.vlgmr.msrb.gmra.mxu0 %vm921_vm0, %v1112_v50  ;;  %v2276_v50 = vor.u32 %v2436_v48, %v2275_v47  ;;  %v2478_v48 = vld [vmem:[%s3186_s9] ss:$0 sm:$0xff] }
 0x380   : > { %1229 = vmatpush.bf16.msra.mxu0 %v1220_v52  ;;  %v2280_v52 = vor.u32 %v2435_v49, %v2277_v51 }
 0x382   : > { %1479 = vmatpush.bf16.msra.mxu3 %v2280_v52 }
 0x3e2   : > { %v1190_v56 = vpop.xlane.xlu0 %1189 }
 0x3e3   : > { %2498 = vrcp.f32 %v1190_v56  ;;  %v2433_v56 = vld [vmem:[%s3187_s10 + $0x14] sm:$0xf] }
 0x3e4   : > { %2500 = vrcp.f32 %v1111_v59 }
 0x3e7   : > { %v1055_v55 = vpop.f32.mrf.mxu1 }
 0x3e8   : > { %v1075_v33 = vadd.f32 %v2858_v14, %v1055_v55  ;;  %v2283_v14 = vld [vmem:[%s3187_s10 + $0x30] sm:$0xf]  ;;  %v2434_v55 = vld [vmem:[%s3187_s10 + $0x14] sm:$0xf0] }
 0x3e9   : > { %v2499_v58 = vpop.eup %2498  ;;  %v2284_v31 = vor.u32 %v2438_v44, %v2283_v14 }
 0x3ea   : > { %v2501_v0 = vpop.eup %2500 }
 0x3eb   : > { %1465 = vmatpush.bf16.msra.mxu2 %v2284_v31 }
 0x3ef   : > { %v1057_v57 = vpop.f32.mrf.mxu1  ;;  %1466 = vmatpush.bf16.msra.mxu2 %v2276_v50 }
 0x3f0   : > { %v2268_v57 = vor.u32 %v2434_v55, %v2267_v54 }
 0x3f3   : > { %v1209_v60 = vpop.f32.mrf.mxu3  ;;  %1467 = vmatpush.bf16.msra.mxu2 %v2268_v57 }
 0x3f4   : > { %v1214_v61 = vmul.f32 %v2499_v58, %v1209_v60  ;;  %v2269_v58 = vld [vmem:[%s3187_s10 + $0x18] sm:$0xf0]  ;;  %v2429_v60 = vld [vmem:[%s3185_s8 + $0x30] sm:$0xff] }
 0x3f5   : > { %v2272_v59 = vor.u32 %v2433_v56, %v2269_v58  ;;  %1346 = vmatpush.bf16.msra.mxu1 %v2429_v60 }
 0x3f6   : > { %v1215_v62 = vpack.c.bf16 %v1214_v61, %v1214_v61  ;;  %v2259_v61 = vld [vmem:[%s3187_s10] sm:$0xf] }
 0x3f7   : > { %1480 = vmatpush.bf16.msra.mxu3 %v2272_v59  ;;  %v1488_v59 = vld [vmem:[%s3189_s12] sm:$0xf] }
 0x3f8   : > { %2224 = vmatmul.msk.bf16.vlgmr.msra.gmra.mxu0 %vm921_vm0, %v1215_v62  ;;  %v2432_v62 = vld [vmem:[%s3187_s10 + $0x4] sm:$0xf0]  ;;  %v1633_v60 = vsel %vm956_vm1, %v1488_v59, 0 }
 0x3fb   : > { %v1211_v63 = vpop.f32.mrf.mxu3 }
 0x3fc   : > { %v1130_v1 = vpop.f32.mrf.mxu0  ;;  %v2431_v63 = vld [vmem:[%s3187_s10 + $0x4] sm:$0xf] }
 0x3fd   : > { %v1135_v3 = vmul.f32 %v2501_v0, %v1130_v1  ;;  %v2260_v0 = vor.u32 %v2432_v62, %v2259_v61  ;;  %v2261_v1 = vld [vmem:[%s3187_s10 + $0x8] sm:$0xf0] }
 0x3ff   : > { %v1136_v4 = vpack.c.bf16 %v1135_v3, %v1135_v3  ;;  %v2264_v3 = vor.u32 %v2431_v63, %v2261_v1  ;;  %1468 = vmatpush.bf16.msra.mxu2 %v2260_v0 }
 0x401   : > { %2221 = vmatmul.msk.bf16.vlgmr.msrb.gmra.mxu1 %vm921_vm0, %v1136_v4  ;;  %v2428_v4 = vld [vmem:[%s3185_s8 + $0x28] sm:$0xff]  ;;  %1481 = vmatpush.bf16.msra.mxu3 %v2264_v3 }
 0x402   : > { %1347 = vmatpush.bf16.msra.mxu1 %v2428_v4 }
 0x404   : > { %v1132_v5 = vpop.f32.mrf.mxu0 }
 0x405   : > { %v698_v5 = vld [vmem:[%s691_s28] sm:$0xf] }
 0x406   : > { %1469 = vmatmul.bf16.vlgmr.msra.gmra.mxu2 %v698_v5  ;;  %1482 = vmatmul.bf16.vlgmr.msra.gmra.mxu3 %v698_v5 }
 0x407   : > { %1348 = vmatpush.bf16.msra.mxu1 %v2427_v6 }
 0x40b   : > { %1349 = vmatpush.bf16.msra.mxu1 %v2426_v7 }
 0x40f   : > { %1350 = vmatpush.bf16.msra.mxu1 %v2425_v8 }
 0x413   : > { %1351 = vmatpush.bf16.msra.mxu1 %v2424_v9 }
 0x417   : > { %1352 = vmatpush.bf16.msra.mxu1 %v2423_v10 }
 0x475   : > { %v1231_v30 = vpop.f32.mrf.mxu0 }
 0x47d   : > { %v1233_v34 = vpop.f32.mrf.mxu0 }
 0x47e   : > { %v1152_v35 = vpop.f32.mrf.mxu1 }
 0x47f   : > { %v1156_v36 = vadd.f32 %v1152_v35, %v1075_v33  ;;  %v1375_v35 = vld [vmem:[%s3188_s11] sm:$0x3] }
 0x481   : > { %v1235_v38 = vadd.f32 %v1231_v30, %v1156_v36  ;;  %v2477_v30 = vld [vmem:[%s3184_s7] ss:$0 sm:$0xff]  ;;  %v1377_v36 = vperm.slane %v1375_v35, 0 }
 0x483   : > { %v1240_v40 = vadd.f32 %v2475_v37, %v1235_v38  ;;  %v1378_v37 = vperm.slane %v1375_v35, 1 }
 0x485   : > { %v2940_v41 = vadd.f32 %v1241_v39, %v1240_v40 }
 0x486   : > { %v1154_v42 = vpop.f32.mrf.mxu1 }
 0x487   : > { %1245 = vadd.xlane.f32.xlu0 %v2940_v41  ;;  %v1248_v43 = vmul.f32 %v2940_v41, %v2940_v41 }
 0x489   : > { %1249 = vadd.xlane.f32.xlu1 %v1248_v43  ;;  %v1470_v38 = vpop.f32.mrf.mxu2  ;;  %v1483_v40 = vpop.f32.mrf.mxu3 }
 0x48a   : > { %v1471_v39 = vadd.f32 %v1470_v38, %v1377_v36 }
 0x491   : > { %v1472_v14 = vpop.f32.mrf.mxu2  ;;  %v1485_v2 = vpop.f32.mrf.mxu3 }
 0x492   : > { %v1489_v2 = vld [vmem:[%s3189_s12 + $0x4] sm:$0xf] }
 0x4fa   : > { %v1246_v11 = vpop.xlane.xlu0 %1245 }
 0x4fb   : > { %v1247_v12 = vmul.f32 0.03125, %v1246_v11 }
 0x4fc   : > { %v1250_v13 = vpop.xlane.xlu1 %1249 }
 0x4fd   : > { %v1252_v15 = vmul.f32 %v1247_v12, %v1247_v12  ;;  %v1251_v16 = vmul.f32 0.03125, %v1250_v13  ;;  %v1255_v26 = vsub.f32 %v2940_v41, %v1247_v12  ;;  %v1484_v41 = vadd.f32 %v1483_v40, %v1378_v37 }
 0x4ff   : > { %v1253_v17 = vsub.f32 %v1251_v16, %v1252_v15  ;;  %v1487_v42 = vpack.c.bf16 %v1484_v41, %v1471_v39 }
 0x501   : > { %v1254_v18 = vmax.f32 %v1253_v17, 0.0  ;;  %v1496_v43 = vsel %vm921_vm0, %v1487_v42, 0  ;;  %v1523_v44 = vunpack.c.h.b16 %v1487_v42  ;;  %v1552_v45 = vunpack.c.l.b16 %v1487_v42 }
 0x502   : > { %1505 = vmatpush.bf16.xpose.msrb.mxu0 %v1496_v43 }
 0x503   : > { %v1256_v19 = vadd.f32 1e-05, %v1254_v18  ;;  %v3036_v31 = vpack.c.b16 %v1523_v44, %v1523_v44  ;;  %v1553_v46 = vpack.c.b16 %v1552_v45, %v1552_v45 }
 0x505   : > { %2502 = vrsqrt.f32 %v1256_v19  ;;  %vm1263_vm4 = vweird.f32 %v1256_v19  ;;  %1728 = vrot.lane.b32.xlu1 %v1553_v46, %s3223_s1  ;;  %v1529_v47 = vsel %vm956_vm1, %v3036_v31, 0 }
 0x50a   : > { %1538 = vmatpush.bf16.msra.mxu0 %v1529_v47 }
 0x50b   : > { %v2503_v20 = vpop.eup %2502 }
 0x50c   : > { %v1258_v21 = vmul.f32 %v2503_v20, %v1256_v19  ;;  %vm1264_vm3 = vweird.f32 %v2503_v20 }
 0x50d   : > { %vm1265_vm5 = vmor %vm1263_vm4, %vm1264_vm3 }
 0x50e   : > { %v1259_v22 = vmul.f32 %v2503_v20, %v1258_v21 }
 0x510   : > { %v1260_v23 = vmul.f32 0.5, %v1259_v22 }
 0x512   : > { %v1261_v24 = vsub.f32 1.5, %v1260_v23 }
 0x514   : > { %v1262_v25 = vmul.f32 %v2503_v20, %v1261_v24 }
 0x516   : > { %v1266_v28 = vsel %vm1265_vm5, %v2503_v20, %v1262_v25 }
 0x517   : > { %v1267_v29 = vmul.f32 %v1266_v28, %v1255_v26 }
 0x519   : > { %v1271_v32 = vmul.f32 %v2476_v27, %v1267_v29 }
 0x51b   : > { %v3028_v33 = vadd.f32 %v2477_v30, %v1271_v32 }
 0x51d   : > { %v1276_v34 = vpack.c.bf16 %v3028_v33, %v3028_v33 }
 0x51f   : > { %1353 = vmatmul.bf16.vlgmr.msra.gmra.mxu1 %v1276_v34 }
 0x577   : > { %v1729_v1 = vpop.permute.xlu1 %1728 }
 0x578   : > { %v1734_v5 = vsel %vm921_vm0, %v1729_v1, 0  ;;  %v1490_v1 = vld [vmem:[%s3189_s12 + $0x8] sm:$0xf] }
 0x59c   : > { %v1354_v49 = vpop.f32.mrf.mxu1 }
 0x59d   : > { %v1355_v50 = vadd.f32 %v2478_v48, %v1354_v49 }
 0x59f   : > { %v1358_v51 = vpack.c.bf16 %v1355_v50, %v1355_v50 }
 0x5a1   : > { %2321 = vmatmul.msk.bf16.vlgmr.msrb.gmra.mxu0 %vm921_vm0, %v1358_v51  ;;  %v1548_v57 = vunpack.c.l.b16 %v1358_v51 }
 0x5a2   : > { %1642 = vmatpush.bf16.msrb.mxu0 %v1633_v60 }
 0x5a3   : > { %v1549_v58 = vpack.c.b16 %v1548_v57, %v1548_v57 }
 0x5a4   : > { %v1356_v52 = vpop.f32.mrf.mxu1 }
 0x61e   : > { %v1507_v53 = vpop.f32.mrf.mxu0 }
 0x61f   : > { %v1511_v54 = vmul.f32 0.35355338, %v1507_v53 }
 0x621   : > { %v1512_v55 = vsel %vm921_vm0, %v1511_v54, -inf }
 0x622   : > { %1513 = vmax.xlane.f32.xlu0 %v1512_v55 }
 0x626   : > { %v1509_v56 = vpop.f32.mrf.mxu0 }
 0x636   : > { %1554 = vrot.lane.b32.xlu0 %v1553_v46, %s3224_s25 }
 0x63e   : > { %1550 = vrot.lane.b32.xlu0 %v1549_v58, %s3224_s25 }
 0x646   : > { %1648 = vrot.lane.b32.xlu0 %v1549_v58, %s3225_s26 }
 0x64e   : > { %1726 = vrot.lane.b32.xlu0 %v1549_v58, %s3223_s1 }
 0x695   : > { %v1514_v61 = vpop.xlane.xlu0 %1513 }
 0x696   : > { %v1515_v62 = vsub.f32 %v1511_v54, %v1514_v61 }
 0x698   : > { %v1516_v63 = vmul.f32 1.442695, %v1515_v62 }
 0x69a   : > { %2504 = vpow2.f32 %v1516_v63 }
 0x6a0   : > { %v2505_v0 = vpop.eup %2504 }
 0x6a1   : > { %v1521_v3 = vpack.c.bf16 %v2505_v0, %v2505_v0  ;;  %v1518_v4 = vsel %vm921_vm0, %v2505_v0, 0.0 }
 0x6a2   : > { %1519 = vadd.xlane.f32.xlu2 %v1518_v4  ;;  %v1491_v4 = vld [vmem:[%s3189_s12 + $0xc] sm:$0xf] }
 0x6a3   : > { %2322 = vmatmul.msk.bf16.vlgmr.msra.gmra.mxu0 %vm921_vm0, %v1521_v3  ;;  %v1710_v3 = vsel %vm956_vm1, %v1490_v1, 0 }
 0x6a4   : > { %1743 = vmatpush.bf16.xpose.msra.mxu0 %v1734_v5  ;;  %v1788_v5 = vsel %vm956_vm1, %v1491_v4, 0  ;;  %v2455_v4 = vld [vmem:[%s3195_s18] sm:$0xff] }
 0x6a8   : > { %v1555_v6 = vpop.permute.xlu0 %1554 }
 0x6a9   : > { %v1560_v7 = vsel %vm921_vm0, %v1555_v6, 0 }
 0x6aa   : > { %1569 = vmatpush.bf16.xpose.msrb.mxu1 %v1560_v7 }
 0x6b0   : > { %v1551_v8 = vpop.permute.xlu0 %1550 }
 0x6b1   : > { %2323 = vmatmul.msk.bf16.vlgmr.msrb.gmra.mxu1 %vm921_vm0, %v1551_v8 }
 0x6b8   : > { %v1649_v17 = vpop.permute.xlu0 %1648 }
 0x6ba   : > { %1650 = vrot.lane.b32.xlu2 %v1553_v46, %s3225_s26  ;;  %v1614_v46 = vsel %vm956_vm1, %v1489_v2, 0 }
 0x6bb   : > { %1623 = vmatpush.bf16.msrb.mxu3 %v1614_v46 }
 0x6bf   : > { %1719 = vmatpush.bf16.msra.mxu3 %v1710_v3  ;;  %v2456_v3 = vld [vmem:[%s3195_s18 + $0x8] sm:$0xff] }
 0x6c0   : > { %v1727_v24 = vpop.permute.xlu0 %1726 }
 0x6c2   : > { %1586 = vrot.lane.b32.xlu2 %v3036_v31, %s3224_s25 }
 0x715   : > { %v1520_v9 = vpop.xlane.xlu2 %1519 }
 0x716   : > { %2506 = vrcp.f32 %v1520_v9 }
 0x71c   : > { %v2507_v12 = vpop.eup %2506 }
 0x71d   : > { %v1651_v10 = vpop.permute.xlu2 %1650 }
 0x71e   : > { %v1656_v11 = vsel %vm921_vm0, %v1651_v10, 0 }
 0x71f   : > { %1665 = vmatpush.bf16.xpose.msra.mxu1 %v1656_v11 }
 0x720   : > { %v1540_v13 = vpop.f32.mrf.mxu0 }
 0x721   : > { %v1545_v15 = vmul.f32 %v2507_v12, %v1540_v13 }
 0x723   : > { %v1546_v16 = vpack.c.bf16 %v1545_v15, %v1545_v15 }
 0x725   : > { %v1587_v18 = vpop.permute.xlu2 %1586  ;;  %2326 = vmatmul.msk.bf16.vlgmr.msrb.gmra.mxu0 %vm921_vm0, %v1546_v16 }
 0x726   : > { %v1592_v19 = vsel %vm956_vm1, %v1587_v18, 0  ;;  %2327 = vmatmul.msk.bf16.vlgmr.msra.gmra.mxu1 %vm921_vm0, %v1649_v17 }
 0x727   : > { %1601 = vmatpush.bf16.msrb.mxu2 %v1592_v19 }
 0x728   : > { %v1542_v20 = vpop.f32.mrf.mxu0 }
 0x72e   : > { %v1571_v21 = vpop.f32.mrf.mxu1 }
 0x72f   : > { %v1575_v22 = vmul.f32 0.35355338, %v1571_v21 }
 0x731   : > { %v1576_v23 = vsel %vm921_vm0, %v1575_v22, -inf }
 0x732   : > { %1577 = vmax.xlane.f32.xlu0 %v1576_v23 }
 0x735   : > { %2330 = vmatmul.msk.bf16.vlgmr.msra.gmra.mxu0 %vm921_vm0, %v1727_v24 }
 0x736   : > { %v1573_v25 = vpop.f32.mrf.mxu1 }
 0x737   : > { %v2479_v25 = vld [vmem:[%s3190_s13] ss:$0 sm:$0xff] }
 0x746   : > { %1682 = vrot.lane.b32.xlu0 %v3036_v31, %s3225_s26 }
 0x7a2   : > { %v3070_v26 = vpop.f32.mrf.mxu0 }
 0x7a3   : > { %v1667_v27 = vpop.f32.mrf.mxu1 }
 0x7a4   : > { %v1671_v28 = vmul.f32 0.35355338, %v1667_v27 }
 0x7a5   : > { %v1578_v29 = vpop.xlane.xlu0 %1577 }
 0x7a6   : > { %v1579_v30 = vsub.f32 %v1575_v22, %v1578_v29  ;;  %v1672_v32 = vsel %vm921_vm0, %v1671_v28, -inf }
 0x7a7   : > { %1673 = vmax.xlane.f32.xlu2 %v1672_v32 }
 0x7a8   : > { %v1580_v34 = vmul.f32 1.442695, %v1579_v30 }
 0x7aa   : > { %2508 = vpow2.f32 %v1580_v34  ;;  %v1646_v35 = vpop.f32.mrf.mxu0 }
 0x7ab   : > { %v1669_v36 = vpop.f32.mrf.mxu1  ;;  %v2454_v35 = vld [vmem:[%s3193_s16 + $0x38] sm:$0xff] }
 0x7ac   : > { %v2452_v36 = vld [vmem:[%s3193_s16 + $0x28] sm:$0xff] }
 0x7b0   : > { %v2509_v37 = vpop.eup %2508 }
 0x7b1   : > { %v1585_v38 = vpack.c.bf16 %v2509_v37, %v2509_v37  ;;  %v1582_v44 = vsel %vm921_vm0, %v2509_v37, 0.0  ;;  %v2450_v37 = vld [vmem:[%s3193_s16 + $0x18] sm:$0xff] }
 0x7b2   : > { %v1745_v39 = vpop.f32.mrf.mxu0 }
 0x7b3   : > { %v1749_v40 = vmul.f32 0.35355338, %v1745_v39  ;;  %2324 = vmatmul.msk.bf16.vlgmr.msrb.gmra.mxu2 %vm921_vm0, %v1585_v38  ;;  %v2449_v38 = vld [vmem:[%s3193_s16 + $0x10] sm:$0xff]  ;;  %v2448_v39 = vld [vmem:[%s3193_s16 + $0x8] sm:$0xff] }
 0x7b5   : > { %v1750_v41 = vsel %vm921_vm0, %v1749_v40, -inf }
 0x7b6   : > { %1751 = vmax.xlane.f32.xlu1 %v1750_v41 }
 0x7b8   : > { %v1683_v42 = vpop.permute.xlu0 %1682 }
 0x7b9   : > { %v1688_v43 = vsel %vm956_vm1, %v1683_v42, 0 }
 0x7ba   : > { %1697 = vmatpush.bf16.msra.mxu2 %v1688_v43  ;;  %v1747_v14 = vpop.f32.mrf.mxu0 }
 0x7be   : > { %1583 = vadd.xlane.f32.xlu1 %v1582_v44  ;;  %1797 = vmatpush.bf16.msrb.mxu2 %v1788_v5  ;;  %v2482_v5 = vld [vmem:[%s3194_s17] ss:$0 sm:$0xff] }
 0x7bf   : > { %1760 = vrot.lane.b32.xlu2 %v3036_v31, %s3223_s1 }
 0x81a   : > { %v1674_v45 = vpop.xlane.xlu2 %1673 }
 0x81b   : > { %v1675_v47 = vsub.f32 %v1671_v28, %v1674_v45  ;;  %v2462_v45 = vld [vmem:[%s3195_s18 + $0x38] sm:$0xff] }
 0x81c   : > { %1995 = vmatpush.bf16.msrb.mxu0 %v2462_v45 }
 0x81d   : > { %v1676_v48 = vmul.f32 1.442695, %v1675_v47  ;;  %v2461_v47 = vld [vmem:[%s3195_s18 + $0x30] sm:$0xff] }
 0x81f   : > { %2510 = vpow2.f32 %v1676_v48 }
 0x820   : > { %1996 = vmatpush.bf16.msrb.mxu0 %v2461_v47 }
 0x822   : > { %v1761_v49 = vpop.permute.xlu2 %1760 }
 0x823   : > { %v1766_v50 = vsel %vm956_vm1, %v1761_v49, 0  ;;  %v2460_v49 = vld [vmem:[%s3195_s18 + $0x28] sm:$0xff] }
 0x824   : > { %1775 = vmatpush.bf16.msrb.mxu1 %v1766_v50  ;;  %1997 = vmatpush.bf16.msrb.mxu0 %v2460_v49  ;;  %v2459_v50 = vld [vmem:[%s3195_s18 + $0x20] sm:$0xff] }
 0x825   : > { %v2511_v51 = vpop.eup %2510 }
 0x826   : > { %v1681_v52 = vpack.c.bf16 %v2511_v51, %v2511_v51  ;;  %v1678_v53 = vsel %vm921_vm0, %v2511_v51, 0.0 }
 0x827   : > { %1679 = vadd.xlane.f32.xlu0 %v1678_v53  ;;  %v2458_v53 = vld [vmem:[%s3195_s18 + $0x18] sm:$0xff] }
 0x828   : > { %2328 = vmatmul.msk.bf16.vlgmr.msra.gmra.mxu2 %vm921_vm0, %v1681_v52  ;;  %1998 = vmatpush.bf16.msrb.mxu0 %v2459_v50 }
 0x829   : > { %v1752_v31 = vpop.xlane.xlu1 %1751 }
 0x82a   : > { %v1753_v54 = vsub.f32 %v1749_v40, %v1752_v31  ;;  %v2447_v40 = vld [vmem:[%s3193_s16] sm:$0xff] }
 0x82c   : > { %v1754_v55 = vmul.f32 1.442695, %v1753_v54  ;;  %1999 = vmatpush.bf16.msrb.mxu0 %v2458_v53 }
 0x82e   : > { %2512 = vpow2.f32 %v1754_v55  ;;  %v2457_v55 = vld [vmem:[%s3195_s18 + $0x10] sm:$0xff] }
 0x830   : > { %2000 = vmatpush.bf16.msrb.mxu0 %v2457_v55 }
 0x831   : > { %v1584_v56 = vpop.xlane.xlu1 %1583 }
 0x832   : > { %2514 = vrcp.f32 %v1584_v56 }
 0x834   : > { %v2513_v57 = vpop.eup %2512  ;;  %2001 = vmatpush.bf16.msrb.mxu0 %v2456_v3 }
 0x835   : > { %v1759_v58 = vpack.c.bf16 %v2513_v57, %v2513_v57  ;;  %v1756_v59 = vsel %vm921_vm0, %v2513_v57, 0.0 }
 0x836   : > { %v1603_v60 = vpop.f32.mrf.mxu2  ;;  %1757 = vadd.xlane.f32.xlu1 %v1756_v59  ;;  %v2480_v59 = vld [vmem:[%s3191_s14] ss:$0 sm:$0xff] }
 0x837   : > { %2331 = vmatmul.msk.bf16.vlgmr.msrb.gmra.mxu1 %vm921_vm0, %v1759_v58 }
 0x838   : > { %v2515_v61 = vpop.eup %2514  ;;  %2002 = vmatpush.bf16.msrb.mxu0 %v2455_v4 }
 0x839   : > { %v1608_v62 = vmul.f32 %v2515_v61, %v1603_v60 }
 0x83b   : > { %v1609_v63 = vpack.c.bf16 %v1608_v62, %v1608_v62  ;;  %v2481_v62 = vld [vmem:[%s3192_s15] ss:$0 sm:$0xff] }
 0x83d   : > { %2325 = vmatmul.msk.bf16.vlgmr.msrb.gmra.mxu3 %vm921_vm0, %v1609_v63 }
 0x83e   : > { %v1605_v0 = vpop.f32.mrf.mxu2  ;;  %1912 = vmatpush.bf16.msrb.mxu3 %v2454_v35 }
 0x89a   : > { %v1680_v6 = vpop.xlane.xlu0 %1679 }
 0x89b   : > { %2516 = vrcp.f32 %v1680_v6 }
 0x8a1   : > { %v2517_v7 = vpop.eup %2516 }
 0x8a9   : > { %v1758_v8 = vpop.xlane.xlu1 %1757 }
 0x8aa   : > { %2518 = vrcp.f32 %v1758_v8 }
 0x8ab   : > { %v1699_v9 = vpop.f32.mrf.mxu2 }
 0x8ac   : > { %v1704_v10 = vmul.f32 %v2517_v7, %v1699_v9 }
 0x8ae   : > { %v1705_v11 = vpack.c.bf16 %v1704_v10, %v1704_v10 }
 0x8b0   : > { %2329 = vmatmul.msk.bf16.vlgmr.msra.gmra.mxu3 %vm921_vm0, %v1705_v11  ;;  %v2519_v13 = vpop.eup %2518  ;;  %v2483_v11 = vld [vmem:[%s3196_s19] ss:$0 sm:$0xff] }
 0x8b3   : > { %v1701_v12 = vpop.f32.mrf.mxu2 }
 0x8b4   : > { %v1777_v15 = vpop.f32.mrf.mxu1 }
 0x8b5   : > { %v1782_v16 = vmul.f32 %v2519_v13, %v1777_v15 }
 0x8b7   : > { %v1783_v17 = vpack.c.bf16 %v1782_v16, %v1782_v16 }
 0x8b9   : > { %2332 = vmatmul.msk.bf16.vlgmr.msrb.gmra.mxu2 %vm921_vm0, %v1783_v17 }
 0x8bc   : > { %v1779_v18 = vpop.f32.mrf.mxu1 }
 0x8c0   : > { %v1625_v19 = vpop.f32.mrf.mxu3 }
 0x8c1   : > { %v1645_v22 = vadd.f32 %v3070_v26, %v1625_v19  ;;  %v2453_v26 = vld [vmem:[%s3193_s16 + $0x30] sm:$0xff] }
 0x8c2   : > { %1913 = vmatpush.bf16.msrb.mxu3 %v2453_v26  ;;  %v2484_v26 = vld [vmem:[%s3197_s20] ss:$0 sm:$0xff] }
 0x8c6   : > { %1914 = vmatpush.bf16.msrb.mxu3 %v2452_v36 }
 0x8c8   : > { %v1627_v20 = vpop.f32.mrf.mxu3 }
 0x933   : > { %v1721_v21 = vpop.f32.mrf.mxu3 }
 0x934   : > { %v1725_v23 = vadd.f32 %v1721_v21, %v1645_v22 }
 0x93b   : > { %v1723_v24 = vpop.f32.mrf.mxu3 }
 0x93c   : > { %v1799_v27 = vpop.f32.mrf.mxu2 }
 0x93d   : > { %v1803_v28 = vadd.f32 %v1799_v27, %v1725_v23 }
 0x93f   : > { %v1808_v29 = vadd.f32 %v2479_v25, %v1803_v28 }
 0x941   : > { %v1809_v30 = vadd.f32 %v1808_v29, %v3028_v33  ;;  %v2451_v33 = vld [vmem:[%s3193_s16 + $0x20] sm:$0xff] }
 0x942   : > { %1915 = vmatpush.bf16.msrb.mxu3 %v2451_v33  ;;  %v2485_v33 = vld [vmem:[%s3198_s21] ss:$0 sm:$0xff] }
 0x943   : > { %1812 = vadd.xlane.f32.xlu1 %v1809_v30  ;;  %v1815_v32 = vmul.f32 %v1809_v30, %v1809_v30 }
 0x944   : > { %v1801_v34 = vpop.f32.mrf.mxu2 }
 0x945   : > { %1816 = vadd.xlane.f32.xlu2 %v1815_v32 }
 0x946   : > { %1916 = vmatpush.bf16.msrb.mxu3 %v2450_v37 }
 0x94a   : > { %1917 = vmatpush.bf16.msrb.mxu3 %v2449_v38 }
 0x94e   : > { %1918 = vmatpush.bf16.msrb.mxu3 %v2448_v39 }
 0x952   : > { %1919 = vmatpush.bf16.msrb.mxu3 %v2447_v40 }
 0x9b6   : > { %v1813_v41 = vpop.xlane.xlu1 %1812 }
 0x9b7   : > { %v1814_v42 = vmul.f32 0.03125, %v1813_v41 }
 0x9b8   : > { %v1817_v43 = vpop.xlane.xlu2 %1816 }
 0x9b9   : > { %v1819_v14 = vmul.f32 %v1814_v42, %v1814_v42  ;;  %v1818_v44 = vmul.f32 0.03125, %v1817_v43  ;;  %v1822_v58 = vsub.f32 %v1809_v30, %v1814_v42 }
 0x9bb   : > { %v1820_v2 = vsub.f32 %v1818_v44, %v1819_v14 }
 0x9bd   : > { %v1821_v46 = vmax.f32 %v1820_v2, 0.0 }
 0x9bf   : > { %v1823_v48 = vadd.f32 1e-05, %v1821_v46 }
 0x9c1   : > { %2520 = vrsqrt.f32 %v1823_v48  ;;  %vm1830_vm7 = vweird.f32 %v1823_v48 }
 0x9c7   : > { %v2521_v51 = vpop.eup %2520 }
 0x9c8   : > { %v1825_v52 = vmul.f32 %v2521_v51, %v1823_v48  ;;  %vm1831_vm6 = vweird.f32 %v2521_v51 }
 0x9c9   : > { %vm1832_vm8 = vmor %vm1830_vm7, %vm1831_vm6 }
 0x9ca   : > { %v1826_v31 = vmul.f32 %v2521_v51, %v1825_v52 }
 0x9cc   : > { %v1827_v54 = vmul.f32 0.5, %v1826_v31 }
 0x9ce   : > { %v1828_v56 = vsub.f32 1.5, %v1827_v54 }
 0x9d0   : > { %v1829_v57 = vmul.f32 %v2521_v51, %v1828_v56 }
 0x9d2   : > { %v1833_v60 = vsel %vm1832_vm8, %v2521_v51, %v1829_v57 }
 0x9d3   : > { %v1834_v61 = vmul.f32 %v1833_v60, %v1822_v58 }
 0x9d5   : > { %v1838_v63 = vmul.f32 %v2480_v59, %v1834_v61 }
 0x9d7   : > { %v1842_v0 = vadd.f32 %v2481_v62, %v1838_v63 }
 0x9d9   : > { %v1843_v1 = vpack.c.bf16 %v1842_v0, %v1842_v0 }
 0x9db   : > { %1920 = vmatmul.bf16.vlgmr.msrb.gmra.mxu3 %v1843_v1 }
 0xa5e   : > { %v1921_v6 = vpop.f32.mrf.mxu3 }
 0xa5f   : > { %v1922_v7 = vadd.f32 %v2482_v5, %v1921_v6 }
 0xa61   : > { %v1925_v8 = vmax.f32 %v1922_v7, 0.0 }
 0xa63   : > { %v1926_v9 = vpack.c.bf16 %v1925_v8, %v1925_v8 }
 0xa65   : > { %2003 = vmatmul.bf16.vlgmr.msrb.gmra.mxu0 %v1926_v9 }
 0xa66   : > { %v1923_v10 = vpop.f32.mrf.mxu3 }
 0xae2   : > { %v2004_v12 = vpop.f32.mrf.mxu0 }
 0xae3   : > { %v2005_v13 = vadd.f32 %v2483_v11, %v2004_v12 }
 0xae5   : > { %v2008_v15 = vadd.f32 %v2005_v13, %v1842_v0 }
 0xae7   : > { %2011 = vadd.xlane.f32.xlu1 %v2008_v15  ;;  %v2014_v17 = vmul.f32 %v2008_v15, %v2008_v15 }
 0xaea   : > { %v2006_v16 = vpop.f32.mrf.mxu0 }
 0xaef   : > { %2015 = vadd.xlane.f32.xlu1 %v2014_v17 }
 0xb5a   : > { %v2012_v18 = vpop.xlane.xlu1 %2011 }
 0xb5b   : > { %v2013_v19 = vmul.f32 0.03125, %v2012_v18 }
 0xb5d   : > { %v2018_v21 = vmul.f32 %v2013_v19, %v2013_v19  ;;  %v2021_v35 = vsub.f32 %v2008_v15, %v2013_v19 }
 0xb62   : > { %v2016_v20 = vpop.xlane.xlu1 %2015 }
 0xb63   : > { %v2017_v22 = vmul.f32 0.03125, %v2016_v20 }
 0xb65   : > { %v2019_v23 = vsub.f32 %v2017_v22, %v2018_v21 }
 0xb67   : > { %v2020_v24 = vmax.f32 %v2019_v23, 0.0 }
 0xb69   : > { %v2022_v25 = vadd.f32 1e-05, %v2020_v24 }
 0xb6b   : > { %2522 = vrsqrt.f32 %v2022_v25  ;;  %vm2029_vm10 = vweird.f32 %v2022_v25 }
 0xb71   : > { %v2523_v27 = vpop.eup %2522 }
 0xb72   : > { %v2024_v28 = vmul.f32 %v2523_v27, %v2022_v25  ;;  %vm2030_vm9 = vweird.f32 %v2523_v27 }
 0xb73   : > { %vm2031_vm11 = vmor %vm2029_vm10, %vm2030_vm9 }
 0xb74   : > { %v2025_v29 = vmul.f32 %v2523_v27, %v2024_v28 }
 0xb76   : > { %v2026_v30 = vmul.f32 0.5, %v2025_v29 }
 0xb78   : > { %v2027_v32 = vsub.f32 1.5, %v2026_v30 }
 0xb7a   : > { %v2028_v34 = vmul.f32 %v2523_v27, %v2027_v32 }
 0xb7c   : > { %v2032_v36 = vsel %vm2031_vm11, %v2523_v27, %v2028_v34 }
 0xb7d   : > { %v2033_v37 = vmul.f32 %v2032_v36, %v2021_v35 }
 0xb7f   : > { %v2037_v38 = vmul.f32 %v2484_v26, %v2033_v37 }
 0xb81   : > { %v2041_v39 = vadd.f32 %v2485_v33, %v2037_v38 }
 0xb83   : > { %v2042_v40 = vpack.c.bf16 %v2041_v39, %v2041_v39 }
 0xb85   : > { %2043 = vst [vmem:[%s695_s4] sm:$0xf] %v2042_v40 }
 0xb86 PF: > { %s32_s3 = sadd.s32 1, %s2530_s3  }
 0xb87   : > { %p29_p4 = scmp.ge.s32.totalorder %s32_s3, 4  }
 0xb89   :  { %31 = sbr.rel (!%p29_p4) target bundleno = 8 (0x8), region = 141 }

</bundles_post_ra>
